<compile_context>
chip_gen: v5e
topology: v5e:2x2
jax: 0.10.0
libtpu: 0.0.40
codegen_flags: <defaults>
</compile_context>

<pallas_src>
import functools
import math

import jax
import jax.numpy as jnp
import numpy as np
from jax.experimental import pallas as pl
from jax.experimental.pallas import tpu as pltpu

MAX_LEN = 64


# --------------------------------------------------------------------------
# Relative position buckets (glue, plain JAX; mirrors T5RelativePositionBias)
# --------------------------------------------------------------------------
def _relative_position_bucket(relative_position, causal=False, num_buckets=32,
                              max_distance=MAX_LEN):
    ret = 0
    n = -relative_position
    if not causal:
        num_buckets //= 2
        ret += (n < 0).astype(jnp.int32) * num_buckets
        n = jnp.abs(n)
    else:
        n = jnp.maximum(n, 0)
    max_exact = num_buckets // 2
    is_small = n < max_exact
    # clamp n>=1 before the log: avoids int-casting -inf on the zero-offset
    # diagonal (that branch is masked out by is_small anyway).
    val_if_large = max_exact + (
        jnp.log(jnp.maximum(n, 1).astype(jnp.float32) / max_exact)
        / math.log(max_distance / max_exact)
        * (num_buckets - max_exact)
    ).astype(jnp.int32)
    val_if_large = jnp.minimum(val_if_large, num_buckets - 1)
    ret = ret + jnp.where(is_small, n, val_if_large)
    return ret


def relative_position_bias_table(seq_len, rel_emb, causal=False, num_buckets=32,
                                 max_distance=MAX_LEN):
    """Returns bias of shape (heads, seq_len, seq_len) -- NOT yet scaled."""
    q_pos = jnp.arange(seq_len, dtype=jnp.int32)
    k_pos = jnp.arange(seq_len, dtype=jnp.int32)
    rel_pos = k_pos[None, :] - q_pos[:, None]                 # (i, j)
    rp_bucket = _relative_position_bucket(rel_pos, causal=causal,
                                          num_buckets=num_buckets,
                                          max_distance=max_distance)
    values = rel_emb[rp_bucket]                               # (i, j, heads)
    return jnp.transpose(values, (2, 0, 1))                   # (heads, i, j)


# --------------------------------------------------------------------------
# Batch-chunk selection: Bc*N ~ full MXU height, >= 2 grid chunks if possible.
# --------------------------------------------------------------------------
def _pick_batch_chunk(batch, seq, target_rows=256):
    divisors = [d for d in range(1, batch + 1) if batch % d == 0]
    ok = [d for d in divisors if d * seq <= target_rows] or [1]
    best = max(ok)
    if batch >= 2 and batch // best < 2:
        two_plus = [d for d in ok if batch // d >= 2]
        if two_plus:
            best = max(two_plus)          # keep >= 2 parallel chunks (v7x 2 TCs)
    return best


# --------------------------------------------------------------------------
# Pallas kernel: one batch chunk (Bc elements), all heads batched
# --------------------------------------------------------------------------
def _t5_attn_kernel(scale, heads, dim_head, bc, seq,
                    x_ref, wqkv_ref, bias_ref, wo_ref, bo_ref, o_ref,
                    qkv_scr, out_scr):
    hb = heads * bc                      # merged (head, batch-in-chunk) batch dim

    # ---- Fused QKV projection: ONE (Bc*N, dim) @ (dim, 3*inner) MXU matmul,
    # bf16 operands, f32 accumulation.
    qkv = jnp.dot(x_ref[...], wqkv_ref[...],
                  preferred_element_type=jnp.float32)         # (M, 3*inner) f32
    qkv_bf = qkv.astype(jnp.bfloat16)                         # single f32->bf16 pass

    # ---- Head-major re-layout via VMEM scratch: one aligned 128-lane slice
    # store per (q/k/v, head).  No jnp.concatenate / transpose relayouts.
    for g in range(3 * heads):
        lo = g * dim_head
        qkv_scr[g] = qkv_bf[:, lo:lo + dim_head]              # (M, dim_head)
    qkv3 = qkv_scr[...]                                       # (3*heads, M, d)
    q = qkv3[:heads].reshape(hb, seq, dim_head)               # free leading regroup
    k = qkv3[heads:2 * heads].reshape(hb, seq, dim_head)
    v = qkv3[2 * heads:].reshape(hb, seq, dim_head)

    # ---- Attention logits, one batched contraction over (head, batch elem).
    sim = jnp.einsum('bqd,bkd->bqk', q, k,
                     preferred_element_type=jnp.float32)      # (hb, N, N) f32
    # q*scale @ k^T + bias*scale  ==  (q@k^T + bias) * scale
    sim = (sim + bias_ref[...].astype(jnp.float32)) * scale

    # ---- Softmax over keys (f32 on VPU/EUP).
    # NOTE: approx reciprocal -> rows sum to 1 only to ~1e-3 (inference-grade).
    m = jnp.max(sim, axis=-1, keepdims=True)
    p = jnp.exp(sim - m)
    attn = (p * pl.reciprocal(jnp.sum(p, axis=-1, keepdims=True),
                              approx=True)).astype(jnp.bfloat16)

    # ---- attn @ v, one batched contraction over (head, batch elem).
    out = jnp.einsum('bqk,bkd->bqd', attn, v,
                     preferred_element_type=jnp.float32)      # (hb, N, d) f32
    out = out.astype(jnp.bfloat16).reshape(heads, bc * seq, dim_head)

    # ---- Back to (M, heads*dim_head): aligned 128-lane offset stores.
    for h in range(heads):
        out_scr[:, h * dim_head:(h + 1) * dim_head] = out[h]

    # ---- Fused output projection: ONE (M, inner) @ (inner, dim) matmul + bias.
    o = jnp.dot(out_scr[...], wo_ref[...],
                preferred_element_type=jnp.float32) + bo_ref[...]
    o_ref[...] = o.astype(o_ref.dtype)


def t5_self_attention(x, wq, wk, wv, wo, bo, rel_bias, *, heads, dim_head,
                      target_rows=256):
    """x: (B, N, dim); w{q,k,v}: (dim, heads*dim_head); wo: (heads*dim_head, dim);
    bo: (dim,); rel_bias: (heads, N, N). Returns (B, N, dim)."""
    B, N, dim = x.shape
    inner = heads * dim_head
    scale = dim_head ** (-0.5)

    bc = _pick_batch_chunk(B, N, target_rows)     # batch elements per grid chunk
    chunks = B // bc
    M = bc * N                                    # matmul M rows per chunk

    # Wrapper-side layout plumbing (not compute): flatten batch into rows,
    # fuse the QKV weights, store everything feeding the MXU in bf16
    # (f32 accumulation in-kernel), tile the per-head bias to the merged
    # (head, batch-in-chunk) batch dim the kernel uses.
    x2 = x.reshape(B * N, dim).astype(jnp.bfloat16)
    wqkv = jnp.concatenate([wq, wk, wv], axis=1).astype(jnp.bfloat16)
    wo_b = wo.astype(jnp.bfloat16)
    bo2 = bo.reshape(1, dim).astype(jnp.float32)
    bias_t = jnp.repeat(rel_bias, bc, axis=0).astype(jnp.bfloat16)  # (heads*bc, N, N)

    kernel = functools.partial(_t5_attn_kernel, scale, heads, dim_head, bc, N)

    grid_spec = pltpu.PrefetchScalarGridSpec(
        num_scalar_prefetch=0,
        grid=(chunks,),
        in_specs=[
            pl.BlockSpec((M, dim), lambda c: (c, 0)),             # x rows (bf16)
            pl.BlockSpec((dim, 3 * inner), lambda c: (0, 0)),     # fused wqkv (resident)
            pl.BlockSpec((heads * bc, N, N), lambda c: (0, 0, 0)),# rel bias (resident)
            pl.BlockSpec((inner, dim), lambda c: (0, 0)),         # wo (resident)
            pl.BlockSpec((1, dim), lambda c: (0, 0)),             # bo
        ],
        out_specs=pl.BlockSpec((M, dim), lambda c: (c, 0)),
        scratch_shapes=[
            pltpu.VMEM((3 * heads, M, dim_head), jnp.bfloat16),   # head-major q/k/v
            pltpu.VMEM((M, inner), jnp.bfloat16),                 # concat'd heads out
        ],
    )

    out = pl.pallas_call(
        kernel,
        out_shape=jax.ShapeDtypeStruct((B * N, dim), x.dtype),
        grid_spec=grid_spec,
        compiler_params=pltpu.CompilerParams(
            dimension_semantics=("parallel",)),   # batch-chunk parallel (2 TCs on v7x)
    )(x2, wqkv, bias_t, wo_b, bo2)
    return out.reshape(B, N, dim)


# --------------------------------------------------------------------------
# Pure-JAX reference (f32; mirrors the PyTorch module exactly)
# --------------------------------------------------------------------------
def t5_self_attention_ref(x, wq, wk, wv, wo, bo, rel_bias, *, heads, dim_head):
    B, N, dim = x.shape
    scale = dim_head ** (-0.5)
    q = (x @ wq).reshape(B, N, heads, dim_head).transpose(0, 2, 1, 3) * scale
    k = (x @ wk).reshape(B, N, heads, dim_head).transpose(0, 2, 1, 3)
    v = (x @ wv).reshape(B, N, heads, dim_head).transpose(0, 2, 1, 3)
    sim = jnp.einsum('bhid,bhjd->bhij', q, k) + rel_bias[None] * scale
    attn = jax.nn.softmax(sim, axis=-1)
    out = jnp.einsum('bhij,bhjd->bhid', attn, v)
    out = out.transpose(0, 2, 1, 3).reshape(B, N, heads * dim_head)
    return out @ wo + bo


# --------------------------------------------------------------------------
if __name__ == "__main__":
    # Small shapes consistent with the module (dim/heads/dim_head are ctor args).
    # B=16, N=16 -> chunk picker gives Bc=8 (M=128 matmul rows) with 2 parallel
    # grid chunks.  dim_head=128 keeps head slices lane-tile aligned.
    B, N = 16, 16
    DIM, HEADS, DIM_HEAD = 128, 4, 128
    INNER = HEADS * DIM_HEAD
    NUM_BUCKETS = 32

    key = jax.random.PRNGKey(0)
    kx, kq, kk, kv, kwo, kbo, kemb = jax.random.split(key, 7)

    x = jax.random.normal(kx, (B, N, DIM), dtype=jnp.float32)
    wq = jax.random.normal(kq, (DIM, INNER), dtype=jnp.float32) * 0.02
    wk = jax.random.normal(kk, (DIM, INNER), dtype=jnp.float32) * 0.02
    wv = jax.random.normal(kv, (DIM, INNER), dtype=jnp.float32) * 0.02
    wo = jax.random.normal(kwo, (INNER, DIM), dtype=jnp.float32) * 0.02
    bo = jax.random.normal(kbo, (DIM,), dtype=jnp.float32) * 0.02
    rel_emb = jax.random.normal(kemb, (NUM_BUCKETS, HEADS), dtype=jnp.float32) * 0.02

    rel_bias = relative_position_bias_table(N, rel_emb, causal=False,
                                            num_buckets=NUM_BUCKETS,
                                            max_distance=MAX_LEN)

    out = t5_self_attention(x, wq, wk, wv, wo, bo, rel_bias,
                            heads=HEADS, dim_head=DIM_HEAD)
    out = jax.block_until_ready(out)

    ref = t5_self_attention_ref(x, wq, wk, wv, wo, bo, rel_bias,
                                heads=HEADS, dim_head=DIM_HEAD)
    # bf16 matmul operands (f32 accumulate) + approx reciprocal => relaxed
    # tolerance vs the pure-f32 reference.
    np.testing.assert_allclose(np.asarray(out), np.asarray(ref),
                               rtol=2e-2, atol=2e-2)
    print("KERNEL_OK")
</pallas_src>

<mosaic_0001>
module attributes {stable_mosaic.version = 11 : i64} {
  func.func @_t5_attn_kernel(%arg0: i32, %arg1: memref<128x128xbf16, #tpu.memory_space<vmem>>, %arg2: memref<128x1536xbf16, #tpu.memory_space<vmem>>, %arg3: memref<32x16x16xbf16, #tpu.memory_space<vmem>>, %arg4: memref<512x128xbf16, #tpu.memory_space<vmem>>, %arg5: memref<1x128xf32, #tpu.memory_space<vmem>>, %arg6: memref<128x128xf32, #tpu.memory_space<vmem>>, %arg7: memref<12x128x128xbf16, #tpu.memory_space<vmem>>, %arg8: memref<128x512xbf16, #tpu.memory_space<vmem>>) attributes {dimension_semantics = [#tpu.dimension_semantics<parallel>], iteration_bounds = array<i64: 2>, scalar_prefetch = 0 : i64, scratch_operands = 2 : i64, tpu.core_type = #tpu.core_type<tc>, window_params = [{transform_indices = @transform_0, window_bounds = array<i64: 128, 128>}, {pipeline_mode = #tpu.pipeline_mode<synchronous>, transform_indices = @transform_1, window_bounds = array<i64: 128, 1536>}, {pipeline_mode = #tpu.pipeline_mode<synchronous>, transform_indices = @transform_2, window_bounds = array<i64: 32, 16, 16>}, {pipeline_mode = #tpu.pipeline_mode<synchronous>, transform_indices = @transform_3, window_bounds = array<i64: 512, 128>}, {pipeline_mode = #tpu.pipeline_mode<synchronous>, transform_indices = @transform_4, window_bounds = array<i64: 1, 128>}, {transform_indices = @transform_5, window_bounds = array<i64: 128, 128>}]} {
    %c0 = arith.constant 0 : index
    %c0_0 = arith.constant 0 : index
    %0 = vector.load %arg1[%c0, %c0_0] : memref<128x128xbf16, #tpu.memory_space<vmem>>, vector<128x128xbf16>
    %c0_1 = arith.constant 0 : index
    %c0_2 = arith.constant 0 : index
    %1 = vector.load %arg2[%c0_1, %c0_2] : memref<128x1536xbf16, #tpu.memory_space<vmem>>, vector<128x1536xbf16>
    %cst = arith.constant dense<0.000000e+00> : vector<128x1536xf32>
    %2 = tpu.matmul %0, %1, %cst {dimension_numbers = #tpu.dot_dimension_numbers<[1], [0], [0], [1], [0, 0, 1, 1], [], []>} : vector<128x128xbf16>, vector<128x1536xbf16>, vector<128x1536xf32> -> vector<128x1536xf32>
    %3 = arith.truncf %2 : vector<128x1536xf32> to vector<128x1536xbf16>
    %4 = vector.extract_strided_slice %3 {offsets = [0, 0], sizes = [128, 128], strides = [1, 1]} : vector<128x1536xbf16> to vector<128x128xbf16>
    %c0_3 = arith.constant 0 : index
    %c0_4 = arith.constant 0 : index
    %c0_5 = arith.constant 0 : index
    %5 = vector.load %arg7[%c0_3, %c0_4, %c0_5] : memref<12x128x128xbf16, #tpu.memory_space<vmem>>, vector<1x128x128xbf16>
    %6 = vector.shape_cast %5 : vector<1x128x128xbf16> to vector<128x128xbf16>
    %7 = vector.shape_cast %4 : vector<128x128xbf16> to vector<1x128x128xbf16>
    tpu.vector_store %arg7[%c0_3, %c0_4, %c0_5], %7 {strides = array<i32>} : memref<12x128x128xbf16, #tpu.memory_space<vmem>>, vector<1x128x128xbf16>,
    %8 = vector.extract_strided_slice %3 {offsets = [0, 128], sizes = [128, 128], strides = [1, 1]} : vector<128x1536xbf16> to vector<128x128xbf16>
    %c1 = arith.constant 1 : index
    %c0_6 = arith.constant 0 : index
    %c0_7 = arith.constant 0 : index
    %9 = vector.load %arg7[%c1, %c0_6, %c0_7] : memref<12x128x128xbf16, #tpu.memory_space<vmem>>, vector<1x128x128xbf16>
    %10 = vector.shape_cast %9 : vector<1x128x128xbf16> to vector<128x128xbf16>
    %11 = vector.shape_cast %8 : vector<128x128xbf16> to vector<1x128x128xbf16>
    tpu.vector_store %arg7[%c1, %c0_6, %c0_7], %11 {strides = array<i32>} : memref<12x128x128xbf16, #tpu.memory_space<vmem>>, vector<1x128x128xbf16>,
    %12 = vector.extract_strided_slice %3 {offsets = [0, 256], sizes = [128, 128], strides = [1, 1]} : vector<128x1536xbf16> to vector<128x128xbf16>
    %c2 = arith.constant 2 : index
    %c0_8 = arith.constant 0 : index
    %c0_9 = arith.constant 0 : index
    %13 = vector.load %arg7[%c2, %c0_8, %c0_9] : memref<12x128x128xbf16, #tpu.memory_space<vmem>>, vector<1x128x128xbf16>
    %14 = vector.shape_cast %13 : vector<1x128x128xbf16> to vector<128x128xbf16>
    %15 = vector.shape_cast %12 : vector<128x128xbf16> to vector<1x128x128xbf16>
    tpu.vector_store %arg7[%c2, %c0_8, %c0_9], %15 {strides = array<i32>} : memref<12x128x128xbf16, #tpu.memory_space<vmem>>, vector<1x128x128xbf16>,
    %16 = vector.extract_strided_slice %3 {offsets = [0, 384], sizes = [128, 128], strides = [1, 1]} : vector<128x1536xbf16> to vector<128x128xbf16>
    %c3 = arith.constant 3 : index
    %c0_10 = arith.constant 0 : index
    %c0_11 = arith.constant 0 : index
    %17 = vector.load %arg7[%c3, %c0_10, %c0_11] : memref<12x128x128xbf16, #tpu.memory_space<vmem>>, vector<1x128x128xbf16>
    %18 = vector.shape_cast %17 : vector<1x128x128xbf16> to vector<128x128xbf16>
    %19 = vector.shape_cast %16 : vector<128x128xbf16> to vector<1x128x128xbf16>
    tpu.vector_store %arg7[%c3, %c0_10, %c0_11], %19 {strides = array<i32>} : memref<12x128x128xbf16, #tpu.memory_space<vmem>>, vector<1x128x128xbf16>,
    %20 = vector.extract_strided_slice %3 {offsets = [0, 512], sizes = [128, 128], strides = [1, 1]} : vector<128x1536xbf16> to vector<128x128xbf16>
    %c4 = arith.constant 4 : index
    %c0_12 = arith.constant 0 : index
    %c0_13 = arith.constant 0 : index
    %21 = vector.load %arg7[%c4, %c0_12, %c0_13] : memref<12x128x128xbf16, #tpu.memory_space<vmem>>, vector<1x128x128xbf16>
    %22 = vector.shape_cast %21 : vector<1x128x128xbf16> to vector<128x128xbf16>
    %23 = vector.shape_cast %20 : vector<128x128xbf16> to vector<1x128x128xbf16>
    tpu.vector_store %arg7[%c4, %c0_12, %c0_13], %23 {strides = array<i32>} : memref<12x128x128xbf16, #tpu.memory_space<vmem>>, vector<1x128x128xbf16>,
    %24 = vector.extract_strided_slice %3 {offsets = [0, 640], sizes = [128, 128], strides = [1, 1]} : vector<128x1536xbf16> to vector<128x128xbf16>
    %c5 = arith.constant 5 : index
    %c0_14 = arith.constant 0 : index
    %c0_15 = arith.constant 0 : index
    %25 = vector.load %arg7[%c5, %c0_14, %c0_15] : memref<12x128x128xbf16, #tpu.memory_space<vmem>>, vector<1x128x128xbf16>
    %26 = vector.shape_cast %25 : vector<1x128x128xbf16> to vector<128x128xbf16>
    %27 = vector.shape_cast %24 : vector<128x128xbf16> to vector<1x128x128xbf16>
    tpu.vector_store %arg7[%c5, %c0_14, %c0_15], %27 {strides = array<i32>} : memref<12x128x128xbf16, #tpu.memory_space<vmem>>, vector<1x128x128xbf16>,
    %28 = vector.extract_strided_slice %3 {offsets = [0, 768], sizes = [128, 128], strides = [1, 1]} : vector<128x1536xbf16> to vector<128x128xbf16>
    %c6 = arith.constant 6 : index
    %c0_16 = arith.constant 0 : index
    %c0_17 = arith.constant 0 : index
    %29 = vector.load %arg7[%c6, %c0_16, %c0_17] : memref<12x128x128xbf16, #tpu.memory_space<vmem>>, vector<1x128x128xbf16>
    %30 = vector.shape_cast %29 : vector<1x128x128xbf16> to vector<128x128xbf16>
    %31 = vector.shape_cast %28 : vector<128x128xbf16> to vector<1x128x128xbf16>
    tpu.vector_store %arg7[%c6, %c0_16, %c0_17], %31 {strides = array<i32>} : memref<12x128x128xbf16, #tpu.memory_space<vmem>>, vector<1x128x128xbf16>,
    %32 = vector.extract_strided_slice %3 {offsets = [0, 896], sizes = [128, 128], strides = [1, 1]} : vector<128x1536xbf16> to vector<128x128xbf16>
    %c7 = arith.constant 7 : index
    %c0_18 = arith.constant 0 : index
    %c0_19 = arith.constant 0 : index
    %33 = vector.load %arg7[%c7, %c0_18, %c0_19] : memref<12x128x128xbf16, #tpu.memory_space<vmem>>, vector<1x128x128xbf16>
    %34 = vector.shape_cast %33 : vector<1x128x128xbf16> to vector<128x128xbf16>
    %35 = vector.shape_cast %32 : vector<128x128xbf16> to vector<1x128x128xbf16>
    tpu.vector_store %arg7[%c7, %c0_18, %c0_19], %35 {strides = array<i32>} : memref<12x128x128xbf16, #tpu.memory_space<vmem>>, vector<1x128x128xbf16>,
    %36 = vector.extract_strided_slice %3 {offsets = [0, 1024], sizes = [128, 128], strides = [1, 1]} : vector<128x1536xbf16> to vector<128x128xbf16>
    %c8 = arith.constant 8 : index
    %c0_20 = arith.constant 0 : index
    %c0_21 = arith.constant 0 : index
    %37 = vector.load %arg7[%c8, %c0_20, %c0_21] : memref<12x128x128xbf16, #tpu.memory_space<vmem>>, vector<1x128x128xbf16>
    %38 = vector.shape_cast %37 : vector<1x128x128xbf16> to vector<128x128xbf16>
    %39 = vector.shape_cast %36 : vector<128x128xbf16> to vector<1x128x128xbf16>
    tpu.vector_store %arg7[%c8, %c0_20, %c0_21], %39 {strides = array<i32>} : memref<12x128x128xbf16, #tpu.memory_space<vmem>>, vector<1x128x128xbf16>,
    %40 = vector.extract_strided_slice %3 {offsets = [0, 1152], sizes = [128, 128], strides = [1, 1]} : vector<128x1536xbf16> to vector<128x128xbf16>
    %c9 = arith.constant 9 : index
    %c0_22 = arith.constant 0 : index
    %c0_23 = arith.constant 0 : index
    %41 = vector.load %arg7[%c9, %c0_22, %c0_23] : memref<12x128x128xbf16, #tpu.memory_space<vmem>>, vector<1x128x128xbf16>
    %42 = vector.shape_cast %41 : vector<1x128x128xbf16> to vector<128x128xbf16>
    %43 = vector.shape_cast %40 : vector<128x128xbf16> to vector<1x128x128xbf16>
    tpu.vector_store %arg7[%c9, %c0_22, %c0_23], %43 {strides = array<i32>} : memref<12x128x128xbf16, #tpu.memory_space<vmem>>, vector<1x128x128xbf16>,
    %44 = vector.extract_strided_slice %3 {offsets = [0, 1280], sizes = [128, 128], strides = [1, 1]} : vector<128x1536xbf16> to vector<128x128xbf16>
    %c10 = arith.constant 10 : index
    %c0_24 = arith.constant 0 : index
    %c0_25 = arith.constant 0 : index
    %45 = vector.load %arg7[%c10, %c0_24, %c0_25] : memref<12x128x128xbf16, #tpu.memory_space<vmem>>, vector<1x128x128xbf16>
    %46 = vector.shape_cast %45 : vector<1x128x128xbf16> to vector<128x128xbf16>
    %47 = vector.shape_cast %44 : vector<128x128xbf16> to vector<1x128x128xbf16>
    tpu.vector_store %arg7[%c10, %c0_24, %c0_25], %47 {strides = array<i32>} : memref<12x128x128xbf16, #tpu.memory_space<vmem>>, vector<1x128x128xbf16>,
    %48 = vector.extract_strided_slice %3 {offsets = [0, 1408], sizes = [128, 128], strides = [1, 1]} : vector<128x1536xbf16> to vector<128x128xbf16>
    %c11 = arith.constant 11 : index
    %c0_26 = arith.constant 0 : index
    %c0_27 = arith.constant 0 : index
    %49 = vector.load %arg7[%c11, %c0_26, %c0_27] : memref<12x128x128xbf16, #tpu.memory_space<vmem>>, vector<1x128x128xbf16>
    %50 = vector.shape_cast %49 : vector<1x128x128xbf16> to vector<128x128xbf16>
    %51 = vector.shape_cast %48 : vector<128x128xbf16> to vector<1x128x128xbf16>
    tpu.vector_store %arg7[%c11, %c0_26, %c0_27], %51 {strides = array<i32>} : memref<12x128x128xbf16, #tpu.memory_space<vmem>>, vector<1x128x128xbf16>,
    %c0_28 = arith.constant 0 : index
    %c0_29 = arith.constant 0 : index
    %c0_30 = arith.constant 0 : index
    %52 = vector.load %arg7[%c0_28, %c0_29, %c0_30] : memref<12x128x128xbf16, #tpu.memory_space<vmem>>, vector<12x128x128xbf16>
    %53 = vector.extract_strided_slice %52 {offsets = [0, 0, 0], sizes = [4, 128, 128], strides = [1, 1, 1]} : vector<12x128x128xbf16> to vector<4x128x128xbf16>
    %54 = vector.shape_cast %53 : vector<4x128x128xbf16> to vector<32x16x128xbf16>
    %55 = vector.extract_strided_slice %52 {offsets = [4, 0, 0], sizes = [4, 128, 128], strides = [1, 1, 1]} : vector<12x128x128xbf16> to vector<4x128x128xbf16>
    %56 = vector.shape_cast %55 : vector<4x128x128xbf16> to vector<32x16x128xbf16>
    %57 = vector.extract_strided_slice %52 {offsets = [8, 0, 0], sizes = [4, 128, 128], strides = [1, 1, 1]} : vector<12x128x128xbf16> to vector<4x128x128xbf16>
    %58 = vector.shape_cast %57 : vector<4x128x128xbf16> to vector<32x16x128xbf16>
    "tpu.trace_start"() <{level = 10 : i32, message = "bqd,bkd->bqk"}> : () -> ()
    %cst_31 = arith.constant dense<0.000000e+00> : vector<32x16x16xf32>
    %59 = tpu.matmul %54, %56, %cst_31 {dimension_numbers = #tpu.dot_dimension_numbers<[2], [2], [1], [1], [0, 0, 0, 1, 1, 1], [0], [0]>} : vector<32x16x128xbf16>, vector<32x16x128xbf16>, vector<32x16x16xf32> -> vector<32x16x16xf32>
    "tpu.trace_stop"() : () -> ()
    %c0_32 = arith.constant 0 : index
    %c0_33 = arith.constant 0 : index
    %c0_34 = arith.constant 0 : index
    %60 = vector.load %arg3[%c0_32, %c0_33, %c0_34] : memref<32x16x16xbf16, #tpu.memory_space<vmem>>, vector<32x16x16xbf16>
    %61 = arith.extf %60 : vector<32x16x16xbf16> to vector<32x16x16xf32>
    %62 = arith.addf %59, %61 : vector<32x16x16xf32>
    %cst_35 = arith.constant 0.0883883461 : f32
    %63 = vector.broadcast %cst_35 : f32 to vector<32x16x16xf32>
    %64 = arith.mulf %62, %63 : vector<32x16x16xf32>
    %cst_36 = arith.constant dense<0xFF800000> : vector<32x16xf32>
    %65 = vector.multi_reduction <maximumf>, %64, %cst_36 [2] : vector<32x16x16xf32> to vector<32x16xf32>
    %66 = vector.shape_cast %65 : vector<32x16xf32> to vector<32x16x1xf32>
    %67 = vector.broadcast %66 : vector<32x16x1xf32> to vector<32x16x16xf32>
    %68 = arith.subf %64, %67 : vector<32x16x16xf32>
    %69 = math.exp %68 : vector<32x16x16xf32>
    %cst_37 = arith.constant dense<0.000000e+00> : vector<32x16xf32>
    %70 = vector.multi_reduction <add>, %69, %cst_37 [2] : vector<32x16x16xf32> to vector<32x16xf32>
    %71 = vector.shape_cast %70 : vector<32x16xf32> to vector<32x16x1xf32>
    %72 = tpu.reciprocal %71 {approx = true} : vector<32x16x1xf32> -> vector<32x16x1xf32>
    %73 = vector.broadcast %72 : vector<32x16x1xf32> to vector<32x16x16xf32>
    %74 = arith.mulf %69, %73 : vector<32x16x16xf32>
    %75 = arith.truncf %74 : vector<32x16x16xf32> to vector<32x16x16xbf16>
    "tpu.trace_start"() <{level = 10 : i32, message = "bqk,bkd->bqd"}> : () -> ()
    %cst_38 = arith.constant dense<0.000000e+00> : vector<32x16x128xf32>
    %76 = tpu.matmul %75, %58, %cst_38 {dimension_numbers = #tpu.dot_dimension_numbers<[2], [1], [1], [2], [0, 0, 0, 1, 1, 2], [0], [0]>} : vector<32x16x16xbf16>, vector<32x16x128xbf16>, vector<32x16x128xf32> -> vector<32x16x128xf32>
    "tpu.trace_stop"() : () -> ()
    %77 = arith.truncf %76 : vector<32x16x128xf32> to vector<32x16x128xbf16>
    %78 = vector.shape_cast %77 : vector<32x16x128xbf16> to vector<4x128x128xbf16>
    %79 = vector.extract_strided_slice %78 {offsets = [0, 0, 0], sizes = [1, 128, 128], strides = [1, 1, 1]} : vector<4x128x128xbf16> to vector<1x128x128xbf16>
    %80 = vector.shape_cast %79 : vector<1x128x128xbf16> to vector<128x128xbf16>
    %c0_39 = arith.constant 0 : index
    %c0_40 = arith.constant 0 : index
    %81 = vector.load %arg8[%c0_39, %c0_40] : memref<128x512xbf16, #tpu.memory_space<vmem>>, vector<128x128xbf16>
    tpu.vector_store %arg8[%c0_39, %c0_40], %80 {strides = array<i32>} : memref<128x512xbf16, #tpu.memory_space<vmem>>, vector<128x128xbf16>,
    %82 = vector.extract_strided_slice %78 {offsets = [1, 0, 0], sizes = [1, 128, 128], strides = [1, 1, 1]} : vector<4x128x128xbf16> to vector<1x128x128xbf16>
    %83 = vector.shape_cast %82 : vector<1x128x128xbf16> to vector<128x128xbf16>
    %c0_41 = arith.constant 0 : index
    %c128 = arith.constant 128 : index
    %84 = vector.load %arg8[%c0_41, %c128] : memref<128x512xbf16, #tpu.memory_space<vmem>>, vector<128x128xbf16>
    tpu.vector_store %arg8[%c0_41, %c128], %83 {strides = array<i32>} : memref<128x512xbf16, #tpu.memory_space<vmem>>, vector<128x128xbf16>,
    %85 = vector.extract_strided_slice %78 {offsets = [2, 0, 0], sizes = [1, 128, 128], strides = [1, 1, 1]} : vector<4x128x128xbf16> to vector<1x128x128xbf16>
    %86 = vector.shape_cast %85 : vector<1x128x128xbf16> to vector<128x128xbf16>
    %c0_42 = arith.constant 0 : index
    %c256 = arith.constant 256 : index
    %87 = vector.load %arg8[%c0_42, %c256] : memref<128x512xbf16, #tpu.memory_space<vmem>>, vector<128x128xbf16>
    tpu.vector_store %arg8[%c0_42, %c256], %86 {strides = array<i32>} : memref<128x512xbf16, #tpu.memory_space<vmem>>, vector<128x128xbf16>,
    %88 = vector.extract_strided_slice %78 {offsets = [3, 0, 0], sizes = [1, 128, 128], strides = [1, 1, 1]} : vector<4x128x128xbf16> to vector<1x128x128xbf16>
    %89 = vector.shape_cast %88 : vector<1x128x128xbf16> to vector<128x128xbf16>
    %c0_43 = arith.constant 0 : index
    %c384 = arith.constant 384 : index
    %90 = vector.load %arg8[%c0_43, %c384] : memref<128x512xbf16, #tpu.memory_space<vmem>>, vector<128x128xbf16>
    tpu.vector_store %arg8[%c0_43, %c384], %89 {strides = array<i32>} : memref<128x512xbf16, #tpu.memory_space<vmem>>, vector<128x128xbf16>,
    %c0_44 = arith.constant 0 : index
    %c0_45 = arith.constant 0 : index
    %91 = vector.load %arg8[%c0_44, %c0_45] : memref<128x512xbf16, #tpu.memory_space<vmem>>, vector<128x512xbf16>
    %c0_46 = arith.constant 0 : index
    %c0_47 = arith.constant 0 : index
    %92 = vector.load %arg4[%c0_46, %c0_47] : memref<512x128xbf16, #tpu.memory_space<vmem>>, vector<512x128xbf16>
    %cst_48 = arith.constant dense<0.000000e+00> : vector<128x128xf32>
    %93 = tpu.matmul %91, %92, %cst_48 {dimension_numbers = #tpu.dot_dimension_numbers<[1], [0], [0], [1], [0, 0, 1, 1], [], []>} : vector<128x512xbf16>, vector<512x128xbf16>, vector<128x128xf32> -> vector<128x128xf32>
    %c0_49 = arith.constant 0 : index
    %c0_50 = arith.constant 0 : index
    %94 = vector.load %arg5[%c0_49, %c0_50] : memref<1x128xf32, #tpu.memory_space<vmem>>, vector<1x128xf32>
    %95 = vector.broadcast %94 : vector<1x128xf32> to vector<128x128xf32>
    %96 = arith.addf %93, %95 : vector<128x128xf32>
    %c0_51 = arith.constant 0 : index
    %c0_52 = arith.constant 0 : index
    %97 = vector.load %arg6[%c0_51, %c0_52] : memref<128x128xf32, #tpu.memory_space<vmem>>, vector<128x128xf32>
    tpu.vector_store %arg6[%c0_51, %c0_52], %96 {strides = array<i32>} : memref<128x128xf32, #tpu.memory_space<vmem>>, vector<128x128xf32>,
    return
  }
  func.func @transform_0(%arg0: i32) -> (i32, i32) {
    %c0_i32 = arith.constant 0 : i32
    %c0_i32_0 = arith.constant 0 : i32
    return %arg0, %c0_i32 : i32, i32
  }
  func.func @transform_1(%arg0: i32) -> (i32, i32) {
    %c0_i32 = arith.constant 0 : i32
    %c0_i32_0 = arith.constant 0 : i32
    %c0_i32_1 = arith.constant 0 : i32
    return %c0_i32, %c0_i32_0 : i32, i32
  }
  func.func @transform_2(%arg0: i32) -> (i32, i32, i32) {
    %c0_i32 = arith.constant 0 : i32
    %c0_i32_0 = arith.constant 0 : i32
    %c0_i32_1 = arith.constant 0 : i32
    %c0_i32_2 = arith.constant 0 : i32
    return %c0_i32, %c0_i32_0, %c0_i32_1 : i32, i32, i32
  }
  func.func @transform_3(%arg0: i32) -> (i32, i32) {
    %c0_i32 = arith.constant 0 : i32
    %c0_i32_0 = arith.constant 0 : i32
    %c0_i32_1 = arith.constant 0 : i32
    return %c0_i32, %c0_i32_0 : i32, i32
  }
  func.func @transform_4(%arg0: i32) -> (i32, i32) {
    %c0_i32 = arith.constant 0 : i32
    %c0_i32_0 = arith.constant 0 : i32
    %c0_i32_1 = arith.constant 0 : i32
    return %c0_i32, %c0_i32_0 : i32, i32
  }
  func.func @transform_5(%arg0: i32) -> (i32, i32) {
    %c0_i32 = arith.constant 0 : i32
    %c0_i32_0 = arith.constant 0 : i32
    return %arg0, %c0_i32 : i32, i32
  }
}

</mosaic_0001>

<bundles_post_ra>
// kernel: tpu_custom_call.1
= control target key start
LH: loop header
LB: loop body
LE: loop exit
PB: predicated region body
PF: predicated region fallthrough
CT: control target
= control target key end

     0   :  { %10 = vsyncpa [#allocation5], 0  ;;  %s9276_s0 = inlined_call_operand.vmem [shape: bf16[256,128], index: 0, kind: input, shape index: {}]   ;;  %s9277_s1 = inlined_call_operand.hbm [shape: bf16[128,1536], index: 1, kind: input, shape index: {}]   ;;  %s9278_s2 = inlined_call_operand.vmem [shape: bf16[32,16,16], index: 2, kind: input, shape index: {}]   ;;  %s9279_s3 = inlined_call_operand.vmem [shape: bf16[512,128], index: 3, kind: input, shape index: {}]   ;;  %s9280_s4 = inlined_call_operand.vmem [shape: f32[1,128], index: 4, kind: input, shape index: {}]   ;;  %s9281_s5 = inlined_call_operand.hbm [shape: f32[256,128], index: 5, kind: output, shape index: {}]  }
   0x1   :  { %11 = vsyncpa [#allocation6], 0 }
   0x2   :  { %13 = vsyncpa [#allocation6 + $0x1], 0  ;;  %s8082_s18 = smov 0   ;;  %s8084_s19 = smov 0  }
   0x3   :  { %s8086_s20 = smov 0   ;;  %s8088_s21 = smov 0  }
   0x4 LB: > { %s8103_s22 = sadd.s32 4294967295, %s8045_s21   ;;  %s5822_s23 = sadd.s32 4294967294, %s8045_s21   ;;  %s8045_s21 = sphi %s8088_s21, %s9351_s21   ;;  %s8041_s20 = sphi %s8086_s20, %s9350_s20   ;;  %s8037_s19 = sphi %s8084_s19, %s9349_s19   ;;  %s8033_s18 = sphi %s8082_s18, %s9348_s18  }
   0x5   : > { %s8107_s24 = sadd.s32 1, %s8045_s21   ;;  %s136_s25 = sadd.s32 1, %s8041_s20 }
   0x6   : > { %s133_s26 = ssub.s32 %s8045_s21, %s8107_s24  ;;  %p146_p0 = scmp.ne.s32.totalorder %s8041_s20, %s8037_s19 }
   0x7   : > { %p134_p1 = scmp.eq.s32.totalorder %s133_s26, 0  ;;  %p147_p2 = scmp.eq.s32.totalorder %s8103_s22, 1 }
   0x8   : > { %p152_p3 = scmp.ne.s32.totalorder %s8037_s19, %s8033_s18  ;;  %p153_p4 = scmp.eq.s32.totalorder %s5822_s23, 1 }
   0x9   : > { %s8118_s27 = scalar_select %p134_p1, %s8041_s20, %s136_s25  }
   0xa   : > { %p8120_p5 = por %p147_p2, %p146_p0  ;;  %p8124_p6 = por %p153_p4, %p152_p3 }
   0xb   : > { %p5823_p7 = scmp.ge.s32.totalorder %s8045_s21, 1  ;;  %p160_p8 = scmp.lt.s32.totalorder %s8045_s21, 3 }
   0xc   : > { %p7644_p9 = scmp.eq.s32.totalorder %s8103_s22, 0  ;;  %s171_s7 = sshll.u32 %s9277_s1, 4  ;;  %s172_s7 = int_to_ptr.hbm [resolvable:$true] %s171_s7 }
   0xd   : > { %p161_p10 = pnand %p5823_p7, %p160_p8  ;;  %s8047_s8 = smov [#allocation4]  }
   0xe   : > { %s173_s9 = sshll.u32 %s8047_s8, 4  ;;  %s8048_s10 = smov 768   ;;  %s174_s9 = int_to_ptr.vmem [resolvable:$true] %s173_s9 }
   0xf   : > { %p7636_p11 = pneg %p161_p10  ;;  %s8049_s11 = smov 48  }
  0x10   : > { %207 = sbr.rel (%p161_p10) target bundleno = 1491 (0x5d3), region = 40 }
  0x11   : > { %p7637_p12 = pnand %p7644_p9, %p7636_p11 }
  0x13   : > { %7639 = dma.hbm_to_vmem [thread:$0]  (!%p7637_p12), %s172_s7, 12288, %s174_s9, [#allocation5], %s8048_s10, %s8048_s10, %s8049_s11  }
  0x15   : > { %8024 = dma.done.wait (%p7644_p9), [#allocation5], 12288  }
  0x16   : > { %8026 = vsyncadd (%p7644_p9), [#allocation5], 4294955008  ;;  %v6201_v0 = vld [vmem:[#allocation4 + $0x2a0] sm:$0xf]  ;;  %v7022_v1 = vld [vmem:[#allocation4 + $0x2cc] sm:$0xf0] }
  0x17   : > { %v7016_v2 = vld [vmem:[#allocation4 + $0x2a4] sm:$0xf]  ;;  %v6202_v3 = vor.u32 %v7022_v1, %v6201_v0  ;;  %v6203_v4 = vld [vmem:[#allocation4 + $0x2d0] sm:$0xf0]  ;;  %v6209_v5 = vld [vmem:[#allocation4 + $0x2a8] sm:$0xf] }
  0x18   : > { %v7023_v6 = vld [vmem:[#allocation4 + $0x2d4] sm:$0xf0]  ;;  %v6206_v7 = vor.u32 %v7016_v2, %v6203_v4  ;;  %v7017_v9 = vld [vmem:[#allocation4 + $0x2ac] sm:$0xf]  ;;  %v6211_v10 = vld [vmem:[#allocation4 + $0x2d8] sm:$0xf0] }
  0x19   : > { %v6210_v8 = vor.u32 %v7023_v6, %v6209_v5  ;;  %v6153_v11 = vld [vmem:[#allocation4 + $0x240] sm:$0xf]  ;;  %884 = vmatpush.bf16.msra.mxu0 %v6202_v3  ;;  %v6214_v12 = vor.u32 %v7017_v9, %v6211_v10  ;;  %v7010_v13 = vld [vmem:[#allocation4 + $0x26c] sm:$0xf0]  ;;  %v7004_v14 = vld [vmem:[#allocation4 + $0x244] sm:$0xf] }
  0x1a   : > { %v6155_v15 = vld [vmem:[#allocation4 + $0x270] sm:$0xf0]  ;;  %933 = vmatpush.bf16.msra.mxu1 %v6206_v7  ;;  %v6154_v16 = vor.u32 %v7010_v13, %v6153_v11  ;;  %v6161_v18 = vld [vmem:[#allocation4 + $0x248] sm:$0xf]  ;;  %v7011_v19 = vld [vmem:[#allocation4 + $0x274] sm:$0xf0] }
  0x1b   : > { %982 = vmatpush.bf16.msra.mxu2 %v6210_v8  ;;  %v6158_v17 = vor.u32 %v7004_v14, %v6155_v15  ;;  %v7005_v20 = vld [vmem:[#allocation4 + $0x24c] sm:$0xf]  ;;  %1031 = vmatpush.bf16.msra.mxu3 %v6214_v12  ;;  %v6162_v21 = vor.u32 %v7011_v19, %v6161_v18  ;;  %v6163_v22 = vld [vmem:[#allocation4 + $0x278] sm:$0xf0]  ;;  %v6105_v23 = vld [vmem:[#allocation4 + $0x1e0] sm:$0xf] }
  0x1c   : > { %v6998_v24 = vld [vmem:[#allocation4 + $0x20c] sm:$0xf0]  ;;  %v6166_v25 = vor.u32 %v7005_v20, %v6163_v22  ;;  %v6992_v26 = vld [vmem:[#allocation4 + $0x1e4] sm:$0xf]  ;;  %v6107_v27 = vld [vmem:[#allocation4 + $0x210] sm:$0xf0] }
  0x1d   : > { %v6113_v28 = vld [vmem:[#allocation4 + $0x1e8] sm:$0xf]  ;;  %885 = vmatpush.bf16.msra.mxu0 %v6154_v16  ;;  %v6106_v29 = vor.u32 %v6998_v24, %v6105_v23  ;;  %v6999_v30 = vld [vmem:[#allocation4 + $0x214] sm:$0xf0]  ;;  %v6993_v31 = vld [vmem:[#allocation4 + $0x1ec] sm:$0xf]  ;;  %v6110_v33 = vor.u32 %v6992_v26, %v6107_v27 }
  0x1e   : > { %v6115_v32 = vld [vmem:[#allocation4 + $0x218] sm:$0xf0]  ;;  %934 = vmatpush.bf16.msra.mxu1 %v6158_v17  ;;  %v6114_v34 = vor.u32 %v6999_v30, %v6113_v28  ;;  %v6057_v35 = vld [vmem:[#allocation4 + $0x180] sm:$0xf]  ;;  %v6986_v36 = vld [vmem:[#allocation4 + $0x1ac] sm:$0xf0] }
  0x1f   : > { %983 = vmatpush.bf16.msra.mxu2 %v6162_v21  ;;  %v6980_v37 = vld [vmem:[#allocation4 + $0x184] sm:$0xf]  ;;  %1032 = vmatpush.bf16.msra.mxu3 %v6166_v25  ;;  %v6118_v38 = vor.u32 %v6993_v31, %v6115_v32  ;;  %v6059_v39 = vld [vmem:[#allocation4 + $0x1b0] sm:$0xf0]  ;;  %v6065_v40 = vld [vmem:[#allocation4 + $0x188] sm:$0xf]  ;;  %v6058_v44 = vor.u32 %v6986_v36, %v6057_v35 }
  0x20   : > { %v6987_v41 = vld [vmem:[#allocation4 + $0x1b4] sm:$0xf0]  ;;  %v6981_v42 = vld [vmem:[#allocation4 + $0x18c] sm:$0xf]  ;;  %v6067_v43 = vld [vmem:[#allocation4 + $0x1b8] sm:$0xf0]  ;;  %v6062_v45 = vor.u32 %v6980_v37, %v6059_v39 }
  0x21   : > { %886 = vmatpush.bf16.msra.mxu0 %v6106_v29  ;;  %s5829_s12 = sshll.u32 %s8103_s22, 4  ;;  %v6066_v46 = vor.u32 %v6987_v41, %v6065_v40  ;;  %v6009_v47 = vld [vmem:[#allocation4 + $0x120] sm:$0xf]  ;;  %v6974_v48 = vld [vmem:[#allocation4 + $0x14c] sm:$0xf0]  ;;  %v6070_v50 = vor.u32 %v6981_v42, %v6067_v43  ;;  %vm3275_vm0 = vcmask 130048  }
  0x22   : > { %935 = vmatpush.bf16.msra.mxu1 %v6110_v33  ;;  %v6968_v49 = vld [vmem:[#allocation4 + $0x124] sm:$0xf]  ;;  %v6011_v51 = vld [vmem:[#allocation4 + $0x150] sm:$0xf0]  ;;  %v6017_v52 = vld [vmem:[#allocation4 + $0x128] sm:$0xf]  ;;  %v6010_v56 = vor.u32 %v6974_v48, %v6009_v47 }
  0x23   : > { %984 = vmatpush.bf16.msra.mxu2 %v6114_v34  ;;  %1033 = vmatpush.bf16.msra.mxu3 %v6118_v38  ;;  %v6975_v53 = vld [vmem:[#allocation4 + $0x154] sm:$0xf0]  ;;  %v6969_v54 = vld [vmem:[#allocation4 + $0x12c] sm:$0xf]  ;;  %v6019_v55 = vld [vmem:[#allocation4 + $0x158] sm:$0xf0]  ;;  %v6014_v57 = vor.u32 %v6968_v49, %v6011_v51 }
  0x24   : > { %p8143_p13 = scmp.lt.s32.totalorder %s5829_s12, 31  ;;  %v6018_v58 = vor.u32 %v6975_v53, %v6017_v52  ;;  %v5961_v59 = vld [vmem:[#allocation4 + $0xc0] sm:$0xf]  ;;  %v6962_v60 = vld [vmem:[#allocation4 + $0xec] sm:$0xf0]  ;;  %v6022_v62 = vor.u32 %v6969_v54, %v6019_v55  ;;  %s233_s26 = sand.u32 1, %s8037_s19  }
  0x25   : > { %887 = vmatpush.bf16.msra.mxu0 %v6058_v44  ;;  %v6956_v61 = vld [vmem:[#allocation4 + $0xc4] sm:$0xf]  ;;  %v5963_v63 = vld [vmem:[#allocation4 + $0xf0] sm:$0xf0]  ;;  %v5969_v0 = vld [vmem:[#allocation4 + $0xc8] sm:$0xf]  ;;  %v5962_v4 = vor.u32 %v6962_v60, %v5961_v59 }
  0x26   : > { %936 = vmatpush.bf16.msra.mxu1 %v6062_v45  ;;  %v6963_v1 = vld [vmem:[#allocation4 + $0xf4] sm:$0xf0]  ;;  %v6957_v2 = vld [vmem:[#allocation4 + $0xcc] sm:$0xf]  ;;  %v5971_v3 = vld [vmem:[#allocation4 + $0xf8] sm:$0xf0]  ;;  %v5966_v5 = vor.u32 %v6956_v61, %v5963_v63 }
  0x27   : > { %985 = vmatpush.bf16.msra.mxu2 %v6066_v46  ;;  %1034 = vmatpush.bf16.msra.mxu3 %v6070_v50  ;;  %s9353_s12 = smov (!%p8143_p13, %s5829_s12), 31  ;;  %v5970_v6 = vor.u32 %v6963_v1, %v5969_v0  ;;  %v5913_v7 = vld [vmem:[#allocation4 + $0x60] sm:$0xf]  ;;  %v6950_v8 = vld [vmem:[#allocation4 + $0x8c] sm:$0xf0]  ;;  %v5974_v10 = vor.u32 %v6957_v2, %v5971_v3  ;;  %s5828_s30 = sshll.u32 %s233_s26, 7 }
  0x28   : > { %v6944_v9 = vld [vmem:[#allocation4 + $0x64] sm:$0xf]  ;;  %v5915_v11 = vld [vmem:[#allocation4 + $0x90] sm:$0xf0]  ;;  %v5921_v12 = vld [vmem:[#allocation4 + $0x68] sm:$0xf]  ;;  %v5914_v16 = vor.u32 %v6950_v8, %v5913_v7 }
  0x29   : > { %888 = vmatpush.bf16.msra.mxu0 %v6010_v56  ;;  %v6951_v13 = vld [vmem:[#allocation4 + $0x94] sm:$0xf0]  ;;  %v6945_v14 = vld [vmem:[#allocation4 + $0x6c] sm:$0xf]  ;;  %v5923_v15 = vld [vmem:[#allocation4 + $0x98] sm:$0xf0]  ;;  %v5918_v17 = vor.u32 %v6944_v9, %v5915_v11 }
  0x2a   : > { %937 = vmatpush.bf16.msra.mxu1 %v6014_v57  ;;  %s5830_s14 = sshll.u32 %s9353_s12, 2  ;;  %v5922_v18 = vor.u32 %v6951_v13, %v5921_v12  ;;  %v5865_v19 = vld [vmem:[#allocation4] sm:$0xf]  ;;  %v6938_v20 = vld [vmem:[#allocation4 + $0x2c] sm:$0xf0]  ;;  %v5926_v22 = vor.u32 %v6945_v14, %v5923_v15  ;;  %s9210_s6 = scalar_lea.vmem [#allocation7], %s5828_s30 }
  0x2b   : > { %986 = vmatpush.bf16.msra.mxu2 %v6018_v58  ;;  %1035 = vmatpush.bf16.msra.mxu3 %v6022_v62  ;;  %v6932_v21 = vld [vmem:[#allocation4 + $0x4] sm:$0xf]  ;;  %v5867_v23 = vld [vmem:[#allocation4 + $0x30] sm:$0xf0]  ;;  %v5873_v24 = vld [vmem:[#allocation4 + $0x8] sm:$0xf]  ;;  %v5866_v28 = vor.u32 %v6938_v20, %v5865_v19  ;;  %s8157_s17 = scalar_lea.vmem %s9276_s0, %s5830_s14 }
  0x2c   : > { %v6939_v25 = vld [vmem:[#allocation4 + $0x34] sm:$0xf0]  ;;  %v6933_v26 = vld [vmem:[#allocation4 + $0xc] sm:$0xf]  ;;  %v5875_v27 = vld [vmem:[#allocation4 + $0x38] sm:$0xf0]  ;;  %v5870_v29 = vor.u32 %v6932_v21, %v5867_v23 }
  0x2d   : > { %889 = vmatpush.bf16.msra.mxu0 %v5962_v4  ;;  %v5874_v30 = vor.u32 %v6939_v25, %v5873_v24  ;;  %v5878_v31 = vor.u32 %v6933_v26, %v5875_v27  ;;  %v8160_v32 = vld [vmem:[%s8157_s17] sm:$0xff]  ;;  %v8167_v33 = vld [vmem:[%s8157_s17 + $0x8] sm:$0xff]  ;;  %v6217_v34 = vld [vmem:[#allocation4 + $0x2b0] sm:$0xf]  ;;  %s7188_s7 = sshll.u32 %s8103_s22, 7  ;;  %s5745_s11 = sshll.u32 %s9210_s6, 4  ;;  %s5746_s11 = int_to_ptr.vmem [resolvable:$true] %s5745_s11 }
  0x2e   : > { %938 = vmatpush.bf16.msra.mxu1 %v5966_v5  ;;  %v7024_v35 = vld [vmem:[#allocation4 + $0x2dc] sm:$0xf0]  ;;  %v6225_v36 = vld [vmem:[#allocation4 + $0x2b8] sm:$0xf]  ;;  %v7025_v38 = vld [vmem:[#allocation4 + $0x2e4] sm:$0xf0]  ;;  %s5744_s10 = scalar_lea.hbm %s9281_s5, %s7188_s7 }
  0x2f   : > { %987 = vmatpush.bf16.msra.mxu2 %v5970_v6  ;;  %1036 = vmatpush.bf16.msra.mxu3 %v5974_v10  ;;  %v6218_v37 = vor.u32 %v7024_v35, %v6217_v34  ;;  %v6226_v39 = vor.u32 %v7025_v38, %v6225_v36  ;;  %v8174_v40 = vld [vmem:[%s8157_s17 + $0x10] sm:$0xff]  ;;  %v6219_v42 = vld [vmem:[#allocation4 + $0x2e0] sm:$0xf0]  ;;  %v7019_v43 = vld [vmem:[#allocation4 + $0x2bc] sm:$0xf]  ;;  %s5747_s12 = sshll.u32 %s5744_s10, 4  ;;  %s5748_s12 = int_to_ptr.hbm [resolvable:$true] %s5747_s12 }
  0x30   : > { %v7018_v41 = vld [vmem:[#allocation4 + $0x2b4] sm:$0xf]  ;;  %v6227_v45 = vld [vmem:[#allocation4 + $0x2e8] sm:$0xf0]  ;;  %v6169_v46 = vld [vmem:[#allocation4 + $0x250] sm:$0xf] }
  0x31   : > { %890 = vmatpush.bf16.msra.mxu0 %v5914_v16  ;;  %v6222_v44 = vor.u32 %v7018_v41, %v6219_v42  ;;  %v7012_v47 = vld [vmem:[#allocation4 + $0x27c] sm:$0xf0]  ;;  %v6230_v48 = vor.u32 %v7019_v43, %v6227_v45  ;;  %v6177_v50 = vld [vmem:[#allocation4 + $0x258] sm:$0xf]  ;;  %v7013_v51 = vld [vmem:[#allocation4 + $0x284] sm:$0xf0] }
  0x32   : > { %939 = vmatpush.bf16.msra.mxu1 %v5918_v17  ;;  %v6170_v49 = vor.u32 %v7012_v47, %v6169_v46  ;;  %v6178_v52 = vor.u32 %v7013_v51, %v6177_v50  ;;  %v8181_v53 = vld [vmem:[%s8157_s17 + $0x18] sm:$0xff]  ;;  %v7006_v54 = vld [vmem:[#allocation4 + $0x254] sm:$0xf]  ;;  %v6171_v55 = vld [vmem:[#allocation4 + $0x280] sm:$0xf0]  ;;  %s5733_s22 = scalar_lea.sflag [#allocation6], %s233_s26 }
  0x33   : > { %988 = vmatpush.bf16.msra.mxu2 %v5922_v18  ;;  %1037 = vmatpush.bf16.msra.mxu3 %v5926_v22  ;;  %v7007_v56 = vld [vmem:[#allocation4 + $0x25c] sm:$0xf]  ;;  %v6174_v57 = vor.u32 %v7006_v54, %v6171_v55  ;;  %v6179_v58 = vld [vmem:[#allocation4 + $0x288] sm:$0xf0]  ;;  %v6121_v59 = vld [vmem:[#allocation4 + $0x1f0] sm:$0xf] }
  0x34   : > { %v7000_v60 = vld [vmem:[#allocation4 + $0x21c] sm:$0xf0]  ;;  %v6182_v61 = vor.u32 %v7007_v56, %v6179_v58  ;;  %v6129_v63 = vld [vmem:[#allocation4 + $0x1f8] sm:$0xf]  ;;  %v7001_v0 = vld [vmem:[#allocation4 + $0x224] sm:$0xf0] }
  0x35   : > { %891 = vmatpush.bf16.msra.mxu0 %v5866_v28  ;;  %v6122_v62 = vor.u32 %v7000_v60, %v6121_v59  ;;  %v6130_v1 = vor.u32 %v7001_v0, %v6129_v63  ;;  %v8188_v2 = vld [vmem:[%s8157_s17 + $0x20] sm:$0xff]  ;;  %v6994_v3 = vld [vmem:[#allocation4 + $0x1f4] sm:$0xf]  ;;  %v6995_v5 = vld [vmem:[#allocation4 + $0x1fc] sm:$0xf]  ;;  %s7993_s13 = sshra.s32 %s5748_s12, 4  ;;  %s7994_s13 = int_to_ptr.hbm [resolvable:$true] %s7993_s13 }
  0x36   : > { %940 = vmatpush.bf16.msra.mxu1 %v5870_v29  ;;  %v6123_v4 = vld [vmem:[#allocation4 + $0x220] sm:$0xf0]  ;;  %v6131_v7 = vld [vmem:[#allocation4 + $0x228] sm:$0xf0]  ;;  %v6073_v8 = vld [vmem:[#allocation4 + $0x190] sm:$0xf]  ;;  %p8000_p3 = scmp.lt.s32.totalorder %s7994_s13, %s9281_s5 }
  0x37   : > { %989 = vmatpush.bf16.msra.mxu2 %v5874_v30  ;;  %1038 = vmatpush.bf16.msra.mxu3 %v5878_v31  ;;  %v6126_v6 = vor.u32 %v6994_v3, %v6123_v4  ;;  %v6988_v9 = vld [vmem:[#allocation4 + $0x1bc] sm:$0xf0]  ;;  %v6134_v10 = vor.u32 %v6995_v5, %v6131_v7  ;;  %v6081_v12 = vld [vmem:[#allocation4 + $0x198] sm:$0xf]  ;;  %v6989_v13 = vld [vmem:[#allocation4 + $0x1c4] sm:$0xf0] }
  0x38   : > { %892 = vmatmul.bf16.vlgmr.msra.gmra.mxu0 %v8160_v32  ;;  %v6074_v11 = vor.u32 %v6988_v9, %v6073_v8  ;;  %v6982_v14 = vld [vmem:[#allocation4 + $0x194] sm:$0xf]  ;;  %v6082_v15 = vor.u32 %v6989_v13, %v6081_v12  ;;  %v6075_v16 = vld [vmem:[#allocation4 + $0x1c0] sm:$0xf0]  ;;  %v6983_v17 = vld [vmem:[#allocation4 + $0x19c] sm:$0xf] }
  0x39   : > { %941 = vmatmul.bf16.vlgmr.msra.gmra.mxu1 %v8160_v32  ;;  %1080 = vmatpush.bf16.msrb.mxu0 %v6218_v37  ;;  %v6083_v18 = vld [vmem:[#allocation4 + $0x1c8] sm:$0xf0]  ;;  %v6078_v19 = vor.u32 %v6982_v14, %v6075_v16  ;;  %v6025_v22 = vld [vmem:[#allocation4 + $0x130] sm:$0xf]  ;;  %v6976_v23 = vld [vmem:[#allocation4 + $0x15c] sm:$0xf0] }
  0x3a   : > { %990 = vmatmul.bf16.vlgmr.msra.gmra.mxu2 %v8160_v32  ;;  %1039 = vmatmul.bf16.vlgmr.msra.gmra.mxu3 %v8160_v32  ;;  %v6086_v20 = vor.u32 %v6983_v17, %v6083_v18  ;;  %v8195_v21 = vld [vmem:[%s8157_s17 + $0x28] sm:$0xff]  ;;  %v6970_v24 = vld [vmem:[#allocation4 + $0x134] sm:$0xf]  ;;  %v6026_v25 = vor.u32 %v6976_v23, %v6025_v22  ;;  %v6027_v26 = vld [vmem:[#allocation4 + $0x160] sm:$0xf0]  ;;  %s7995_s14 = scalar_lea.hbm %s7994_s13, 128 }
  0x3b   : > { %1178 = vmatpush.bf16.msrb.mxu2 %v6226_v39  ;;  %1129 = vmatpush.bf16.msrb.mxu1 %v6222_v44  ;;  %v6033_v27 = vld [vmem:[#allocation4 + $0x138] sm:$0xf]  ;;  %v6977_v28 = vld [vmem:[#allocation4 + $0x164] sm:$0xf0]  ;;  %v6030_v29 = vor.u32 %v6970_v24, %v6027_v26  ;;  %v6971_v31 = vld [vmem:[#allocation4 + $0x13c] sm:$0xf]  ;;  %p7996_p0 = scmp.ne.s32.totalorder %s7994_s13, %s7995_s14 }
  0x3c   : > { %1227 = vmatpush.bf16.msrb.mxu3 %v6230_v48  ;;  %v6034_v30 = vor.u32 %v6977_v28, %v6033_v27  ;;  %v6035_v34 = vld [vmem:[#allocation4 + $0x168] sm:$0xf0]  ;;  %v5977_v35 = vld [vmem:[#allocation4 + $0xd0] sm:$0xf]  ;;  %v6964_v37 = vld [vmem:[#allocation4 + $0xfc] sm:$0xf0] }
  0x3d   : > { %1081 = vmatpush.bf16.msrb.mxu0 %v6170_v49  ;;  %v6038_v36 = vor.u32 %v6971_v31, %v6035_v34  ;;  %v6958_v38 = vld [vmem:[#allocation4 + $0xd4] sm:$0xf]  ;;  %v5979_v39 = vld [vmem:[#allocation4 + $0x100] sm:$0xf0]  ;;  %v5978_v41 = vor.u32 %v6964_v37, %v5977_v35  ;;  %v5985_v43 = vld [vmem:[#allocation4 + $0xd8] sm:$0xf]  ;;  %p7997_p1 = pnand %p7996_p0, %p8120_p5 }
  0x3e   : > { %v5982_v42 = vor.u32 %v6958_v38, %v5979_v39  ;;  %v6965_v44 = vld [vmem:[#allocation4 + $0x104] sm:$0xf0]  ;;  %v6959_v45 = vld [vmem:[#allocation4 + $0xdc] sm:$0xf]  ;;  %v5987_v47 = vld [vmem:[#allocation4 + $0x108] sm:$0xf0] }
  0x3f   : > { %1179 = vmatpush.bf16.msrb.mxu2 %v6178_v52  ;;  %1130 = vmatpush.bf16.msrb.mxu1 %v6174_v57  ;;  %v5986_v46 = vor.u32 %v6965_v44, %v5985_v43  ;;  %v5929_v48 = vld [vmem:[#allocation4 + $0x70] sm:$0xf]  ;;  %v6952_v49 = vld [vmem:[#allocation4 + $0x9c] sm:$0xf0]  ;;  %v5990_v50 = vor.u32 %v6959_v45, %v5987_v47  ;;  %v6946_v51 = vld [vmem:[#allocation4 + $0x74] sm:$0xf]  ;;  %p7998_p2 = pneg %p7997_p1 }
  0x40   : > { %1228 = vmatpush.bf16.msrb.mxu3 %v6182_v61  ;;  %v5931_v52 = vld [vmem:[#allocation4 + $0xa0] sm:$0xf0]  ;;  %v5937_v54 = vld [vmem:[#allocation4 + $0x78] sm:$0xf]  ;;  %v5930_v55 = vor.u32 %v6952_v49, %v5929_v48  ;;  %v6953_v56 = vld [vmem:[#allocation4 + $0xa4] sm:$0xf0] }
  0x41   : > { %1082 = vmatpush.bf16.msrb.mxu0 %v6122_v62  ;;  %v6947_v57 = vld [vmem:[#allocation4 + $0x7c] sm:$0xf]  ;;  %v5939_v58 = vld [vmem:[#allocation4 + $0xa8] sm:$0xf0]  ;;  %v5934_v59 = vor.u32 %v6946_v51, %v5931_v52  ;;  %v5938_v60 = vor.u32 %v6953_v56, %v5937_v54  ;;  %v8202_v62 = vld [vmem:[%s8157_s17 + $0x30] sm:$0xff] }
  0x42   : > { %v5942_v61 = vor.u32 %v6947_v57, %v5939_v58  ;;  %v5881_v63 = vld [vmem:[#allocation4 + $0x10] sm:$0xf]  ;;  %v6940_v0 = vld [vmem:[#allocation4 + $0x3c] sm:$0xf0]  ;;  %v5883_v4 = vld [vmem:[#allocation4 + $0x40] sm:$0xf0] }
  0x43   : > { %1180 = vmatpush.bf16.msrb.mxu2 %v6130_v1  ;;  %1131 = vmatpush.bf16.msrb.mxu1 %v6126_v6  ;;  %v6934_v1 = vld [vmem:[#allocation4 + $0x14] sm:$0xf]  ;;  %v5882_v3 = vor.u32 %v6940_v0, %v5881_v63  ;;  %v5889_v5 = vld [vmem:[#allocation4 + $0x18] sm:$0xf]  ;;  %v6941_v6 = vld [vmem:[#allocation4 + $0x44] sm:$0xf0] }
  0x44   : > { %1229 = vmatpush.bf16.msrb.mxu3 %v6134_v10  ;;  %v5886_v7 = vor.u32 %v6934_v1, %v5883_v4  ;;  %v5890_v8 = vor.u32 %v6941_v6, %v5889_v5  ;;  %v6935_v9 = vld [vmem:[#allocation4 + $0x1c] sm:$0xf]  ;;  %v5891_v10 = vld [vmem:[#allocation4 + $0x48] sm:$0xf0]  ;;  %v6233_v47 = vld [vmem:[#allocation4 + $0x2c0] sm:$0xf] }
  0x45   : > { %1083 = vmatpush.bf16.msrb.mxu0 %v6074_v11  ;;  %v5894_v11 = vor.u32 %v6935_v9, %v5891_v10  ;;  %v8209_v12 = vld [vmem:[%s8157_s17 + $0x38] sm:$0xff]  ;;  %v7026_v48 = vld [vmem:[#allocation4 + $0x2ec] sm:$0xf0]  ;;  %v6241_v51 = vld [vmem:[#allocation4 + $0x2c8] sm:$0xf] }
  0x46   : > { %v7027_v52 = vld [vmem:[#allocation4 + $0x2f4] sm:$0xf0]  ;;  %v7020_v63 = vld [vmem:[#allocation4 + $0x2c4] sm:$0xf]  ;;  %v6235_v0 = vld [vmem:[#allocation4 + $0x2f0] sm:$0xf0] }
  0x47   : > { %1181 = vmatpush.bf16.msrb.mxu2 %v6082_v15  ;;  %1132 = vmatpush.bf16.msrb.mxu1 %v6078_v19  ;;  %v6242_v56 = vor.u32 %v7027_v52, %v6241_v51  ;;  %v7021_v4 = vld [vmem:[#allocation4 + $0x2cc] sm:$0xf]  ;;  %v6243_v5 = vld [vmem:[#allocation4 + $0x2f8] sm:$0xf0]  ;;  %v6145_v51 = vld [vmem:[#allocation4 + $0x208] sm:$0xf] }
  0x48   : > { %897 = vmatmul.bf16.gmra.mxu0 %v8167_v33  ;;  %1230 = vmatpush.bf16.msrb.mxu3 %v6086_v20  ;;  %v7003_v52 = vld [vmem:[#allocation4 + $0x234] sm:$0xf0] }
  0x49   : > { %946 = vmatmul.bf16.gmra.mxu1 %v8167_v33  ;;  %1084 = vmatpush.bf16.msrb.mxu0 %v6026_v25 }
  0x4a   : > { %995 = vmatmul.bf16.gmra.mxu2 %v8167_v33  ;;  %1044 = vmatmul.bf16.gmra.mxu3 %v8167_v33 }
  0x4b   : > { %1133 = vmatpush.bf16.msrb.mxu1 %v6030_v29  ;;  %1182 = vmatpush.bf16.msrb.mxu2 %v6034_v30 }
  0x4c   : > { %1231 = vmatpush.bf16.msrb.mxu3 %v6038_v36 }
  0x4d   : > { %1085 = vmatpush.bf16.msrb.mxu0 %v5978_v41 }
  0x4f   : > { %1134 = vmatpush.bf16.msrb.mxu1 %v5982_v42  ;;  %1183 = vmatpush.bf16.msrb.mxu2 %v5986_v46 }
  0x50   : > { %1232 = vmatpush.bf16.msrb.mxu3 %v5990_v50  ;;  %v6234_v50 = vor.u32 %v7026_v48, %v6233_v47  ;;  %v7002_v48 = vld [vmem:[#allocation4 + $0x22c] sm:$0xf0] }
  0x51   : > { %1086 = vmatpush.bf16.msrb.mxu0 %v5930_v55 }
  0x53   : > { %1135 = vmatpush.bf16.msrb.mxu1 %v5934_v59  ;;  %1184 = vmatpush.bf16.msrb.mxu2 %v5938_v60 }
  0x54   : > { %1233 = vmatpush.bf16.msrb.mxu3 %v5942_v61 }
  0x55   : > { %1087 = vmatpush.bf16.msrb.mxu0 %v5882_v3  ;;  %v6238_v3 = vor.u32 %v7020_v63, %v6235_v0  ;;  %v6996_v63 = vld [vmem:[#allocation4 + $0x204] sm:$0xf]  ;;  %v6139_v0 = vld [vmem:[#allocation4 + $0x230] sm:$0xf0] }
  0x57   : > { %1136 = vmatpush.bf16.msrb.mxu1 %v5886_v7  ;;  %1185 = vmatpush.bf16.msrb.mxu2 %v5890_v8  ;;  %v6246_v8 = vor.u32 %v7021_v4, %v6243_v5  ;;  %v6997_v4 = vld [vmem:[#allocation4 + $0x20c] sm:$0xf]  ;;  %v6147_v5 = vld [vmem:[#allocation4 + $0x238] sm:$0xf0] }
  0x58   : > { %902 = vmatmul.bf16.gmra.mxu0 %v8174_v40  ;;  %1234 = vmatpush.bf16.msrb.mxu3 %v5894_v11 }
  0x59   : > { %951 = vmatmul.bf16.gmra.mxu1 %v8174_v40  ;;  %1276 = vmatpush.bf16.msra.mxu0 %v6234_v50 }
  0x5a   : > { %1000 = vmatmul.bf16.gmra.mxu2 %v8174_v40  ;;  %1049 = vmatmul.bf16.gmra.mxu3 %v8174_v40 }
  0x5b   : > { %1374 = vmatpush.bf16.msra.mxu2 %v6242_v56  ;;  %1325 = vmatpush.bf16.msra.mxu1 %v6238_v3  ;;  %v6146_v56 = vor.u32 %v7003_v52, %v6145_v51  ;;  %v6142_v3 = vor.u32 %v6996_v63, %v6139_v0  ;;  %v6966_v51 = vld [vmem:[#allocation4 + $0x10c] sm:$0xf0]  ;;  %v6960_v52 = vld [vmem:[#allocation4 + $0xe4] sm:$0xf]  ;;  %v6961_v0 = vld [vmem:[#allocation4 + $0xec] sm:$0xf] }
  0x5c   : > { %1423 = vmatpush.bf16.msra.mxu3 %v6246_v8  ;;  %v6150_v8 = vor.u32 %v6997_v4, %v6147_v5 }
  0x68   : > { %907 = vmatmul.bf16.gmra.mxu0 %v8181_v53 }
  0x69   : > { %956 = vmatmul.bf16.gmra.mxu1 %v8181_v53 }
  0x6a   : > { %1005 = vmatmul.bf16.gmra.mxu2 %v8181_v53  ;;  %1054 = vmatmul.bf16.gmra.mxu3 %v8181_v53 }
  0x78   : > { %912 = vmatmul.bf16.gmra.mxu0 %v8188_v2 }
  0x79   : > { %961 = vmatmul.bf16.gmra.mxu1 %v8188_v2 }
  0x7a   : > { %1010 = vmatmul.bf16.gmra.mxu2 %v8188_v2  ;;  %1059 = vmatmul.bf16.gmra.mxu3 %v8188_v2 }
  0x88   : > { %917 = vmatmul.bf16.gmra.mxu0 %v8195_v21 }
  0x89   : > { %966 = vmatmul.bf16.gmra.mxu1 %v8195_v21 }
  0x8a   : > { %1015 = vmatmul.bf16.gmra.mxu2 %v8195_v21  ;;  %1064 = vmatmul.bf16.gmra.mxu3 %v8195_v21 }
  0x98   : > { %922 = vmatmul.bf16.gmra.mxu0 %v8202_v62 }
  0x99   : > { %971 = vmatmul.bf16.gmra.mxu1 %v8202_v62 }
  0x9a   : > { %1020 = vmatmul.bf16.gmra.mxu2 %v8202_v62  ;;  %1069 = vmatmul.bf16.gmra.mxu3 %v8202_v62 }
  0xa8   : > { %927 = vmatmul.bf16.gmra.mxu0 %v8209_v12 }
  0xa9   : > { %976 = vmatmul.bf16.gmra.mxu1 %v8209_v12 }
  0xaa   : > { %1025 = vmatmul.bf16.gmra.mxu2 %v8209_v12  ;;  %1074 = vmatmul.bf16.gmra.mxu3 %v8209_v12 }
  0xb5   : > { %v893_v13 = vpop.f32.mrf.mxu0 }
  0xb6   : > { %v942_v14 = vpop.f32.mrf.mxu1 }
  0xb7   : > { %v1472_v15 = vpack.c.bf16 %v942_v14, %v893_v13 }
  0xb8   : > { %1088 = vmatmul.bf16.vlgmr.msrb.gmra.mxu0 %v8160_v32 }
  0xb9   : > { %v1600_v16 = vrot.slane %v1472_v15, 4  ;;  %1137 = vmatmul.bf16.vlgmr.msrb.gmra.mxu1 %v8160_v32 }
  0xba   : > { %1186 = vmatmul.bf16.vlgmr.msrb.gmra.mxu2 %v8160_v32  ;;  %1235 = vmatmul.bf16.vlgmr.msrb.gmra.mxu3 %v8160_v32 }
  0xbb   : > { %1633 = vst [vmem:[#allocation2 + $0x40] sm:$0xf] %v1600_v16  ;;  %v7014_v16 = vld [vmem:[#allocation4 + $0x28c] sm:$0xf0] }
  0xbd   : > { %v991_v17 = vpop.f32.mrf.mxu2  ;;  %v1040_v18 = vpop.f32.mrf.mxu3 }
  0xbe   : > { %v895_v19 = vpop.f32.mrf.mxu0  ;;  %v1473_v20 = vpack.c.bf16 %v1040_v18, %v991_v17  ;;  %v944_v23 = vpop.f32.mrf.mxu1 }
  0xbf   : > { %v7192_v22 = vpack.c.bf16 %v895_v19, %v893_v13  ;;  %v1478_v24 = vpack.c.bf16 %v944_v23, %v895_v19  ;;  %v6193_v19 = vld [vmem:[#allocation4 + $0x268] sm:$0xf] }
  0xc0   : > { %v1682_v25 = vrot.slane %v1473_v20, 4  ;;  %v7015_v20 = vld [vmem:[#allocation4 + $0x294] sm:$0xf0] }
  0xc1   : > { %7193 = vst [vmem:[#allocation2] sm:$0xff] %v7192_v22   ;;  %v1601_v26 = vrot.slane %v1478_v24, 4 }
  0xc2   : > { %1715 = vst [vmem:[#allocation2 + $0xc0] sm:$0xf] %v1682_v25  ;;  %v6194_v25 = vor.u32 %v7015_v20, %v6193_v19  ;;  %v6991_v19 = vld [vmem:[#allocation4 + $0x1d4] sm:$0xf0]  ;;  %v6984_v20 = vld [vmem:[#allocation4 + $0x1a4] sm:$0xf] }
  0xc3   : > { %1634 = vst [vmem:[#allocation2 + $0x44] sm:$0xf] %v1601_v26 }
  0xc4   : > { %1375 = vmatpush.bf16.msra.mxu2 %v6194_v25 }
  0xc5   : > { %v993_v27 = vpop.f32.mrf.mxu2  ;;  %v1042_v29 = vpop.f32.mrf.mxu3 }
  0xc6   : > { %v7232_v28 = vpack.c.bf16 %v993_v27, %v991_v17  ;;  %v898_v30 = vpop.f32.mrf.mxu0  ;;  %v1479_v31 = vpack.c.bf16 %v1042_v29, %v993_v27  ;;  %v947_v34 = vpop.f32.mrf.mxu1 }
  0xc7   : > { %v1484_v32 = vpack.c.bf16 %v947_v34, %v898_v30  ;;  %v6187_v34 = vld [vmem:[#allocation4 + $0x290] sm:$0xf0] }
  0xc8   : > { %7233 = vst [vmem:[#allocation2 + $0x80] sm:$0xff] %v7232_v28   ;;  %v1683_v35 = vrot.slane %v1479_v31, 4  ;;  %1093 = vmatmul.bf16.gmra.mxu0 %v8167_v33  ;;  %v7008_v31 = vld [vmem:[#allocation4 + $0x264] sm:$0xf]  ;;  %1376 = vmatpush.bf16.msra.mxu2 %v6146_v56  ;;  %v6001_v56 = vld [vmem:[#allocation4 + $0xe8] sm:$0xf] }
  0xc9   : > { %v1602_v36 = vrot.slane %v1484_v32, 4  ;;  %1142 = vmatmul.bf16.gmra.mxu1 %v8167_v33 }
  0xca   : > { %1191 = vmatmul.bf16.gmra.mxu2 %v8167_v33  ;;  %1716 = vst [vmem:[#allocation2 + $0xc4] sm:$0xf] %v1683_v35  ;;  %1240 = vmatmul.bf16.gmra.mxu3 %v8167_v33  ;;  %v6190_v35 = vor.u32 %v7008_v31, %v6187_v34 }
  0xcb   : > { %1635 = vst [vmem:[#allocation2 + $0x48] sm:$0xf] %v1602_v36  ;;  %v7009_v36 = vld [vmem:[#allocation4 + $0x26c] sm:$0xf] }
  0xcc   : > { %1326 = vmatpush.bf16.msra.mxu1 %v6190_v35 }
  0xcd   : > { %v996_v37 = vpop.f32.mrf.mxu2  ;;  %v1045_v38 = vpop.f32.mrf.mxu3 }
  0xce   : > { %v900_v39 = vpop.f32.mrf.mxu0  ;;  %v1485_v41 = vpack.c.bf16 %v1045_v38, %v996_v37  ;;  %v949_v43 = vpop.f32.mrf.mxu1 }
  0xcf   : > { %v7197_v42 = vpack.c.bf16 %v900_v39, %v898_v30  ;;  %v1490_v44 = vpack.c.bf16 %v949_v43, %v900_v39 }
  0xd0   : > { %v1684_v45 = vrot.slane %v1485_v41, 4  ;;  %1327 = vmatpush.bf16.msra.mxu1 %v6142_v3 }
  0xd1   : > { %7557 = vst [vmem:[#allocation2 + $0x8] sm:$0xff] %v7197_v42   ;;  %v1603_v46 = vrot.slane %v1490_v44, 4 }
  0xd2   : > { %1717 = vst [vmem:[#allocation2 + $0xc8] sm:$0xf] %v1684_v45 }
  0xd3   : > { %1636 = vst [vmem:[#allocation2 + $0x4c] sm:$0xf] %v1603_v46 }
  0xd5   : > { %v998_v49 = vpop.f32.mrf.mxu2  ;;  %v1047_v54 = vpop.f32.mrf.mxu3 }
  0xd6   : > { %v7237_v33 = vpack.c.bf16 %v998_v49, %v996_v37  ;;  %v903_v55 = vpop.f32.mrf.mxu0  ;;  %v1491_v57 = vpack.c.bf16 %v1047_v54, %v998_v49  ;;  %v952_v58 = vpop.f32.mrf.mxu1  ;;  %v6195_v37 = vld [vmem:[#allocation4 + $0x298] sm:$0xf0] }
  0xd7   : > { %v1496_v59 = vpack.c.bf16 %v952_v58, %v903_v55  ;;  %v6198_v41 = vor.u32 %v7009_v36, %v6195_v37  ;;  %v6041_v36 = vld [vmem:[#allocation4 + $0x140] sm:$0xf]  ;;  %v6978_v37 = vld [vmem:[#allocation4 + $0x16c] sm:$0xf0] }
  0xd8   : > { %7564 = vst [vmem:[#allocation2 + $0x88] sm:$0xff] %v7237_v33   ;;  %v1685_v60 = vrot.slane %v1491_v57, 4  ;;  %1098 = vmatmul.bf16.gmra.mxu0 %v8174_v40 }
  0xd9   : > { %v1604_v61 = vrot.slane %v1496_v59, 4  ;;  %1147 = vmatmul.bf16.gmra.mxu1 %v8174_v40  ;;  %1424 = vmatpush.bf16.msra.mxu3 %v6198_v41  ;;  %v6972_v41 = vld [vmem:[#allocation4 + $0x144] sm:$0xf] }
  0xda   : > { %1196 = vmatmul.bf16.gmra.mxu2 %v8174_v40  ;;  %1718 = vst [vmem:[#allocation2 + $0xcc] sm:$0xf] %v1685_v60  ;;  %1245 = vmatmul.bf16.gmra.mxu3 %v8174_v40  ;;  %v6185_v40 = vld [vmem:[#allocation4 + $0x260] sm:$0xf] }
  0xdb   : > { %1637 = vst [vmem:[#allocation2 + $0x50] sm:$0xf] %v1604_v61  ;;  %v6186_v18 = vor.u32 %v7014_v16, %v6185_v40  ;;  %v6990_v40 = vld [vmem:[#allocation4 + $0x1cc] sm:$0xf0] }
  0xdd   : > { %v1001_v1 = vpop.f32.mrf.mxu2  ;;  %v1050_v6 = vpop.f32.mrf.mxu3  ;;  %1277 = vmatpush.bf16.msra.mxu0 %v6186_v18  ;;  %1425 = vmatpush.bf16.msra.mxu3 %v6150_v8  ;;  %v6097_v18 = vld [vmem:[#allocation4 + $0x1a8] sm:$0xf] }
  0xde   : > { %v905_v7 = vpop.f32.mrf.mxu0  ;;  %v1497_v9 = vpack.c.bf16 %v1050_v6, %v1001_v1  ;;  %v954_v11 = vpop.f32.mrf.mxu1  ;;  %v6098_v25 = vor.u32 %v6991_v19, %v6097_v18  ;;  %v5897_v19 = vld [vmem:[#allocation4 + $0x20] sm:$0xf] }
  0xdf   : > { %v7202_v10 = vpack.c.bf16 %v905_v7, %v903_v55  ;;  %v1502_v13 = vpack.c.bf16 %v954_v11, %v905_v7 }
  0xe0   : > { %v1686_v14 = vrot.slane %v1497_v9, 4  ;;  %1377 = vmatpush.bf16.msra.mxu2 %v6098_v25 }
  0xe1   : > { %7558 = vst [vmem:[#allocation2 + $0x10] sm:$0xff] %v7202_v10   ;;  %v1605_v15 = vrot.slane %v1502_v13, 4 }
  0xe2   : > { %1719 = vst [vmem:[#allocation2 + $0xd0] sm:$0xf] %v1686_v14 }
  0xe3   : > { %1638 = vst [vmem:[#allocation2 + $0x54] sm:$0xf] %v1605_v15 }
  0xe5   : > { %v1003_v17 = vpop.f32.mrf.mxu2  ;;  %v1052_v23 = vpop.f32.mrf.mxu3 }
  0xe6   : > { %v7242_v22 = vpack.c.bf16 %v1003_v17, %v1001_v1  ;;  %v908_v24 = vpop.f32.mrf.mxu0  ;;  %v1503_v26 = vpack.c.bf16 %v1052_v23, %v1003_v17  ;;  %v957_v27 = vpop.f32.mrf.mxu1 }
  0xe7   : > { %v1508_v28 = vpack.c.bf16 %v957_v27, %v908_v24  ;;  %v6985_v27 = vld [vmem:[#allocation4 + $0x1ac] sm:$0xf] }
  0xe8   : > { %7565 = vst [vmem:[#allocation2 + $0x90] sm:$0xff] %v7242_v22   ;;  %v1687_v29 = vrot.slane %v1503_v26, 4  ;;  %1103 = vmatmul.bf16.gmra.mxu0 %v8181_v53  ;;  %v6091_v26 = vld [vmem:[#allocation4 + $0x1d0] sm:$0xf0] }
  0xe9   : > { %v1606_v30 = vrot.slane %v1508_v28, 4  ;;  %1152 = vmatmul.bf16.gmra.mxu1 %v8181_v53  ;;  %v6099_v28 = vld [vmem:[#allocation4 + $0x1d8] sm:$0xf0]  ;;  %v6094_v31 = vor.u32 %v6984_v20, %v6091_v26  ;;  %v6942_v20 = vld [vmem:[#allocation4 + $0x4c] sm:$0xf0] }
  0xea   : > { %1201 = vmatmul.bf16.gmra.mxu2 %v8181_v53  ;;  %1720 = vst [vmem:[#allocation2 + $0xd4] sm:$0xf] %v1687_v29  ;;  %1250 = vmatmul.bf16.gmra.mxu3 %v8181_v53  ;;  %v6137_v53 = vld [vmem:[#allocation4 + $0x200] sm:$0xf]  ;;  %v5898_v26 = vor.u32 %v6942_v20, %v5897_v19 }
  0xeb   : > { %1639 = vst [vmem:[#allocation2 + $0x58] sm:$0xf] %v1606_v30  ;;  %v6138_v50 = vor.u32 %v7002_v48, %v6137_v53  ;;  %1328 = vmatpush.bf16.msra.mxu1 %v6094_v31  ;;  %v6051_v53 = vld [vmem:[#allocation4 + $0x178] sm:$0xf0] }
  0xed   : > { %v1006_v32 = vpop.f32.mrf.mxu2  ;;  %v1055_v38 = vpop.f32.mrf.mxu3  ;;  %1278 = vmatpush.bf16.msra.mxu0 %v6138_v50  ;;  %v5993_v50 = vld [vmem:[#allocation4 + $0xe0] sm:$0xf] }
  0xee   : > { %v910_v39 = vpop.f32.mrf.mxu0  ;;  %v1509_v42 = vpack.c.bf16 %v1055_v38, %v1006_v32  ;;  %v959_v44 = vpop.f32.mrf.mxu1 }
  0xef   : > { %v7207_v43 = vpack.c.bf16 %v910_v39, %v908_v24  ;;  %v1514_v45 = vpack.c.bf16 %v959_v44, %v910_v39  ;;  %v6042_v39 = vor.u32 %v6978_v37, %v6041_v36  ;;  %v6049_v44 = vld [vmem:[#allocation4 + $0x148] sm:$0xf]  ;;  %v5907_v36 = vld [vmem:[#allocation4 + $0x58] sm:$0xf0] }
  0xf0   : > { %v1688_v46 = vrot.slane %v1509_v42, 4  ;;  %v6043_v42 = vld [vmem:[#allocation4 + $0x170] sm:$0xf0] }
  0xf1   : > { %7559 = vst [vmem:[#allocation2 + $0x18] sm:$0xff] %v7207_v43   ;;  %v1607_v47 = vrot.slane %v1514_v45, 4  ;;  %v6046_v43 = vor.u32 %v6972_v41, %v6043_v42  ;;  %v6979_v45 = vld [vmem:[#allocation4 + $0x174] sm:$0xf0] }
  0xf2   : > { %1721 = vst [vmem:[#allocation2 + $0xd8] sm:$0xf] %v1688_v46  ;;  %v6050_v46 = vor.u32 %v6979_v45, %v6049_v44 }
  0xf3   : > { %1640 = vst [vmem:[#allocation2 + $0x5c] sm:$0xf] %v1607_v47  ;;  %v6973_v47 = vld [vmem:[#allocation4 + $0x14c] sm:$0xf]  ;;  %1329 = vmatpush.bf16.msra.mxu1 %v6046_v43 }
  0xf4   : > { %1378 = vmatpush.bf16.msra.mxu2 %v6050_v46 }
  0xf5   : > { %v1008_v49 = vpop.f32.mrf.mxu2  ;;  %v1057_v54 = vpop.f32.mrf.mxu3 }
  0xf6   : > { %v7247_v33 = vpack.c.bf16 %v1008_v49, %v1006_v32  ;;  %v913_v55 = vpop.f32.mrf.mxu0  ;;  %v1515_v57 = vpack.c.bf16 %v1057_v54, %v1008_v49  ;;  %v962_v58 = vpop.f32.mrf.mxu1  ;;  %v6102_v32 = vor.u32 %v6985_v27, %v6099_v28  ;;  %v6054_v49 = vor.u32 %v6973_v47, %v6051_v53  ;;  %v5899_v27 = vld [vmem:[#allocation4 + $0x50] sm:$0xf0]  ;;  %v5905_v28 = vld [vmem:[#allocation4 + $0x28] sm:$0xf] }
  0xf7   : > { %v1520_v59 = vpack.c.bf16 %v962_v58, %v913_v55 }
  0xf8   : > { %7566 = vst [vmem:[#allocation2 + $0x98] sm:$0xff] %v7247_v33   ;;  %v1689_v60 = vrot.slane %v1515_v57, 4  ;;  %1108 = vmatmul.bf16.gmra.mxu0 %v8188_v2  ;;  %1426 = vmatpush.bf16.msra.mxu3 %v6102_v32  ;;  %v6967_v57 = vld [vmem:[#allocation4 + $0x114] sm:$0xf0] }
  0xf9   : > { %v1608_v61 = vrot.slane %v1520_v59, 4  ;;  %1157 = vmatmul.bf16.gmra.mxu1 %v8188_v2  ;;  %v6002_v63 = vor.u32 %v6967_v57, %v6001_v56 }
  0xfa   : > { %1206 = vmatmul.bf16.gmra.mxu2 %v8188_v2  ;;  %1722 = vst [vmem:[#allocation2 + $0xdc] sm:$0xf] %v1689_v60  ;;  %1255 = vmatmul.bf16.gmra.mxu3 %v8188_v2  ;;  %v6089_v2 = vld [vmem:[#allocation4 + $0x1a0] sm:$0xf] }
  0xfb   : > { %1641 = vst [vmem:[#allocation2 + $0x60] sm:$0xf] %v1608_v61  ;;  %v6090_v17 = vor.u32 %v6990_v40, %v6089_v2  ;;  %1379 = vmatpush.bf16.msra.mxu2 %v6002_v63  ;;  %v6949_v40 = vld [vmem:[#allocation4 + $0x8c] sm:$0xf] }
  0xfc   : > { %1427 = vmatpush.bf16.msra.mxu3 %v6054_v49 }
  0xfd   : > { %v1011_v1 = vpop.f32.mrf.mxu2  ;;  %v1060_v6 = vpop.f32.mrf.mxu3  ;;  %1279 = vmatpush.bf16.msra.mxu0 %v6090_v17 }
  0xfe   : > { %v915_v7 = vpop.f32.mrf.mxu0  ;;  %v1521_v9 = vpack.c.bf16 %v1060_v6, %v1011_v1  ;;  %v964_v11 = vpop.f32.mrf.mxu1  ;;  %v5945_v6 = vld [vmem:[#allocation4 + $0x80] sm:$0xf] }
  0xff   : > { %v7212_v10 = vpack.c.bf16 %v915_v7, %v913_v55  ;;  %v1526_v13 = vpack.c.bf16 %v964_v11, %v915_v7  ;;  %v5995_v55 = vld [vmem:[#allocation4 + $0x110] sm:$0xf0]  ;;  %v6954_v7 = vld [vmem:[#allocation4 + $0xac] sm:$0xf0] }
 0x100   : > { %v1690_v14 = vrot.slane %v1521_v9, 4  ;;  %v5998_v61 = vor.u32 %v6960_v52, %v5995_v55  ;;  %v5946_v9 = vor.u32 %v6954_v7, %v5945_v6  ;;  %v5947_v11 = vld [vmem:[#allocation4 + $0xb0] sm:$0xf0] }
 0x101   : > { %7560 = vst [vmem:[#allocation2 + $0x20] sm:$0xff] %v7212_v10   ;;  %v1609_v15 = vrot.slane %v1526_v13, 4  ;;  %1280 = vmatpush.bf16.msra.mxu0 %v6042_v39  ;;  %v6948_v10 = vld [vmem:[#allocation4 + $0x84] sm:$0xf] }
 0x102   : > { %1723 = vst [vmem:[#allocation2 + $0xe0] sm:$0xf] %v1690_v14  ;;  %1330 = vmatpush.bf16.msra.mxu1 %v5998_v61  ;;  %v5950_v13 = vor.u32 %v6948_v10, %v5947_v11  ;;  %v5953_v14 = vld [vmem:[#allocation4 + $0x88] sm:$0xf]  ;;  %v7941_v11 = vld [vmem:[%s8157_s17] sm:$0xff] }
 0x103   : > { %1642 = vst [vmem:[#allocation2 + $0x64] sm:$0xf] %v1609_v15  ;;  %v6955_v15 = vld [vmem:[#allocation4 + $0xb4] sm:$0xf0] }
 0x104   : > { %v5954_v2 = vor.u32 %v6955_v15, %v5953_v14 }
 0x105   : > { %v1013_v16 = vpop.f32.mrf.mxu2  ;;  %v1062_v23 = vpop.f32.mrf.mxu3 }
 0x106   : > { %v7252_v22 = vpack.c.bf16 %v1013_v16, %v1011_v1  ;;  %v918_v24 = vpop.f32.mrf.mxu0  ;;  %v1527_v29 = vpack.c.bf16 %v1062_v23, %v1013_v16  ;;  %v967_v30 = vpop.f32.mrf.mxu1  ;;  %v6003_v1 = vld [vmem:[#allocation4 + $0x118] sm:$0xf0]  ;;  %1331 = vmatpush.bf16.msra.mxu1 %v5950_v13  ;;  %1380 = vmatpush.bf16.msra.mxu2 %v5954_v2 }
 0x107   : > { %v1532_v34 = vpack.c.bf16 %v967_v30, %v918_v24  ;;  %v6006_v4 = vor.u32 %v6961_v0, %v6003_v1  ;;  %v5955_v16 = vld [vmem:[#allocation4 + $0xb8] sm:$0xf0] }
 0x108   : > { %7567 = vst [vmem:[#allocation2 + $0xa0] sm:$0xff] %v7252_v22   ;;  %v1691_v35 = vrot.slane %v1527_v29, 4  ;;  %1113 = vmatmul.bf16.gmra.mxu0 %v8195_v21  ;;  %v5958_v18 = vor.u32 %v6949_v40, %v5955_v16  ;;  %v6936_v22 = vld [vmem:[#allocation4 + $0x24] sm:$0xf]  ;;  %v6943_v29 = vld [vmem:[#allocation4 + $0x54] sm:$0xf0] }
 0x109   : > { %v1610_v38 = vrot.slane %v1532_v34, 4  ;;  %1162 = vmatmul.bf16.gmra.mxu1 %v8195_v21  ;;  %1428 = vmatpush.bf16.msra.mxu3 %v6006_v4  ;;  %v5902_v34 = vor.u32 %v6936_v22, %v5899_v27  ;;  %v5906_v32 = vor.u32 %v6943_v29, %v5905_v28 }
 0x10a   : > { %1211 = vmatmul.bf16.gmra.mxu2 %v8195_v21  ;;  %1724 = vst [vmem:[#allocation2 + $0xe4] sm:$0xf] %v1691_v35  ;;  %1260 = vmatmul.bf16.gmra.mxu3 %v8195_v21  ;;  %v5994_v21 = vor.u32 %v6966_v51, %v5993_v50  ;;  %v6937_v35 = vld [vmem:[#allocation4 + $0x2c] sm:$0xf] }
 0x10b   : > { %1643 = vst [vmem:[#allocation2 + $0x68] sm:$0xf] %v1610_v38  ;;  %v5910_v38 = vor.u32 %v6937_v35, %v5907_v36  ;;  %1332 = vmatpush.bf16.msra.mxu1 %v5902_v34  ;;  %1381 = vmatpush.bf16.msra.mxu2 %v5906_v32 }
 0x10c   : > { %1281 = vmatpush.bf16.msra.mxu0 %v5994_v21 }
 0x10d   : > { %v8239_v48 = vpop.f32.mrf.mxu2  ;;  %v1065_v33 = vpop.f32.mrf.mxu3  ;;  %1429 = vmatpush.bf16.msra.mxu3 %v5958_v18 }
 0x10e   : > { %v920_v54 = vpop.f32.mrf.mxu0  ;;  %v1533_v58 = vpack.c.bf16 %v1065_v33, %v8239_v48  ;;  %v969_v60 = vpop.f32.mrf.mxu1 }
 0x10f   : > { %v7217_v59 = vpack.c.bf16 %v920_v54, %v918_v24  ;;  %v1538_v3 = vpack.c.bf16 %v969_v60, %v920_v54 }
 0x110   : > { %v1692_v5 = vrot.slane %v1533_v58, 4  ;;  %1282 = vmatpush.bf16.msra.mxu0 %v5946_v9 }
 0x111   : > { %7561 = vst [vmem:[#allocation2 + $0x28] sm:$0xff] %v7217_v59   ;;  %v1611_v8 = vrot.slane %v1538_v3, 4  ;;  %1430 = vmatpush.bf16.msra.mxu3 %v5910_v38 }
 0x112   : > { %1725 = vst [vmem:[#allocation2 + $0xe8] sm:$0xf] %v1692_v5 }
 0x113   : > { %1644 = vst [vmem:[#allocation2 + $0x6c] sm:$0xf] %v1611_v8 }
 0x114   : > { %1283 = vmatpush.bf16.msra.mxu0 %v5898_v26 }
 0x115   : > { %v1018_v17 = vpop.f32.mrf.mxu2  ;;  %v1067_v24 = vpop.f32.mrf.mxu3 }
 0x116   : > { %v7257_v23 = vpack.c.bf16 %v1018_v17, %v8239_v48  ;;  %v923_v25 = vpop.f32.mrf.mxu0  ;;  %v1539_v30 = vpack.c.bf16 %v1067_v24, %v1018_v17  ;;  %v972_v31 = vpop.f32.mrf.mxu1 }
 0x117   : > { %v1544_v37 = vpack.c.bf16 %v972_v31, %v923_v25  ;;  %v7942_v31 = vld [vmem:[%s8157_s17 + $0x8] sm:$0xff] }
 0x118   : > { %7568 = vst [vmem:[#allocation2 + $0xa8] sm:$0xff] %v7257_v23   ;;  %v1693_v39 = vrot.slane %v1539_v30, 4  ;;  %1118 = vmatmul.bf16.gmra.mxu0 %v8202_v62 }
 0x119   : > { %v1612_v41 = vrot.slane %v1544_v37, 4  ;;  %1167 = vmatmul.bf16.gmra.mxu1 %v8202_v62 }
 0x11a   : > { %1216 = vmatmul.bf16.gmra.mxu2 %v8202_v62  ;;  %1726 = vst [vmem:[#allocation2 + $0xec] sm:$0xf] %v1693_v39  ;;  %1265 = vmatmul.bf16.gmra.mxu3 %v8202_v62 }
 0x11b   : > { %1645 = vst [vmem:[#allocation2 + $0x70] sm:$0xf] %v1612_v41 }
 0x11d   : > { %v1021_v42 = vpop.f32.mrf.mxu2  ;;  %v1070_v43 = vpop.f32.mrf.mxu3 }
 0x11e   : > { %v925_v44 = vpop.f32.mrf.mxu0  ;;  %v1545_v45 = vpack.c.bf16 %v1070_v43, %v1021_v42  ;;  %v974_v47 = vpop.f32.mrf.mxu1 }
 0x11f   : > { %v7222_v46 = vpack.c.bf16 %v925_v44, %v923_v25  ;;  %v1550_v53 = vpack.c.bf16 %v974_v47, %v925_v44 }
 0x120   : > { %v1694_v48 = vrot.slane %v1545_v45, 4 }
 0x121   : > { %7562 = vst [vmem:[#allocation2 + $0x30] sm:$0xff] %v7222_v46   ;;  %v1613_v49 = vrot.slane %v1550_v53, 4 }
 0x122   : > { %1727 = vst [vmem:[#allocation2 + $0xf0] sm:$0xf] %v1694_v48 }
 0x123   : > { %1646 = vst [vmem:[#allocation2 + $0x74] sm:$0xf] %v1613_v49 }
 0x125   : > { %v1023_v50 = vpop.f32.mrf.mxu2  ;;  %v1072_v52 = vpop.f32.mrf.mxu3 }
 0x126   : > { %v7262_v51 = vpack.c.bf16 %v1023_v50, %v1021_v42  ;;  %v928_v33 = vpop.f32.mrf.mxu0  ;;  %v1551_v62 = vpack.c.bf16 %v1072_v52, %v1023_v50  ;;  %v977_v54 = vpop.f32.mrf.mxu1  ;;  %v7943_v52 = vld [vmem:[%s8157_s17 + $0x10] sm:$0xff] }
 0x127   : > { %v1556_v21 = vpack.c.bf16 %v977_v54, %v928_v33 }
 0x128   : > { %7569 = vst [vmem:[#allocation2 + $0xb0] sm:$0xff] %v7262_v51   ;;  %v1695_v55 = vrot.slane %v1551_v62, 4  ;;  %1123 = vmatmul.bf16.gmra.mxu0 %v8209_v12 }
 0x129   : > { %v1614_v56 = vrot.slane %v1556_v21, 4  ;;  %1172 = vmatmul.bf16.gmra.mxu1 %v8209_v12 }
 0x12a   : > { %1221 = vmatmul.bf16.gmra.mxu2 %v8209_v12  ;;  %1728 = vst [vmem:[#allocation2 + $0xf4] sm:$0xf] %v1695_v55  ;;  %1270 = vmatmul.bf16.gmra.mxu3 %v8209_v12 }
 0x12b   : > { %1647 = vst [vmem:[#allocation2 + $0x78] sm:$0xf] %v1614_v56 }
 0x12d   : > { %v1026_v57 = vpop.f32.mrf.mxu2  ;;  %v1075_v58 = vpop.f32.mrf.mxu3 }
 0x12e   : > { %v930_v59 = vpop.f32.mrf.mxu0  ;;  %v1557_v60 = vpack.c.bf16 %v1075_v58, %v1026_v57  ;;  %v979_v63 = vpop.f32.mrf.mxu1 }
 0x12f   : > { %v7227_v61 = vpack.c.bf16 %v930_v59, %v928_v33  ;;  %v1562_v0 = vpack.c.bf16 %v979_v63, %v930_v59 }
 0x130   : > { %v1696_v1 = vrot.slane %v1557_v60, 4 }
 0x131   : > { %7563 = vst [vmem:[#allocation2 + $0x38] sm:$0xff] %v7227_v61   ;;  %v1615_v3 = vrot.slane %v1562_v0, 4 }
 0x132   : > { %1729 = vst [vmem:[#allocation2 + $0xf8] sm:$0xf] %v1696_v1 }
 0x133   : > { %1648 = vst [vmem:[#allocation2 + $0x7c] sm:$0xf] %v1615_v3 }
 0x135   : > { %v1028_v4 = vpop.f32.mrf.mxu2  ;;  %v1077_v6 = vpop.f32.mrf.mxu3 }
 0x136   : > { %v7267_v5 = vpack.c.bf16 %v1028_v4, %v1026_v57  ;;  %v1089_v7 = vpop.f32.mrf.mxu0  ;;  %v1563_v8 = vpack.c.bf16 %v1077_v6, %v1028_v4  ;;  %v1138_v12 = vpop.f32.mrf.mxu1 }
 0x137   : > { %v1474_v9 = vpack.c.bf16 %v1138_v12, %v1089_v7 }
 0x138   : > { %7570 = vst [vmem:[#allocation2 + $0xb8] sm:$0xff] %v7267_v5   ;;  %v1697_v10 = vrot.slane %v1563_v8, 4  ;;  %1284 = vmatmul.bf16.vlgmr.msra.gmra.mxu0 %v7941_v11  ;;  %v7944_v8 = vld [vmem:[%s8157_s17 + $0x18] sm:$0xff] }
 0x139   : > { %v1764_v13 = vrot.slane %v1474_v9, 4  ;;  %1333 = vmatmul.bf16.vlgmr.msra.gmra.mxu1 %v7941_v11 }
 0x13a   : > { %1382 = vmatmul.bf16.vlgmr.msra.gmra.mxu2 %v7941_v11  ;;  %1730 = vst [vmem:[#allocation2 + $0xfc] sm:$0xf] %v1697_v10  ;;  %1431 = vmatmul.bf16.vlgmr.msra.gmra.mxu3 %v7941_v11 }
 0x13b   : > { %1797 = vst [vmem:[#allocation2 + $0x140] sm:$0xf] %v1764_v13 }
 0x13d   : > { %v1187_v14 = vpop.f32.mrf.mxu2  ;;  %v1236_v15 = vpop.f32.mrf.mxu3 }
 0x13e   : > { %v1091_v2 = vpop.f32.mrf.mxu0  ;;  %v1475_v40 = vpack.c.bf16 %v1236_v15, %v1187_v14  ;;  %v1140_v17 = vpop.f32.mrf.mxu1 }
 0x13f   : > { %v7272_v16 = vpack.c.bf16 %v1091_v2, %v1089_v7  ;;  %v1480_v18 = vpack.c.bf16 %v1140_v17, %v1091_v2 }
 0x140   : > { %v1846_v19 = vrot.slane %v1475_v40, 4 }
 0x141   : > { %7273 = vst [vmem:[#allocation2 + $0x100] sm:$0xff] %v7272_v16   ;;  %v1765_v20 = vrot.slane %v1480_v18, 4 }
 0x142   : > { %1879 = vst [vmem:[#allocation2 + $0x1c0] sm:$0xf] %v1846_v19 }
 0x143   : > { %1798 = vst [vmem:[#allocation2 + $0x144] sm:$0xf] %v1765_v20 }
 0x145   : > { %v1189_v22 = vpop.f32.mrf.mxu2  ;;  %v1238_v24 = vpop.f32.mrf.mxu3 }
 0x146   : > { %v7312_v23 = vpack.c.bf16 %v1189_v22, %v1187_v14  ;;  %v1094_v25 = vpop.f32.mrf.mxu0  ;;  %v1481_v26 = vpack.c.bf16 %v1238_v24, %v1189_v22  ;;  %v1143_v27 = vpop.f32.mrf.mxu1 }
 0x147   : > { %v1486_v28 = vpack.c.bf16 %v1143_v27, %v1094_v25  ;;  %v7945_v27 = vld [vmem:[%s8157_s17 + $0x20] sm:$0xff] }
 0x148   : > { %7313 = vst [vmem:[#allocation2 + $0x180] sm:$0xff] %v7312_v23   ;;  %v7060_v29 = vld [vmem:[#allocation2 + $0x100] sm:$0xff]  ;;  %v1847_v30 = vrot.slane %v1481_v26, 4  ;;  %1289 = vmatmul.bf16.gmra.mxu0 %v7942_v31 }
 0x149   : > { %v1766_v34 = vrot.slane %v1486_v28, 4  ;;  %1338 = vmatmul.bf16.gmra.mxu1 %v7942_v31  ;;  %2398 = vmatpush.bf16.xpose.msrb.mxu0 %v7060_v29 }
 0x14a   : > { %1387 = vmatmul.bf16.gmra.mxu2 %v7942_v31  ;;  %1880 = vst [vmem:[#allocation2 + $0x1c4] sm:$0xf] %v1847_v30  ;;  %1436 = vmatmul.bf16.gmra.mxu3 %v7942_v31 }
 0x14b   : > { %1799 = vst [vmem:[#allocation2 + $0x148] sm:$0xf] %v1766_v34 }
 0x14d   : > { %v1192_v32 = vpop.f32.mrf.mxu2  ;;  %v1241_v35 = vpop.f32.mrf.mxu3 }
 0x14e   : > { %v1096_v36 = vpop.f32.mrf.mxu0  ;;  %v1487_v37 = vpack.c.bf16 %v1241_v35, %v1192_v32  ;;  %v1145_v39 = vpop.f32.mrf.mxu1 }
 0x14f   : > { %v7277_v38 = vpack.c.bf16 %v1096_v36, %v1094_v25  ;;  %v1492_v41 = vpack.c.bf16 %v1145_v39, %v1096_v36 }
 0x150   : > { %v1848_v42 = vrot.slane %v1487_v37, 4 }
 0x151   : > { %7571 = vst [vmem:[#allocation2 + $0x108] sm:$0xff] %v7277_v38   ;;  %v1767_v43 = vrot.slane %v1492_v41, 4 }
 0x152   : > { %1881 = vst [vmem:[#allocation2 + $0x1c8] sm:$0xf] %v1848_v42 }
 0x153   : > { %1800 = vst [vmem:[#allocation2 + $0x14c] sm:$0xf] %v1767_v43 }
 0x155   : > { %v1194_v44 = vpop.f32.mrf.mxu2  ;;  %v1243_v46 = vpop.f32.mrf.mxu3 }
 0x156   : > { %v7317_v45 = vpack.c.bf16 %v1194_v44, %v1192_v32  ;;  %v1099_v47 = vpop.f32.mrf.mxu0  ;;  %v1493_v53 = vpack.c.bf16 %v1243_v46, %v1194_v44  ;;  %v1148_v48 = vpop.f32.mrf.mxu1 }
 0x157   : > { %v1498_v49 = vpack.c.bf16 %v1148_v48, %v1099_v47  ;;  %v7946_v48 = vld [vmem:[%s8157_s17 + $0x28] sm:$0xff] }
 0x158   : > { %7578 = vst [vmem:[#allocation2 + $0x188] sm:$0xff] %v7317_v45   ;;  %v7061_v50 = vld [vmem:[#allocation2 + $0x108] sm:$0xff]  ;;  %v1849_v51 = vrot.slane %v1493_v53, 4  ;;  %1294 = vmatmul.bf16.gmra.mxu0 %v7943_v52 }
 0x159   : > { %v1768_v33 = vrot.slane %v1498_v49, 4  ;;  %1343 = vmatmul.bf16.gmra.mxu1 %v7943_v52 }
 0x15a   : > { %1392 = vmatmul.bf16.gmra.mxu2 %v7943_v52  ;;  %1882 = vst [vmem:[#allocation2 + $0x1cc] sm:$0xf] %v1849_v51  ;;  %1441 = vmatmul.bf16.gmra.mxu3 %v7943_v52 }
 0x15b   : > { %2424 = vmatpush.bf16.xpose.msrb.mxu1 %v7061_v50  ;;  %1801 = vst [vmem:[#allocation2 + $0x150] sm:$0xf] %v1768_v33 }
 0x15d   : > { %v1197_v62 = vpop.f32.mrf.mxu2  ;;  %v1246_v54 = vpop.f32.mrf.mxu3 }
 0x15e   : > { %v1101_v21 = vpop.f32.mrf.mxu0  ;;  %v1499_v55 = vpack.c.bf16 %v1246_v54, %v1197_v62  ;;  %v1150_v57 = vpop.f32.mrf.mxu1 }
 0x15f   : > { %v7282_v56 = vpack.c.bf16 %v1101_v21, %v1099_v47  ;;  %v1504_v58 = vpack.c.bf16 %v1150_v57, %v1101_v21 }
 0x160   : > { %v1850_v59 = vrot.slane %v1499_v55, 4 }
 0x161   : > { %7572 = vst [vmem:[#allocation2 + $0x110] sm:$0xff] %v7282_v56   ;;  %v1769_v60 = vrot.slane %v1504_v58, 4 }
 0x162   : > { %1883 = vst [vmem:[#allocation2 + $0x1d0] sm:$0xf] %v1850_v59 }
 0x163   : > { %1802 = vst [vmem:[#allocation2 + $0x154] sm:$0xf] %v1769_v60 }
 0x165   : > { %v1199_v61 = vpop.f32.mrf.mxu2  ;;  %v1248_v0 = vpop.f32.mrf.mxu3 }
 0x166   : > { %v7322_v63 = vpack.c.bf16 %v1199_v61, %v1197_v62  ;;  %v1104_v1 = vpop.f32.mrf.mxu0  ;;  %v1505_v3 = vpack.c.bf16 %v1248_v0, %v1199_v61  ;;  %v1153_v4 = vpop.f32.mrf.mxu1 }
 0x167   : > { %v1510_v5 = vpack.c.bf16 %v1153_v4, %v1104_v1  ;;  %v7947_v4 = vld [vmem:[%s8157_s17 + $0x30] sm:$0xff] }
 0x168   : > { %7579 = vst [vmem:[#allocation2 + $0x190] sm:$0xff] %v7322_v63   ;;  %v7062_v6 = vld [vmem:[#allocation2 + $0x110] sm:$0xff]  ;;  %v1851_v7 = vrot.slane %v1505_v3, 4  ;;  %1299 = vmatmul.bf16.gmra.mxu0 %v7944_v8 }
 0x169   : > { %v1770_v12 = vrot.slane %v1510_v5, 4  ;;  %1348 = vmatmul.bf16.gmra.mxu1 %v7944_v8  ;;  %2450 = vmatpush.bf16.xpose.msrb.mxu2 %v7062_v6 }
 0x16a   : > { %1397 = vmatmul.bf16.gmra.mxu2 %v7944_v8  ;;  %1884 = vst [vmem:[#allocation2 + $0x1d4] sm:$0xf] %v1851_v7  ;;  %1446 = vmatmul.bf16.gmra.mxu3 %v7944_v8 }
 0x16b   : > { %1803 = vst [vmem:[#allocation2 + $0x158] sm:$0xf] %v1770_v12 }
 0x16d   : > { %v1202_v9 = vpop.f32.mrf.mxu2  ;;  %v1251_v10 = vpop.f32.mrf.mxu3 }
 0x16e   : > { %v1106_v11 = vpop.f32.mrf.mxu0  ;;  %v1511_v13 = vpack.c.bf16 %v1251_v10, %v1202_v9  ;;  %v1155_v15 = vpop.f32.mrf.mxu1 }
 0x16f   : > { %v7287_v14 = vpack.c.bf16 %v1106_v11, %v1104_v1  ;;  %v1516_v2 = vpack.c.bf16 %v1155_v15, %v1106_v11 }
 0x170   : > { %v1852_v40 = vrot.slane %v1511_v13, 4 }
 0x171   : > { %7573 = vst [vmem:[#allocation2 + $0x118] sm:$0xff] %v7287_v14   ;;  %v1771_v16 = vrot.slane %v1516_v2, 4 }
 0x172   : > { %1885 = vst [vmem:[#allocation2 + $0x1d8] sm:$0xf] %v1852_v40 }
 0x173   : > { %1804 = vst [vmem:[#allocation2 + $0x15c] sm:$0xf] %v1771_v16 }
 0x175   : > { %v1204_v17 = vpop.f32.mrf.mxu2  ;;  %v1253_v19 = vpop.f32.mrf.mxu3 }
 0x176   : > { %v7327_v18 = vpack.c.bf16 %v1204_v17, %v1202_v9  ;;  %v1109_v20 = vpop.f32.mrf.mxu0  ;;  %v1517_v22 = vpack.c.bf16 %v1253_v19, %v1204_v17  ;;  %v1158_v23 = vpop.f32.mrf.mxu1 }
 0x177   : > { %v1522_v24 = vpack.c.bf16 %v1158_v23, %v1109_v20  ;;  %v7948_v23 = vld [vmem:[%s8157_s17 + $0x38] sm:$0xff]  ;;  %s7999_s17 = scalar_lea.hbm %s9281_s5, 256 }
 0x178   : > { %7580 = vst [vmem:[#allocation2 + $0x198] sm:$0xff] %v7327_v18   ;;  %v7063_v25 = vld [vmem:[#allocation2 + $0x118] sm:$0xff]  ;;  %v1853_v26 = vrot.slane %v1517_v22, 4  ;;  %1304 = vmatmul.bf16.gmra.mxu0 %v7945_v27  ;;  %p8001_p4 = scmp.lt.s32.totalorder %s7999_s17, %s7995_s14 }
 0x179   : > { %v1772_v28 = vrot.slane %v1522_v24, 4  ;;  %1353 = vmatmul.bf16.gmra.mxu1 %v7945_v27  ;;  %2476 = vmatpush.bf16.xpose.msrb.mxu3 %v7063_v25 }
 0x17a   : > { %1402 = vmatmul.bf16.gmra.mxu2 %v7945_v27  ;;  %1886 = vst [vmem:[#allocation2 + $0x1dc] sm:$0xf] %v1853_v26  ;;  %1451 = vmatmul.bf16.gmra.mxu3 %v7945_v27  ;;  %p8002_p7 = por %p8001_p4, %p8000_p3 }
 0x17b   : > { %1805 = vst [vmem:[#allocation2 + $0x160] sm:$0xf] %v1772_v28 }
 0x17c   : > { %p8003_p8 = pnand %p8002_p7, %p7998_p2 }
 0x17d   : > { %v1207_v29 = vpop.f32.mrf.mxu2  ;;  %v1256_v30 = vpop.f32.mrf.mxu3 }
 0x17e   : > { %v1111_v31 = vpop.f32.mrf.mxu0  ;;  %v1523_v34 = vpack.c.bf16 %v1256_v30, %v1207_v29  ;;  %v1160_v35 = vpop.f32.mrf.mxu1 }
 0x17f   : > { %v7292_v32 = vpack.c.bf16 %v1111_v31, %v1109_v20  ;;  %v1528_v36 = vpack.c.bf16 %v1160_v35, %v1111_v31 }
 0x180   : > { %v1854_v37 = vrot.slane %v1523_v34, 4 }
 0x181   : > { %7574 = vst [vmem:[#allocation2 + $0x120] sm:$0xff] %v7292_v32   ;;  %v1773_v38 = vrot.slane %v1528_v36, 4 }
 0x182   : > { %1887 = vst [vmem:[#allocation2 + $0x1e0] sm:$0xf] %v1854_v37 }
 0x183   : > { %1806 = vst [vmem:[#allocation2 + $0x164] sm:$0xf] %v1773_v38 }
 0x185   : > { %v1209_v39 = vpop.f32.mrf.mxu2  ;;  %v1258_v42 = vpop.f32.mrf.mxu3 }
 0x186   : > { %v7332_v41 = vpack.c.bf16 %v1209_v39, %v1207_v29  ;;  %v1114_v43 = vpop.f32.mrf.mxu0  ;;  %v1529_v44 = vpack.c.bf16 %v1258_v42, %v1209_v39  ;;  %v1163_v45 = vpop.f32.mrf.mxu1  ;;  %v7028_v42 = vld [vmem:[#allocation2] sm:$0xff] }
 0x187   : > { %v1534_v46 = vpack.c.bf16 %v1163_v45, %v1114_v43  ;;  %v7030_v45 = vld [vmem:[#allocation2 + $0x10] sm:$0xff] }
 0x188   : > { %7581 = vst [vmem:[#allocation2 + $0x1a0] sm:$0xff] %v7332_v41   ;;  %v7064_v47 = vld [vmem:[#allocation2 + $0x120] sm:$0xff]  ;;  %v1855_v53 = vrot.slane %v1529_v44, 4  ;;  %1309 = vmatmul.bf16.gmra.mxu0 %v7946_v48  ;;  %v7029_v44 = vld [vmem:[#allocation2 + $0x8] sm:$0xff] }
 0x189   : > { %v1774_v49 = vrot.slane %v1534_v46, 4  ;;  %1358 = vmatmul.bf16.gmra.mxu1 %v7946_v48  ;;  %2502 = vmatpush.bf16.xpose.msra.mxu0 %v7064_v47  ;;  %v7031_v47 = vld [vmem:[#allocation2 + $0x18] sm:$0xff] }
 0x18a   : > { %1407 = vmatmul.bf16.gmra.mxu2 %v7946_v48  ;;  %1888 = vst [vmem:[#allocation2 + $0x1e4] sm:$0xf] %v1855_v53  ;;  %1456 = vmatmul.bf16.gmra.mxu3 %v7946_v48  ;;  %v7068_v53 = vld [vmem:[#allocation2 + $0x140] sm:$0xff] }
 0x18b   : > { %1807 = vst [vmem:[#allocation2 + $0x168] sm:$0xf] %v1774_v49 }
 0x18d   : > { %v1212_v50 = vpop.f32.mrf.mxu2  ;;  %v1261_v51 = vpop.f32.mrf.mxu3 }
 0x18e   : > { %v1116_v52 = vpop.f32.mrf.mxu0  ;;  %v1535_v33 = vpack.c.bf16 %v1261_v51, %v1212_v50  ;;  %v1165_v54 = vpop.f32.mrf.mxu1  ;;  %v7070_v51 = vld [vmem:[#allocation2 + $0x150] sm:$0xff] }
 0x18f   : > { %v7297_v62 = vpack.c.bf16 %v1116_v52, %v1114_v43  ;;  %v1540_v21 = vpack.c.bf16 %v1165_v54, %v1116_v52  ;;  %v7071_v52 = vld [vmem:[#allocation2 + $0x158] sm:$0xff] }
 0x190   : > { %v1856_v55 = vrot.slane %v1535_v33, 4 }
 0x191   : > { %7575 = vst [vmem:[#allocation2 + $0x128] sm:$0xff] %v7297_v62   ;;  %v1775_v56 = vrot.slane %v1540_v21, 4 }
 0x192   : > { %1889 = vst [vmem:[#allocation2 + $0x1e8] sm:$0xf] %v1856_v55 }
 0x193   : > { %1808 = vst [vmem:[#allocation2 + $0x16c] sm:$0xf] %v1775_v56 }
 0x195   : > { %v1214_v57 = vpop.f32.mrf.mxu2  ;;  %v1263_v59 = vpop.f32.mrf.mxu3 }
 0x196   : > { %v7337_v58 = vpack.c.bf16 %v1214_v57, %v1212_v50  ;;  %v1119_v60 = vpop.f32.mrf.mxu0  ;;  %v1541_v61 = vpack.c.bf16 %v1263_v59, %v1214_v57  ;;  %v1168_v63 = vpop.f32.mrf.mxu1  ;;  %v7069_v50 = vld [vmem:[#allocation2 + $0x148] sm:$0xff] }
 0x197   : > { %v1546_v0 = vpack.c.bf16 %v1168_v63, %v1119_v60 }
 0x198   : > { %7582 = vst [vmem:[#allocation2 + $0x1a8] sm:$0xff] %v7337_v58   ;;  %v7065_v1 = vld [vmem:[#allocation2 + $0x128] sm:$0xff]  ;;  %v1857_v3 = vrot.slane %v1541_v61, 4  ;;  %1314 = vmatmul.bf16.gmra.mxu0 %v7947_v4 }
 0x199   : > { %v1776_v5 = vrot.slane %v1546_v0, 4  ;;  %1363 = vmatmul.bf16.gmra.mxu1 %v7947_v4 }
 0x19a   : > { %1412 = vmatmul.bf16.gmra.mxu2 %v7947_v4  ;;  %1890 = vst [vmem:[#allocation2 + $0x1ec] sm:$0xf] %v1857_v3  ;;  %1461 = vmatmul.bf16.gmra.mxu3 %v7947_v4  ;;  %v7032_v4 = vld [vmem:[#allocation2 + $0x20] sm:$0xff] }
 0x19b   : > { %2528 = vmatpush.bf16.xpose.msra.mxu1 %v7065_v1  ;;  %1809 = vst [vmem:[#allocation2 + $0x170] sm:$0xf] %v1776_v5 }
 0x19d   : > { %v1217_v6 = vpop.f32.mrf.mxu2  ;;  %v1266_v7 = vpop.f32.mrf.mxu3 }
 0x19e   : > { %v1121_v8 = vpop.f32.mrf.mxu0  ;;  %v1547_v12 = vpack.c.bf16 %v1266_v7, %v1217_v6  ;;  %v1170_v10 = vpop.f32.mrf.mxu1  ;;  %v7034_v7 = vld [vmem:[#allocation2 + $0x30] sm:$0xff] }
 0x19f   : > { %v7302_v9 = vpack.c.bf16 %v1121_v8, %v1119_v60  ;;  %v1552_v11 = vpack.c.bf16 %v1170_v10, %v1121_v8 }
 0x1a0   : > { %v1858_v13 = vrot.slane %v1547_v12, 4  ;;  %v7035_v12 = vld [vmem:[#allocation2 + $0x38] sm:$0xff] }
 0x1a1   : > { %7576 = vst [vmem:[#allocation2 + $0x130] sm:$0xff] %v7302_v9   ;;  %v1777_v14 = vrot.slane %v1552_v11, 4  ;;  %v7072_v9 = vld [vmem:[#allocation2 + $0x160] sm:$0xff]  ;;  %v7073_v11 = vld [vmem:[#allocation2 + $0x168] sm:$0xff] }
 0x1a2   : > { %1891 = vst [vmem:[#allocation2 + $0x1f0] sm:$0xf] %v1858_v13 }
 0x1a3   : > { %1810 = vst [vmem:[#allocation2 + $0x174] sm:$0xf] %v1777_v14 }
 0x1a5   : > { %v1219_v15 = vpop.f32.mrf.mxu2  ;;  %v1268_v40 = vpop.f32.mrf.mxu3 }
 0x1a6   : > { %v7342_v2 = vpack.c.bf16 %v1219_v15, %v1217_v6  ;;  %v1124_v16 = vpop.f32.mrf.mxu0  ;;  %v1553_v17 = vpack.c.bf16 %v1268_v40, %v1219_v15  ;;  %v1173_v18 = vpop.f32.mrf.mxu1  ;;  %v7033_v6 = vld [vmem:[#allocation2 + $0x28] sm:$0xff] }
 0x1a7   : > { %v1558_v19 = vpack.c.bf16 %v1173_v18, %v1124_v16 }
 0x1a8   : > { %7583 = vst [vmem:[#allocation2 + $0x1b0] sm:$0xff] %v7342_v2   ;;  %v7066_v20 = vld [vmem:[#allocation2 + $0x130] sm:$0xff]  ;;  %v1859_v22 = vrot.slane %v1553_v17, 4  ;;  %1319 = vmatmul.bf16.gmra.mxu0 %v7948_v23 }
 0x1a9   : > { %v1778_v24 = vrot.slane %v1558_v19, 4  ;;  %1368 = vmatmul.bf16.gmra.mxu1 %v7948_v23  ;;  %2554 = vmatpush.bf16.xpose.msra.mxu2 %v7066_v20 }
 0x1aa   : > { %1417 = vmatmul.bf16.gmra.mxu2 %v7948_v23  ;;  %1892 = vst [vmem:[#allocation2 + $0x1f4] sm:$0xf] %v1859_v22  ;;  %1466 = vmatmul.bf16.gmra.mxu3 %v7948_v23  ;;  %v7074_v13 = vld [vmem:[#allocation2 + $0x170] sm:$0xff] }
 0x1ab   : > { %1811 = vst [vmem:[#allocation2 + $0x178] sm:$0xf] %v1778_v24 }
 0x1ad   : > { %v1222_v25 = vpop.f32.mrf.mxu2  ;;  %v1271_v26 = vpop.f32.mrf.mxu3 }
 0x1ae   : > { %v1126_v27 = vpop.f32.mrf.mxu0  ;;  %v1559_v28 = vpack.c.bf16 %v1271_v26, %v1222_v25  ;;  %v1175_v30 = vpop.f32.mrf.mxu1 }
 0x1af   : > { %v7307_v29 = vpack.c.bf16 %v1126_v27, %v1124_v16  ;;  %v1564_v31 = vpack.c.bf16 %v1175_v30, %v1126_v27 }
 0x1b0   : > { %v1860_v34 = vrot.slane %v1559_v28, 4 }
 0x1b1   : > { %7577 = vst [vmem:[#allocation2 + $0x138] sm:$0xff] %v7307_v29   ;;  %v1779_v32 = vrot.slane %v1564_v31, 4  ;;  %v7036_v29 = vld [vmem:[#allocation2 + $0x40] sm:$0xff]  ;;  %v7037_v31 = vld [vmem:[#allocation2 + $0x48] sm:$0xff] }
 0x1b2   : > { %1893 = vst [vmem:[#allocation2 + $0x1f8] sm:$0xf] %v1860_v34  ;;  %v7038_v34 = vld [vmem:[#allocation2 + $0x50] sm:$0xff] }
 0x1b3   : > { %1812 = vst [vmem:[#allocation2 + $0x17c] sm:$0xf] %v1779_v32 }
 0x1b5   : > { %v1224_v35 = vpop.f32.mrf.mxu2  ;;  %v1273_v37 = vpop.f32.mrf.mxu3 }
 0x1b6   : > { %v7347_v36 = vpack.c.bf16 %v1224_v35, %v1222_v25  ;;  %v1285_v38 = vpop.f32.mrf.mxu0  ;;  %v1565_v39 = vpack.c.bf16 %v1273_v37, %v1224_v35  ;;  %v1334_v41 = vpop.f32.mrf.mxu1  ;;  %v7039_v35 = vld [vmem:[#allocation2 + $0x58] sm:$0xff] }
 0x1b7   : > { %v1476_v43 = vpack.c.bf16 %v1334_v41, %v1285_v38  ;;  %v7079_v41 = vld [vmem:[#allocation2 + $0x198] sm:$0xff] }
 0x1b8   : > { %7584 = vst [vmem:[#allocation2 + $0x1b8] sm:$0xff] %v7347_v36   ;;  %v1861_v46 = vrot.slane %v1565_v39, 4  ;;  %2399 = vmatmul.bf16.vlgmr.msrb.gmra.mxu0 %v7028_v42  ;;  %v7067_v48 = vld [vmem:[#allocation2 + $0x138] sm:$0xff]  ;;  %v7076_v36 = vld [vmem:[#allocation2 + $0x180] sm:$0xff]  ;;  %v7078_v39 = vld [vmem:[#allocation2 + $0x190] sm:$0xff] }
 0x1b9   : > { %v1928_v49 = vrot.slane %v1476_v43, 4  ;;  %2425 = vmatmul.bf16.vlgmr.msrb.gmra.mxu1 %v7029_v44  ;;  %2606 = vmatpush.bf16.xpose.msrb.mxu0 %v7068_v53 }
 0x1ba   : > { %2451 = vmatmul.bf16.vlgmr.msrb.gmra.mxu2 %v7030_v45  ;;  %1894 = vst [vmem:[#allocation2 + $0x1fc] sm:$0xf] %v1861_v46  ;;  %2477 = vmatmul.bf16.vlgmr.msrb.gmra.mxu3 %v7031_v47  ;;  %v7075_v14 = vld [vmem:[#allocation2 + $0x178] sm:$0xff] }
 0x1bb   : > { %1961 = vst [vmem:[#allocation2 + $0x240] sm:$0xf] %v1928_v49  ;;  %2632 = vmatpush.bf16.xpose.msrb.mxu1 %v7069_v50  ;;  %2658 = vmatpush.bf16.xpose.msrb.mxu2 %v7070_v51 }
 0x1bc   : > { %2580 = vmatpush.bf16.xpose.msra.mxu3 %v7067_v48 }
 0x1bd   : > { %v1383_v33 = vpop.f32.mrf.mxu2  ;;  %v1432_v62 = vpop.f32.mrf.mxu3 }
 0x1be   : > { %v1287_v54 = vpop.f32.mrf.mxu0  ;;  %v1477_v21 = vpack.c.bf16 %v1432_v62, %v1383_v33  ;;  %v1336_v56 = vpop.f32.mrf.mxu1 }
 0x1bf   : > { %v7352_v55 = vpack.c.bf16 %v1287_v54, %v1285_v38  ;;  %v1482_v57 = vpack.c.bf16 %v1336_v56, %v1287_v54  ;;  %v7077_v38 = vld [vmem:[#allocation2 + $0x188] sm:$0xff] }
 0x1c0   : > { %v2010_v58 = vrot.slane %v1477_v21, 4  ;;  %v7040_v21 = vld [vmem:[#allocation2 + $0x60] sm:$0xff]  ;;  %v7041_v56 = vld [vmem:[#allocation2 + $0x68] sm:$0xff] }
 0x1c1   : > { %7353 = vst [vmem:[#allocation2 + $0x200] sm:$0xff] %v7352_v55   ;;  %v1929_v59 = vrot.slane %v1482_v57, 4  ;;  %v7042_v57 = vld [vmem:[#allocation2 + $0x70] sm:$0xff] }
 0x1c2   : > { %2043 = vst [vmem:[#allocation2 + $0x2c0] sm:$0xf] %v2010_v58 }
 0x1c3   : > { %1962 = vst [vmem:[#allocation2 + $0x244] sm:$0xf] %v1929_v59  ;;  %v7043_v59 = vld [vmem:[#allocation2 + $0x78] sm:$0xff] }
 0x1c4   : > { %2684 = vmatpush.bf16.xpose.msrb.mxu3 %v7071_v52 }
 0x1c5   : > { %v1385_v60 = vpop.f32.mrf.mxu2  ;;  %v1434_v63 = vpop.f32.mrf.mxu3 }
 0x1c6   : > { %v7392_v61 = vpack.c.bf16 %v1385_v60, %v1383_v33  ;;  %v1290_v0 = vpop.f32.mrf.mxu0  ;;  %v1483_v1 = vpack.c.bf16 %v1434_v63, %v1385_v60  ;;  %v1339_v3 = vpop.f32.mrf.mxu1  ;;  %v7080_v60 = vld [vmem:[#allocation2 + $0x1a0] sm:$0xff]  ;;  %v7081_v63 = vld [vmem:[#allocation2 + $0x1a8] sm:$0xff] }
 0x1c7   : > { %v1488_v5 = vpack.c.bf16 %v1339_v3, %v1290_v0 }
 0x1c8   : > { %7393 = vst [vmem:[#allocation2 + $0x280] sm:$0xff] %v7392_v61   ;;  %v2011_v8 = vrot.slane %v1483_v1, 4  ;;  %2503 = vmatmul.bf16.vlgmr.msra.gmra.mxu0 %v7032_v4  ;;  %v7083_v1 = vld [vmem:[#allocation2 + $0x1b8] sm:$0xff] }
 0x1c9   : > { %v1930_v10 = vrot.slane %v1488_v5, 4  ;;  %2529 = vmatmul.bf16.vlgmr.msra.gmra.mxu1 %v7033_v6  ;;  %2710 = vmatpush.bf16.xpose.msra.mxu0 %v7072_v9 }
 0x1ca   : > { %2555 = vmatmul.bf16.vlgmr.msra.gmra.mxu2 %v7034_v7  ;;  %2044 = vst [vmem:[#allocation2 + $0x2c4] sm:$0xf] %v2011_v8  ;;  %2581 = vmatmul.bf16.vlgmr.msra.gmra.mxu3 %v7035_v12 }
 0x1cb   : > { %1963 = vst [vmem:[#allocation2 + $0x248] sm:$0xf] %v1930_v10  ;;  %2736 = vmatpush.bf16.xpose.msra.mxu1 %v7073_v11  ;;  %2762 = vmatpush.bf16.xpose.msra.mxu2 %v7074_v13 }
 0x1cc   : > { %2788 = vmatpush.bf16.xpose.msra.mxu3 %v7075_v14 }
 0x1cd   : > { %v1388_v15 = vpop.f32.mrf.mxu2  ;;  %v1437_v2 = vpop.f32.mrf.mxu3 }
 0x1ce   : > { %v1292_v40 = vpop.f32.mrf.mxu0  ;;  %v1489_v16 = vpack.c.bf16 %v1437_v2, %v1388_v15  ;;  %v1341_v18 = vpop.f32.mrf.mxu1 }
 0x1cf   : > { %v7357_v17 = vpack.c.bf16 %v1292_v40, %v1290_v0  ;;  %v1494_v19 = vpack.c.bf16 %v1341_v18, %v1292_v40  ;;  %v7082_v0 = vld [vmem:[#allocation2 + $0x1b0] sm:$0xff]  ;;  %v7045_v18 = vld [vmem:[#allocation2 + $0x88] sm:$0xff] }
 0x1d0   : > { %v2012_v20 = vrot.slane %v1489_v16, 4  ;;  %v7044_v16 = vld [vmem:[#allocation2 + $0x80] sm:$0xff] }
 0x1d1   : > { %7585 = vst [vmem:[#allocation2 + $0x208] sm:$0xff] %v7357_v17   ;;  %v1931_v22 = vrot.slane %v1494_v19, 4  ;;  %v7046_v19 = vld [vmem:[#allocation2 + $0x90] sm:$0xff] }
 0x1d2   : > { %2045 = vst [vmem:[#allocation2 + $0x2c8] sm:$0xf] %v2012_v20 }
 0x1d3   : > { %1964 = vst [vmem:[#allocation2 + $0x24c] sm:$0xf] %v1931_v22  ;;  %v7047_v22 = vld [vmem:[#allocation2 + $0x98] sm:$0xff] }
 0x1d5   : > { %v1390_v23 = vpop.f32.mrf.mxu2  ;;  %v1439_v25 = vpop.f32.mrf.mxu3 }
 0x1d6   : > { %v7397_v24 = vpack.c.bf16 %v1390_v23, %v1388_v15  ;;  %v1295_v26 = vpop.f32.mrf.mxu0  ;;  %v1495_v27 = vpack.c.bf16 %v1439_v25, %v1390_v23  ;;  %v1344_v28 = vpop.f32.mrf.mxu1  ;;  %v7084_v23 = vld [vmem:[#allocation2 + $0x1c0] sm:$0xff]  ;;  %v7085_v25 = vld [vmem:[#allocation2 + $0x1c8] sm:$0xff] }
 0x1d7   : > { %v1500_v30 = vpack.c.bf16 %v1344_v28, %v1295_v26 }
 0x1d8   : > { %7592 = vst [vmem:[#allocation2 + $0x288] sm:$0xff] %v7397_v24   ;;  %v2013_v32 = vrot.slane %v1495_v27, 4  ;;  %2607 = vmatmul.bf16.vlgmr.msrb.gmra.mxu0 %v7036_v29  ;;  %v7087_v27 = vld [vmem:[#allocation2 + $0x1d8] sm:$0xff] }
 0x1d9   : > { %v1932_v37 = vrot.slane %v1500_v30, 4  ;;  %2633 = vmatmul.bf16.vlgmr.msrb.gmra.mxu1 %v7037_v31  ;;  %2814 = vmatpush.bf16.xpose.msrb.mxu0 %v7076_v36 }
 0x1da   : > { %2659 = vmatmul.bf16.vlgmr.msrb.gmra.mxu2 %v7038_v34  ;;  %2046 = vst [vmem:[#allocation2 + $0x2cc] sm:$0xf] %v2013_v32  ;;  %2685 = vmatmul.bf16.vlgmr.msrb.gmra.mxu3 %v7039_v35 }
 0x1db   : > { %1965 = vst [vmem:[#allocation2 + $0x250] sm:$0xf] %v1932_v37  ;;  %2840 = vmatpush.bf16.xpose.msrb.mxu1 %v7077_v38  ;;  %2866 = vmatpush.bf16.xpose.msrb.mxu2 %v7078_v39 }
 0x1dc   : > { %2892 = vmatpush.bf16.xpose.msrb.mxu3 %v7079_v41 }
 0x1dd   : > { %v1393_v42 = vpop.f32.mrf.mxu2  ;;  %v1442_v43 = vpop.f32.mrf.mxu3 }
 0x1de   : > { %v1297_v44 = vpop.f32.mrf.mxu0  ;;  %v1501_v45 = vpack.c.bf16 %v1442_v43, %v1393_v42  ;;  %v1346_v47 = vpop.f32.mrf.mxu1 }
 0x1df   : > { %v7362_v46 = vpack.c.bf16 %v1297_v44, %v1295_v26  ;;  %v1506_v53 = vpack.c.bf16 %v1346_v47, %v1297_v44  ;;  %v7086_v26 = vld [vmem:[#allocation2 + $0x1d0] sm:$0xff]  ;;  %v7049_v47 = vld [vmem:[#allocation2 + $0xa8] sm:$0xff] }
 0x1e0   : > { %v2014_v48 = vrot.slane %v1501_v45, 4  ;;  %v7048_v45 = vld [vmem:[#allocation2 + $0xa0] sm:$0xff] }
 0x1e1   : > { %7586 = vst [vmem:[#allocation2 + $0x210] sm:$0xff] %v7362_v46   ;;  %v1933_v49 = vrot.slane %v1506_v53, 4  ;;  %v7050_v53 = vld [vmem:[#allocation2 + $0xb0] sm:$0xff] }
 0x1e2   : > { %2047 = vst [vmem:[#allocation2 + $0x2d0] sm:$0xf] %v2014_v48 }
 0x1e3   : > { %1966 = vst [vmem:[#allocation2 + $0x254] sm:$0xf] %v1933_v49  ;;  %v7051_v49 = vld [vmem:[#allocation2 + $0xb8] sm:$0xff] }
 0x1e5   : > { %v1395_v50 = vpop.f32.mrf.mxu2  ;;  %v1444_v52 = vpop.f32.mrf.mxu3 }
 0x1e6   : > { %v7402_v51 = vpack.c.bf16 %v1395_v50, %v1393_v42  ;;  %v1300_v33 = vpop.f32.mrf.mxu0  ;;  %v1507_v62 = vpack.c.bf16 %v1444_v52, %v1395_v50  ;;  %v1349_v54 = vpop.f32.mrf.mxu1  ;;  %v7088_v50 = vld [vmem:[#allocation2 + $0x1e0] sm:$0xff]  ;;  %v7089_v52 = vld [vmem:[#allocation2 + $0x1e8] sm:$0xff] }
 0x1e7   : > { %v1512_v55 = vpack.c.bf16 %v1349_v54, %v1300_v33 }
 0x1e8   : > { %7593 = vst [vmem:[#allocation2 + $0x290] sm:$0xff] %v7402_v51   ;;  %v2015_v58 = vrot.slane %v1507_v62, 4  ;;  %2711 = vmatmul.bf16.vlgmr.msra.gmra.mxu0 %v7040_v21  ;;  %v7091_v62 = vld [vmem:[#allocation2 + $0x1f8] sm:$0xff] }
 0x1e9   : > { %v1934_v61 = vrot.slane %v1512_v55, 4  ;;  %2737 = vmatmul.bf16.vlgmr.msra.gmra.mxu1 %v7041_v56  ;;  %2918 = vmatpush.bf16.xpose.msra.mxu0 %v7080_v60 }
 0x1ea   : > { %2763 = vmatmul.bf16.vlgmr.msra.gmra.mxu2 %v7042_v57  ;;  %2048 = vst [vmem:[#allocation2 + $0x2d4] sm:$0xf] %v2015_v58  ;;  %2789 = vmatmul.bf16.vlgmr.msra.gmra.mxu3 %v7043_v59 }
 0x1eb   : > { %1967 = vst [vmem:[#allocation2 + $0x258] sm:$0xf] %v1934_v61  ;;  %2944 = vmatpush.bf16.xpose.msra.mxu1 %v7081_v63  ;;  %2970 = vmatpush.bf16.xpose.msra.mxu2 %v7082_v0 }
 0x1ec   : > { %2996 = vmatpush.bf16.xpose.msra.mxu3 %v7083_v1 }
 0x1ed   : > { %v1398_v3 = vpop.f32.mrf.mxu2  ;;  %v1447_v4 = vpop.f32.mrf.mxu3 }
 0x1ee   : > { %v1302_v5 = vpop.f32.mrf.mxu0  ;;  %v1513_v6 = vpack.c.bf16 %v1447_v4, %v1398_v3  ;;  %v1351_v8 = vpop.f32.mrf.mxu1 }
 0x1ef   : > { %v7367_v7 = vpack.c.bf16 %v1302_v5, %v1300_v33  ;;  %v1518_v12 = vpack.c.bf16 %v1351_v8, %v1302_v5  ;;  %v7090_v33 = vld [vmem:[#allocation2 + $0x1f0] sm:$0xff]  ;;  %v7053_v8 = vld [vmem:[#allocation2 + $0xc8] sm:$0xff] }
 0x1f0   : > { %v2016_v9 = vrot.slane %v1513_v6, 4  ;;  %v7052_v6 = vld [vmem:[#allocation2 + $0xc0] sm:$0xff] }
 0x1f1   : > { %7587 = vst [vmem:[#allocation2 + $0x218] sm:$0xff] %v7367_v7   ;;  %v1935_v10 = vrot.slane %v1518_v12, 4  ;;  %v7054_v12 = vld [vmem:[#allocation2 + $0xd0] sm:$0xff] }
 0x1f2   : > { %2049 = vst [vmem:[#allocation2 + $0x2d8] sm:$0xf] %v2016_v9 }
 0x1f3   : > { %1968 = vst [vmem:[#allocation2 + $0x25c] sm:$0xf] %v1935_v10  ;;  %v7055_v10 = vld [vmem:[#allocation2 + $0xd8] sm:$0xff] }
 0x1f5   : > { %v1400_v11 = vpop.f32.mrf.mxu2  ;;  %v1449_v14 = vpop.f32.mrf.mxu3 }
 0x1f6   : > { %v7407_v13 = vpack.c.bf16 %v1400_v11, %v1398_v3  ;;  %v1305_v15 = vpop.f32.mrf.mxu0  ;;  %v1519_v2 = vpack.c.bf16 %v1449_v14, %v1400_v11  ;;  %v1354_v40 = vpop.f32.mrf.mxu1  ;;  %v7092_v11 = vld [vmem:[#allocation2 + $0x200] sm:$0xff]  ;;  %v7093_v14 = vld [vmem:[#allocation2 + $0x208] sm:$0xff] }
 0x1f7   : > { %v1524_v17 = vpack.c.bf16 %v1354_v40, %v1305_v15 }
 0x1f8   : > { %7594 = vst [vmem:[#allocation2 + $0x298] sm:$0xff] %v7407_v13   ;;  %v2017_v20 = vrot.slane %v1519_v2, 4  ;;  %2815 = vmatmul.bf16.vlgmr.msrb.gmra.mxu0 %v7044_v16  ;;  %v7095_v2 = vld [vmem:[#allocation2 + $0x218] sm:$0xff] }
 0x1f9   : > { %v1936_v24 = vrot.slane %v1524_v17, 4  ;;  %2841 = vmatmul.bf16.vlgmr.msrb.gmra.mxu1 %v7045_v18  ;;  %3022 = vmatpush.bf16.xpose.msrb.mxu0 %v7084_v23 }
 0x1fa   : > { %2867 = vmatmul.bf16.vlgmr.msrb.gmra.mxu2 %v7046_v19  ;;  %2050 = vst [vmem:[#allocation2 + $0x2dc] sm:$0xf] %v2017_v20  ;;  %2893 = vmatmul.bf16.vlgmr.msrb.gmra.mxu3 %v7047_v22 }
 0x1fb   : > { %1969 = vst [vmem:[#allocation2 + $0x260] sm:$0xf] %v1936_v24  ;;  %3048 = vmatpush.bf16.xpose.msrb.mxu1 %v7085_v25  ;;  %3074 = vmatpush.bf16.xpose.msrb.mxu2 %v7086_v26 }
 0x1fc   : > { %3100 = vmatpush.bf16.xpose.msrb.mxu3 %v7087_v27 }
 0x1fd   : > { %v1403_v28 = vpop.f32.mrf.mxu2  ;;  %v1452_v29 = vpop.f32.mrf.mxu3 }
 0x1fe   : > { %v1307_v30 = vpop.f32.mrf.mxu0  ;;  %v1525_v31 = vpack.c.bf16 %v1452_v29, %v1403_v28  ;;  %v1356_v32 = vpop.f32.mrf.mxu1 }
 0x1ff   : > { %v7372_v34 = vpack.c.bf16 %v1307_v30, %v1305_v15  ;;  %v1530_v35 = vpack.c.bf16 %v1356_v32, %v1307_v30  ;;  %v7094_v15 = vld [vmem:[#allocation2 + $0x210] sm:$0xff]  ;;  %v7057_v32 = vld [vmem:[#allocation2 + $0xe8] sm:$0xff] }
 0x200   : > { %v2018_v36 = vrot.slane %v1525_v31, 4  ;;  %v7056_v31 = vld [vmem:[#allocation2 + $0xe0] sm:$0xff] }
 0x201   : > { %7588 = vst [vmem:[#allocation2 + $0x220] sm:$0xff] %v7372_v34   ;;  %v1937_v37 = vrot.slane %v1530_v35, 4  ;;  %v7058_v35 = vld [vmem:[#allocation2 + $0xf0] sm:$0xff] }
 0x202   : > { %2051 = vst [vmem:[#allocation2 + $0x2e0] sm:$0xf] %v2018_v36 }
 0x203   : > { %1970 = vst [vmem:[#allocation2 + $0x264] sm:$0xf] %v1937_v37 }
 0x205   : > { %v1405_v38 = vpop.f32.mrf.mxu2  ;;  %v1454_v41 = vpop.f32.mrf.mxu3 }
 0x206   : > { %v7412_v39 = vpack.c.bf16 %v1405_v38, %v1403_v28  ;;  %v1310_v42 = vpop.f32.mrf.mxu0  ;;  %v1531_v43 = vpack.c.bf16 %v1454_v41, %v1405_v38  ;;  %v1359_v44 = vpop.f32.mrf.mxu1  ;;  %v7059_v38 = vld [vmem:[#allocation2 + $0xf8] sm:$0xff] }
 0x207   : > { %v1536_v46 = vpack.c.bf16 %v1359_v44, %v1310_v42 }
 0x208   : > { %7595 = vst [vmem:[#allocation2 + $0x2a0] sm:$0xff] %v7412_v39   ;;  %v2019_v48 = vrot.slane %v1531_v43, 4  ;;  %2919 = vmatmul.bf16.vlgmr.msra.gmra.mxu0 %v7048_v45  ;;  %v7096_v39 = vld [vmem:[#allocation2 + $0x220] sm:$0xff] }
 0x209   : > { %v1938_v51 = vrot.slane %v1536_v46, 4  ;;  %2945 = vmatmul.bf16.vlgmr.msra.gmra.mxu1 %v7049_v47  ;;  %3126 = vmatpush.bf16.xpose.msra.mxu0 %v7088_v50 }
 0x20a   : > { %2971 = vmatmul.bf16.vlgmr.msra.gmra.mxu2 %v7050_v53  ;;  %2052 = vst [vmem:[#allocation2 + $0x2e4] sm:$0xf] %v2019_v48  ;;  %2997 = vmatmul.bf16.vlgmr.msra.gmra.mxu3 %v7051_v49  ;;  %v8262_v49 = vld [vmem:[%s9278_s2] sm:$0xff]  }
 0x20b   : > { %1971 = vst [vmem:[#allocation2 + $0x268] sm:$0xf] %v1938_v51  ;;  %3152 = vmatpush.bf16.xpose.msra.mxu1 %v7089_v52  ;;  %3178 = vmatpush.bf16.xpose.msra.mxu2 %v7090_v33  ;;  %v7599_v51 = vld [vmem:[%s9278_s2 + $0x8] sm:$0xff]   ;;  %v7431_v33 = vunpack.c.l.bf16 %v8262_v49 }
 0x20c   : > { %3204 = vmatpush.bf16.xpose.msra.mxu3 %v7091_v62  ;;  %v7435_v62 = vunpack.c.l.bf16 %v7599_v51 }
 0x20d   : > { %v1408_v54 = vpop.f32.mrf.mxu2  ;;  %v1457_v21 = vpop.f32.mrf.mxu3 }
 0x20e   : > { %v1312_v55 = vpop.f32.mrf.mxu0  ;;  %v1537_v56 = vpack.c.bf16 %v1457_v21, %v1408_v54  ;;  %v1361_v58 = vpop.f32.mrf.mxu1 }
 0x20f   : > { %v7377_v57 = vpack.c.bf16 %v1312_v55, %v1310_v42  ;;  %v1542_v59 = vpack.c.bf16 %v1361_v58, %v1312_v55 }
 0x210   : > { %v2020_v60 = vrot.slane %v1537_v56, 4 }
 0x211   : > { %7589 = vst [vmem:[#allocation2 + $0x228] sm:$0xff] %v7377_v57   ;;  %v1939_v61 = vrot.slane %v1542_v59, 4 }
 0x212   : > { %2053 = vst [vmem:[#allocation2 + $0x2e8] sm:$0xf] %v2020_v60  ;;  %v7600_v60 = vld [vmem:[%s9278_s2 + $0x10] sm:$0xff]  }
 0x213   : > { %1972 = vst [vmem:[#allocation2 + $0x26c] sm:$0xf] %v1939_v61 }
 0x215   : > { %v1410_v63 = vpop.f32.mrf.mxu2  ;;  %v1459_v1 = vpop.f32.mrf.mxu3 }
 0x216   : > { %v7417_v0 = vpack.c.bf16 %v1410_v63, %v1408_v54  ;;  %v1315_v3 = vpop.f32.mrf.mxu0  ;;  %v1543_v4 = vpack.c.bf16 %v1459_v1, %v1410_v63  ;;  %v1364_v5 = vpop.f32.mrf.mxu1 }
 0x217   : > { %v1548_v7 = vpack.c.bf16 %v1364_v5, %v1315_v3 }
 0x218   : > { %7596 = vst [vmem:[#allocation2 + $0x2a8] sm:$0xff] %v7417_v0   ;;  %v2021_v9 = vrot.slane %v1543_v4, 4  ;;  %3023 = vmatmul.bf16.vlgmr.msrb.gmra.mxu0 %v7052_v6  ;;  %v7097_v42 = vld [vmem:[#allocation2 + $0x228] sm:$0xff]  ;;  %v7439_v4 = vunpack.c.l.bf16 %v7600_v60 }
 0x219   : > { %v1940_v13 = vrot.slane %v1548_v7, 4  ;;  %3049 = vmatmul.bf16.vlgmr.msrb.gmra.mxu1 %v7053_v8  ;;  %4065 = vmatpush.bf16.msrb.mxu0 %v7092_v11  ;;  %v7601_v7 = vld [vmem:[%s9278_s2 + $0x18] sm:$0xff]   ;;  %v7436_v8 = vunpack.c.h.bf16 %v7599_v51 }
 0x21a   : > { %3075 = vmatmul.bf16.vlgmr.msrb.gmra.mxu2 %v7054_v12  ;;  %2054 = vst [vmem:[#allocation2 + $0x2ec] sm:$0xf] %v2021_v9  ;;  %3101 = vmatmul.bf16.vlgmr.msrb.gmra.mxu3 %v7055_v10 }
 0x21b   : > { %1973 = vst [vmem:[#allocation2 + $0x270] sm:$0xf] %v1940_v13  ;;  %4093 = vmatpush.bf16.msrb.mxu1 %v7093_v14  ;;  %4121 = vmatpush.bf16.msrb.mxu2 %v7094_v15  ;;  %v7443_v13 = vunpack.c.l.bf16 %v7601_v7 }
 0x21c   : > { %4149 = vmatpush.bf16.msrb.mxu3 %v7095_v2 }
 0x21d   : > { %v1413_v40 = vpop.f32.mrf.mxu2  ;;  %v1462_v16 = vpop.f32.mrf.mxu3 }
 0x21e   : > { %v1317_v17 = vpop.f32.mrf.mxu0  ;;  %v1549_v18 = vpack.c.bf16 %v1462_v16, %v1413_v40  ;;  %v1366_v20 = vpop.f32.mrf.mxu1 }
 0x21f   : > { %v7382_v19 = vpack.c.bf16 %v1317_v17, %v1315_v3  ;;  %v1554_v22 = vpack.c.bf16 %v1366_v20, %v1317_v17  ;;  %v7440_v17 = vunpack.c.h.bf16 %v7600_v60  ;;  %v7606_v60 = vld [vmem:[%s9278_s2 + $0x40] sm:$0xff]  }
 0x220   : > { %v2022_v23 = vrot.slane %v1549_v18, 4 }
 0x221   : > { %7590 = vst [vmem:[#allocation2 + $0x230] sm:$0xff] %v7382_v19   ;;  %v1941_v24 = vrot.slane %v1554_v22, 4 }
 0x222   : > { %2055 = vst [vmem:[#allocation2 + $0x2f0] sm:$0xf] %v2022_v23  ;;  %v7603_v23 = vld [vmem:[%s9278_s2 + $0x28] sm:$0xff]  }
 0x223   : > { %1974 = vst [vmem:[#allocation2 + $0x274] sm:$0xf] %v1941_v24 }
 0x225   : > { %v1415_v25 = vpop.f32.mrf.mxu2  ;;  %v1464_v27 = vpop.f32.mrf.mxu3 }
 0x226   : > { %v7422_v26 = vpack.c.bf16 %v1415_v25, %v1413_v40  ;;  %v1320_v28 = vpop.f32.mrf.mxu0  ;;  %v1555_v29 = vpack.c.bf16 %v1464_v27, %v1415_v25  ;;  %v1369_v30 = vpop.f32.mrf.mxu1  ;;  %v8287_v40 = vld [vmem:[%s9278_s2 + $0x20] sm:$0xff]  }
 0x227   : > { %v1560_v34 = vpack.c.bf16 %v1369_v30, %v1320_v28  ;;  %v7447_v20 = vunpack.c.l.bf16 %v8287_v40 }
 0x228   : > { %7597 = vst [vmem:[#allocation2 + $0x2b0] sm:$0xff] %v7422_v26   ;;  %v7098_v36 = vld [vmem:[#allocation2 + $0x230] sm:$0xff]  ;;  %v2023_v37 = vrot.slane %v1555_v29, 4  ;;  %3127 = vmatmul.bf16.vlgmr.msra.gmra.mxu0 %v7056_v31  ;;  %v7432_v29 = vunpack.c.h.bf16 %v8262_v49  ;;  %v7451_v31 = vunpack.c.l.bf16 %v7603_v23 }
 0x229   : > { %v1942_v41 = vrot.slane %v1560_v34, 4  ;;  %3153 = vmatmul.bf16.vlgmr.msra.gmra.mxu1 %v7057_v32  ;;  %4177 = vmatpush.bf16.msra.mxu0 %v7096_v39 }
 0x22a   : > { %3179 = vmatmul.bf16.vlgmr.msra.gmra.mxu2 %v7058_v35  ;;  %2056 = vst [vmem:[#allocation2 + $0x2f4] sm:$0xf] %v2023_v37  ;;  %3205 = vmatmul.bf16.vlgmr.msra.gmra.mxu3 %v7059_v38  ;;  %v7444_v35 = vunpack.c.h.bf16 %v7601_v7  ;;  %v7463_v7 = vunpack.c.l.bf16 %v7606_v60 }
 0x22b   : > { %1975 = vst [vmem:[#allocation2 + $0x278] sm:$0xf] %v1942_v41  ;;  %4205 = vmatpush.bf16.msra.mxu1 %v7097_v42  ;;  %4233 = vmatpush.bf16.msra.mxu2 %v7098_v36 }
 0x22d   : > { %v1418_v43 = vpop.f32.mrf.mxu2  ;;  %v1467_v44 = vpop.f32.mrf.mxu3 }
 0x22e   : > { %v1322_v45 = vpop.f32.mrf.mxu0  ;;  %v1561_v46 = vpack.c.bf16 %v1467_v44, %v1418_v43  ;;  %v1371_v53 = vpop.f32.mrf.mxu1  ;;  %v7604_v44 = vld [vmem:[%s9278_s2 + $0x30] sm:$0xff]  }
 0x22f   : > { %v7387_v47 = vpack.c.bf16 %v1322_v45, %v1320_v28  ;;  %v1566_v48 = vpack.c.bf16 %v1371_v53, %v1322_v45  ;;  %v7455_v49 = vunpack.c.l.bf16 %v7604_v44 }
 0x230   : > { %v2024_v50 = vrot.slane %v1561_v46, 4  ;;  %v7605_v46 = vld [vmem:[%s9278_s2 + $0x38] sm:$0xff]  }
 0x231   : > { %7591 = vst [vmem:[#allocation2 + $0x238] sm:$0xff] %v7387_v47   ;;  %v1943_v52 = vrot.slane %v1566_v48, 4 }
 0x232   : > { %2057 = vst [vmem:[#allocation2 + $0x2f8] sm:$0xf] %v2024_v50  ;;  %v7452_v50 = vunpack.c.h.bf16 %v7603_v23 }
 0x233   : > { %1976 = vst [vmem:[#allocation2 + $0x27c] sm:$0xf] %v1943_v52  ;;  %v7459_v52 = vunpack.c.l.bf16 %v7605_v46 }
 0x235   : > { %v1420_v54 = vpop.f32.mrf.mxu2  ;;  %v1469_v55 = vpop.f32.mrf.mxu3 }
 0x236   : > { %v7427_v21 = vpack.c.bf16 %v1420_v54, %v1418_v43  ;;  %v2400_v56 = vpop.f32.mrf.mxu0  ;;  %v1567_v57 = vpack.c.bf16 %v1469_v55, %v1420_v54  ;;  %v2426_v59 = vpop.f32.mrf.mxu1 }
 0x237   : > { %v2401_v58 = vadd.f32 %v7431_v33, %v2400_v56  ;;  %v2427_v61 = vadd.f32 %v7435_v62, %v2426_v59 }
 0x238   : > { %7598 = vst [vmem:[#allocation2 + $0x2b8] sm:$0xff] %v7427_v21   ;;  %v7099_v63 = vld [vmem:[#allocation2 + $0x238] sm:$0xff]  ;;  %v2025_v0 = vrot.slane %v1567_v57, 4 }
 0x239   : > { %v8271_v1 = vmul.f32 0.088388346, %v2401_v58  ;;  %v8273_v3 = vmul.f32 0.088388346, %v2427_v61  ;;  %4261 = vmatpush.bf16.msra.mxu3 %v7099_v63 }
 0x23a   : > { %2058 = vst [vmem:[#allocation2 + $0x2fc] sm:$0xf] %v2025_v0  ;;  %v7448_v0 = vunpack.c.h.bf16 %v8287_v40  ;;  %v7607_v40 = vld [vmem:[%s9278_s2 + $0x48] sm:$0xff]  }
 0x23b   : > { %v3276_v5 = vsel %vm3275_vm0, %v8271_v1, -inf  ;;  %v3282_v6 = vsel %vm3275_vm0, %v8273_v3, -inf }
 0x23c   : > { %3277 = vmax.xlane.f32.xlu0 %v3276_v5  ;;  %3283 = vmax.xlane.f32.xlu1 %v3282_v6  ;;  %v7456_v5 = vunpack.c.h.bf16 %v7604_v44  ;;  %v7464_v44 = vunpack.c.h.bf16 %v7606_v60  ;;  %v7468_v60 = vunpack.c.h.bf16 %v7607_v40 }
 0x23d   : > { %v2452_v12 = vpop.f32.mrf.mxu2  ;;  %v2478_v10 = vpop.f32.mrf.mxu3 }
 0x23e   : > { %v2453_v9 = vadd.f32 %v7439_v4, %v2452_v12  ;;  %v2402_v11 = vpop.f32.mrf.mxu0  ;;  %v2428_v14 = vpop.f32.mrf.mxu1  ;;  %v2479_v18 = vadd.f32 %v7443_v13, %v2478_v10 }
 0x23f   : > { %v2429_v2 = vadd.f32 %v7436_v8, %v2428_v14  ;;  %v2403_v37 = vadd.f32 %v7432_v29, %v2402_v11  ;;  %v7608_v14 = vld [vmem:[%s9278_s2 + $0x50] sm:$0xff]  }
 0x240   : > { %v8282_v15 = vmul.f32 0.088388346, %v2453_v9  ;;  %v8299_v28 = vmul.f32 0.088388346, %v2479_v18  ;;  %v7471_v23 = vunpack.c.l.bf16 %v7608_v14 }
 0x241   : > { %v8289_v16 = vmul.f32 0.088388346, %v2429_v2  ;;  %v8318_v53 = vmul.f32 0.088388346, %v2403_v37 }
 0x242   : > { %v3288_v19 = vsel %vm3275_vm0, %v8282_v15, -inf  ;;  %v3294_v41 = vsel %vm3275_vm0, %v8299_v28, -inf }
 0x243   : > { %v3285_v22 = vsel %vm3275_vm0, %v8289_v16, -inf  ;;  %v3279_v56 = vsel %vm3275_vm0, %v8318_v53, -inf }
 0x244   : > { %3289 = vmax.xlane.f32.xlu0 %v3288_v19  ;;  %3286 = vmax.xlane.f32.xlu1 %v3285_v22  ;;  %v7460_v22 = vunpack.c.h.bf16 %v7605_v46 }
 0x245   : > { %v2454_v24 = vpop.f32.mrf.mxu2  ;;  %v2480_v26 = vpop.f32.mrf.mxu3 }
 0x246   : > { %v2455_v25 = vadd.f32 %v7440_v17, %v2454_v24  ;;  %v2504_v27 = vpop.f32.mrf.mxu0  ;;  %v2530_v34 = vpop.f32.mrf.mxu1  ;;  %v2481_v42 = vadd.f32 %v7444_v35, %v2480_v26 }
 0x247   : > { %v2505_v30 = vadd.f32 %v7447_v20, %v2504_v27  ;;  %v2531_v38 = vadd.f32 %v7451_v31, %v2530_v34 }
 0x248   : > { %v8302_v32 = vmul.f32 0.088388346, %v2455_v25  ;;  %v8322_v51 = vmul.f32 0.088388346, %v2481_v42  ;;  %v7467_v25 = vunpack.c.l.bf16 %v7607_v40  ;;  %v7613_v40 = vld [vmem:[%s9278_s2 + $0x78] sm:$0xff]  }
 0x249   : > { %v8304_v36 = vmul.f32 0.088388346, %v2505_v30  ;;  %v8320_v48 = vmul.f32 0.088388346, %v2531_v38  ;;  %v7610_v38 = vld [vmem:[%s9278_s2 + $0x60] sm:$0xff]  }
 0x24a   : > { %v3291_v43 = vsel %vm3275_vm0, %v8302_v32, -inf  ;;  %v3297_v58 = vsel %vm3275_vm0, %v8322_v51, -inf }
 0x24b   : > { %v3300_v39 = vsel %vm3275_vm0, %v8304_v36, -inf  ;;  %v3306_v55 = vsel %vm3275_vm0, %v8320_v48, -inf }
 0x24c   : > { %3301 = vmax.xlane.f32.xlu2 %v3300_v39  ;;  %3295 = vmax.xlane.f32.xlu0 %v3294_v41  ;;  %v7609_v39 = vld [vmem:[%s9278_s2 + $0x58] sm:$0xff]  }
 0x24d   : > { %3292 = vmax.xlane.f32.xlu1 %v3291_v43  ;;  %v2556_v45 = vpop.f32.mrf.mxu2  ;;  %v2582_v33 = vpop.f32.mrf.mxu3 }
 0x24e   : > { %v2506_v47 = vpop.f32.mrf.mxu0  ;;  %v2532_v62 = vpop.f32.mrf.mxu1  ;;  %v2557_v54 = vadd.f32 %v7455_v49, %v2556_v45  ;;  %v2583_v57 = vadd.f32 %v7459_v52, %v2582_v33  ;;  %v7479_v45 = vunpack.c.l.bf16 %v7610_v38 }
 0x24f   : > { %v2533_v21 = vadd.f32 %v7452_v50, %v2532_v62  ;;  %v2507_v12 = vadd.f32 %v7448_v0, %v2506_v47  ;;  %v7475_v47 = vunpack.c.l.bf16 %v7609_v39 }
 0x250   : > { %v8333_v63 = vmul.f32 0.088388346, %v2557_v54  ;;  %v8338_v6 = vmul.f32 0.088388346, %v2583_v57 }
 0x251   : > { %v8336_v4 = vmul.f32 0.088388346, %v2533_v21  ;;  %v8352_v19 = vmul.f32 0.088388346, %v2507_v12 }
 0x252   : > { %v3312_v10 = vsel %vm3275_vm0, %v8333_v63, -inf  ;;  %v3318_v2 = vsel %vm3275_vm0, %v8338_v6, -inf }
 0x253   : > { %v3309_v11 = vsel %vm3275_vm0, %v8336_v4, -inf  ;;  %v3303_v30 = vsel %vm3275_vm0, %v8352_v19, -inf }
 0x254   : > { %3307 = vmax.xlane.f32.xlu2 %v3306_v55  ;;  %3280 = vmax.xlane.f32.xlu0 %v3279_v56  ;;  %v7612_v55 = vld [vmem:[%s9278_s2 + $0x70] sm:$0xff]  }
 0x255   : > { %3298 = vmax.xlane.f32.xlu1 %v3297_v58  ;;  %v2558_v59 = vpop.f32.mrf.mxu2  ;;  %v2584_v8 = vpop.f32.mrf.mxu3  ;;  %v7487_v0 = vunpack.c.l.bf16 %v7612_v55 }
 0x256   : > { %v2608_v61 = vpop.f32.mrf.mxu0  ;;  %v2559_v9 = vadd.f32 %v7456_v5, %v2558_v59  ;;  %v2634_v26 = vpop.f32.mrf.mxu1  ;;  %v2585_v27 = vadd.f32 %v7460_v22, %v2584_v8  ;;  %v7476_v22 = vunpack.c.h.bf16 %v7609_v39 }
 0x257   : > { %v2609_v13 = vadd.f32 %v7463_v7, %v2608_v61  ;;  %v2635_v34 = vadd.f32 %v7467_v25, %v2634_v26  ;;  %v7472_v7 = vunpack.c.h.bf16 %v7608_v14  ;;  %v7491_v25 = vunpack.c.l.bf16 %v7613_v40 }
 0x258   : > { %v8354_v20 = vmul.f32 0.088388346, %v2559_v9  ;;  %v8370_v42 = vmul.f32 0.088388346, %v2585_v27 }
 0x259   : > { %v8356_v24 = vmul.f32 0.088388346, %v2609_v13  ;;  %v8374_v46 = vmul.f32 0.088388346, %v2635_v34 }
 0x25a   : > { %v3315_v31 = vsel %vm3275_vm0, %v8354_v20, -inf  ;;  %v3321_v62 = vsel %vm3275_vm0, %v8370_v42, -inf }
 0x25b   : > { %v3324_v37 = vsel %vm3275_vm0, %v8356_v24, -inf  ;;  %v3330_v56 = vsel %vm3275_vm0, %v8374_v46, -inf }
 0x25c   : > { %3313 = vmax.xlane.f32.xlu2 %v3312_v10  ;;  %3310 = vmax.xlane.f32.xlu0 %v3309_v11 }
 0x25d   : > { %v2660_v17 = vpop.f32.mrf.mxu2  ;;  %3319 = vmax.xlane.f32.xlu1 %v3318_v2  ;;  %v2686_v35 = vpop.f32.mrf.mxu3 }
 0x25e   : > { %v2610_v18 = vpop.f32.mrf.mxu0  ;;  %v2661_v29 = vadd.f32 %v7471_v23, %v2660_v17  ;;  %v2636_v50 = vpop.f32.mrf.mxu1  ;;  %v2687_v21 = vadd.f32 %v7475_v47, %v2686_v35 }
 0x25f   : > { %v2611_v52 = vadd.f32 %v7464_v44, %v2610_v18  ;;  %v2637_v12 = vadd.f32 %v7468_v60, %v2636_v50 }
 0x260   : > { %v8372_v43 = vmul.f32 0.088388346, %v2661_v29  ;;  %v8389_v5 = vmul.f32 0.088388346, %v2687_v21  ;;  %v7480_v29 = vunpack.c.h.bf16 %v7610_v38 }
 0x261   : > { %v8385_v59 = vmul.f32 0.088388346, %v2611_v52  ;;  %v8400_v18 = vmul.f32 0.088388346, %v2637_v12 }
 0x262   : > { %v3336_v54 = vsel %vm3275_vm0, %v8372_v43, -inf  ;;  %v3342_v17 = vsel %vm3275_vm0, %v8389_v5, -inf }
 0x263   : > { %v3327_v10 = vsel %vm3275_vm0, %v8385_v59, -inf  ;;  %v3333_v34 = vsel %vm3275_vm0, %v8400_v18, -inf }
 0x264   : > { %3304 = vmax.xlane.f32.xlu2 %v3303_v30  ;;  %3316 = vmax.xlane.f32.xlu0 %v3315_v31 }
 0x265   : > { %v2662_v41 = vpop.f32.mrf.mxu2  ;;  %3325 = vmax.xlane.f32.xlu1 %v3324_v37  ;;  %v2688_v58 = vpop.f32.mrf.mxu3  ;;  %v7611_v37 = vld [vmem:[%s9278_s2 + $0x68] sm:$0xff]  }
 0x266   : > { %v2712_v49 = vpop.f32.mrf.mxu0  ;;  %v2663_v13 = vadd.f32 %v7472_v7, %v2662_v41  ;;  %v2738_v2 = vpop.f32.mrf.mxu1  ;;  %v2689_v30 = vadd.f32 %v7476_v22, %v2688_v58  ;;  %v7484_v52 = vunpack.c.h.bf16 %v7611_v37 }
 0x267   : > { %v2713_v33 = vadd.f32 %v7479_v45, %v2712_v49  ;;  %v7483_v49 = vunpack.c.l.bf16 %v7611_v37 }
 0x268   : > { %v8404_v26 = vmul.f32 0.088388346, %v2663_v13  ;;  %v8415_v47 = vmul.f32 0.088388346, %v2689_v30  ;;  %v7492_v13 = vunpack.c.h.bf16 %v7613_v40 }
 0x269   : > { %v8387_v61 = vmul.f32 0.088388346, %v2713_v33  ;;  %v2739_v21 = vadd.f32 %v7483_v49, %v2738_v2 }
 0x26a   : > { %v3339_v44 = vsel %vm3275_vm0, %v8404_v26, -inf }
 0x26b   : > { %v3348_v11 = vsel %vm3275_vm0, %v8387_v61, -inf }
 0x26c   : > { %3322 = vmax.xlane.f32.xlu2 %v3321_v62  ;;  %3337 = vmax.xlane.f32.xlu0 %v3336_v54  ;;  %v7488_v62 = vunpack.c.h.bf16 %v7612_v55 }
 0x26d   : > { %v2764_v57 = vpop.f32.mrf.mxu2  ;;  %3331 = vmax.xlane.f32.xlu1 %v3330_v56  ;;  %v2790_v27 = vpop.f32.mrf.mxu3 }
 0x26e   : > { %v2714_v8 = vpop.f32.mrf.mxu0  ;;  %v2765_v9 = vadd.f32 %v7487_v0, %v2764_v57  ;;  %v2791_v31 = vadd.f32 %v7491_v25, %v2790_v27  ;;  %v2740_v38 = vpop.f32.mrf.mxu1  ;;  %v3345_v57 = vsel %vm3275_vm0, %v8415_v47, -inf  ;;  %v7616_v0 = vld [vmem:[%s9278_s2 + $0x90] sm:$0xff]  }
 0x26f   : > { %v2715_v39 = vadd.f32 %v7480_v29, %v2714_v8  ;;  %v2741_v56 = vadd.f32 %v7484_v52, %v2740_v38  ;;  %v8430_v8 = vmul.f32 0.088388346, %v2739_v21 }
 0x270   : > { %v8402_v23 = vmul.f32 0.088388346, %v2765_v9  ;;  %v8417_v50 = vmul.f32 0.088388346, %v2791_v31  ;;  %v7503_v9 = vunpack.c.l.bf16 %v7616_v0  ;;  %v8443_v31 = vld [vmem:[%s9278_s2 + $0xa0] sm:$0xff]  }
 0x271   : > { %v8419_v33 = vmul.f32 0.088388346, %v2715_v39  ;;  %v8432_v12 = vmul.f32 0.088388346, %v2741_v56  ;;  %v3354_v25 = vsel %vm3275_vm0, %v8430_v8, -inf }
 0x272   : > { %v3360_v35 = vsel %vm3275_vm0, %v8402_v23, -inf  ;;  %v3366_v58 = vsel %vm3275_vm0, %v8417_v50, -inf }
 0x273   : > { %v3351_v7 = vsel %vm3275_vm0, %v8419_v33, -inf  ;;  %v3357_v27 = vsel %vm3275_vm0, %v8432_v12, -inf }
 0x274   : > { %3328 = vmax.xlane.f32.xlu2 %v3327_v10  ;;  %3349 = vmax.xlane.f32.xlu0 %v3348_v11  ;;  %v7504_v10 = vunpack.c.h.bf16 %v7616_v0  ;;  %v7615_v0 = vld [vmem:[%s9278_s2 + $0x88] sm:$0xff]  }
 0x275   : > { %v2766_v14 = vpop.f32.mrf.mxu2  ;;  %3343 = vmax.xlane.f32.xlu1 %v3342_v17  ;;  %v2792_v54 = vpop.f32.mrf.mxu3 }
 0x276   : > { %v2816_v41 = vpop.f32.mrf.mxu0  ;;  %v2767_v60 = vadd.f32 %v7488_v62, %v2766_v14  ;;  %v2842_v2 = vpop.f32.mrf.mxu1  ;;  %v2793_v29 = vadd.f32 %v7492_v13, %v2792_v54 }
 0x278   : > { %v8434_v11 = vmul.f32 0.088388346, %v2767_v60  ;;  %v8455_v38 = vmul.f32 0.088388346, %v2793_v29 }
 0x27a   : > { %v3363_v40 = vsel %vm3275_vm0, %v8434_v11, -inf  ;;  %v3369_v60 = vsel %vm3275_vm0, %v8455_v38, -inf }
 0x27c   : > { %3334 = vmax.xlane.f32.xlu2 %v3333_v34  ;;  %3361 = vmax.xlane.f32.xlu0 %v3360_v35  ;;  %v7614_v34 = vld [vmem:[%s9278_s2 + $0x80] sm:$0xff]  }
 0x27d   : > { %3340 = vmax.xlane.f32.xlu1 %v3339_v44  ;;  %v2868_v45 = vpop.f32.mrf.mxu2  ;;  %v2894_v30 = vpop.f32.mrf.mxu3  ;;  %v7496_v37 = vunpack.c.h.bf16 %v7614_v34  ;;  %v7511_v44 = vunpack.c.l.bf16 %v8443_v31 }
 0x27e   : > { %v2818_v55 = vpop.f32.mrf.mxu0  ;;  %v2869_v14 = vadd.f32 %v7503_v9, %v2868_v45  ;;  %v7495_v45 = vunpack.c.l.bf16 %v7614_v34  ;;  %v2844_v52 = vpop.f32.mrf.mxu1  ;;  %v7500_v9 = vunpack.c.h.bf16 %v7615_v0 }
 0x27f   : > { %v2819_v62 = vadd.f32 %v7496_v37, %v2818_v55  ;;  %v8485_v37 = vld [vmem:[%s9278_s2 + $0xb8] sm:$0xff]  }
 0x280   : > { %v8450_v35 = vmul.f32 0.088388346, %v2869_v14 }
 0x281   : > { %v8471_v55 = vmul.f32 0.088388346, %v2819_v62  ;;  %v7523_v62 = vunpack.c.l.bf16 %v8485_v37 }
 0x282   : > { %v3384_v21 = vsel %vm3275_vm0, %v8450_v35, -inf }
 0x284   : > { %3346 = vmax.xlane.f32.xlu2 %v3345_v57  ;;  %3367 = vmax.xlane.f32.xlu0 %v3366_v58  ;;  %v2817_v57 = vadd.f32 %v7495_v45, %v2816_v41  ;;  %v8464_v58 = vld [vmem:[%s9278_s2 + $0xb0] sm:$0xff]   ;;  %v7617_v45 = vld [vmem:[%s9278_s2 + $0x98] sm:$0xff]  }
 0x285   : > { %3352 = vmax.xlane.f32.xlu1 %v3351_v7  ;;  %v2870_v17 = vpop.f32.mrf.mxu2  ;;  %v2896_v7 = vpop.f32.mrf.mxu3 }
 0x286   : > { %v2871_v22 = vadd.f32 %v7504_v10, %v2870_v17  ;;  %v2920_v49 = vpop.f32.mrf.mxu0  ;;  %v7519_v10 = vunpack.c.l.bf16 %v8464_v58  ;;  %v8476_v13 = vmul.f32 0.088388346, %v2817_v57  ;;  %v7499_v17 = vunpack.c.l.bf16 %v7615_v0  ;;  %v2946_v34 = vpop.f32.mrf.mxu1 }
 0x287   : > { %v2921_v54 = vadd.f32 %v7511_v44, %v2920_v49 }
 0x288   : > { %v8452_v39 = vmul.f32 0.088388346, %v2871_v22  ;;  %v2845_v22 = vadd.f32 %v7500_v9, %v2844_v52  ;;  %v3372_v44 = vsel %vm3275_vm0, %v8476_v13, -inf  ;;  %v7508_v52 = vunpack.c.h.bf16 %v7617_v45 }
 0x289   : > { %v8473_v41 = vmul.f32 0.088388346, %v2921_v54 }
 0x28a   : > { %9306 = vst [vmem:[#allocation10_spill] sm:$0xff] %v8452_v39  ;;  %v3387_v56 = vsel %vm3275_vm0, %v8452_v39, -inf  ;;  %v8492_v49 = vmul.f32 0.088388346, %v2845_v22  ;;  %v2897_v57 = vadd.f32 %v7508_v52, %v2896_v7 }
 0x28b   : > { %v3396_v29 = vsel %vm3275_vm0, %v8473_v41, -inf }
 0x28c   : > { %3355 = vmax.xlane.f32.xlu2 %v3354_v25  ;;  %3358 = vmax.xlane.f32.xlu0 %v3357_v27  ;;  %v3375_v27 = vsel %vm3275_vm0, %v8471_v55, -inf  ;;  %v3381_v9 = vsel %vm3275_vm0, %v8492_v49, -inf }
 0x28d   : > { %3364 = vmax.xlane.f32.xlu1 %v3363_v40  ;;  %v2972_v14 = vpop.f32.mrf.mxu2  ;;  %v2843_v40 = vadd.f32 %v7499_v17, %v2842_v2 }
 0x28e   : > { %v2973_v25 = vadd.f32 %v7519_v10, %v2972_v14  ;;  %v2922_v0 = vpop.f32.mrf.mxu0  ;;  %v7619_v14 = vld [vmem:[%s9278_s2 + $0xa8] sm:$0xff]   ;;  %v2948_v7 = vpop.f32.mrf.mxu1 }
 0x28f   : > { %v8497_v54 = vmul.f32 0.088388346, %v2843_v40 }
 0x290   : > { %v8494_v2 = vmul.f32 0.088388346, %v2973_v25 }
 0x291   : > { %v3378_v25 = vsel %vm3275_vm0, %v8497_v54, -inf }
 0x292   : > { %9307 = vst [vmem:[#allocation11_spill] sm:$0xff] %v8494_v2  ;;  %v3408_v10 = vsel %vm3275_vm0, %v8494_v2, -inf }
 0x294   : > { %3385 = vmax.xlane.f32.xlu2 %v3384_v21  ;;  %3388 = vmax.xlane.f32.xlu0 %v3387_v56  ;;  %v7507_v21 = vunpack.c.l.bf16 %v7617_v45  ;;  %v2998_v56 = vpop.f32.mrf.mxu3 }
 0x295   : > { %3370 = vmax.xlane.f32.xlu1 %v3369_v60  ;;  %v2999_v60 = vadd.f32 %v7523_v62, %v2998_v56  ;;  %v2974_v22 = vpop.f32.mrf.mxu2 }
 0x296   : > { %v2895_v17 = vadd.f32 %v7507_v21, %v2894_v30  ;;  %v7512_v30 = vunpack.c.h.bf16 %v8443_v31 }
 0x297   : > { %v8510_v40 = vmul.f32 0.088388346, %v2999_v60  ;;  %v7624_v60 = vld [vmem:[%s9278_s2 + $0xd0] sm:$0xff]  }
 0x298   : > { %v8512_v45 = vmul.f32 0.088388346, %v2895_v17 }
 0x299   : > { %9309 = vst [vmem:[#allocation13_spill] sm:$0xff] %v8510_v40  ;;  %v3414_v56 = vsel %vm3275_vm0, %v8510_v40, -inf }
 0x29a   : > { %9310 = vst [vmem:[#allocation14_spill] sm:$0xff] %v8512_v45  ;;  %v3390_v31 = vsel %vm3275_vm0, %v8512_v45, -inf }
 0x29c   : > { %3376 = vmax.xlane.f32.xlu2 %v3375_v27  ;;  %3397 = vmax.xlane.f32.xlu0 %v3396_v29  ;;  %v8508_v27 = vmul.f32 0.088388346, %v2897_v57  ;;  %v7515_v29 = vunpack.c.l.bf16 %v7619_v14  ;;  %v8522_v57 = vld [vmem:[%s9278_s2 + $0xc8] sm:$0xff]  }
 0x29d   : > { %3373 = vmax.xlane.f32.xlu1 %v3372_v44  ;;  %v7516_v44 = vunpack.c.h.bf16 %v7619_v14  ;;  %v7531_v14 = vunpack.c.l.bf16 %v8522_v57 }
 0x29e   : > { %9308 = vst [vmem:[#allocation12_spill] sm:$0xff] %v8508_v27  ;;  %v2947_v52 = vadd.f32 %v7515_v29, %v2946_v34  ;;  %v3393_v21 = vsel %vm3275_vm0, %v8508_v27, -inf  ;;  %v3024_v34 = vpop.f32.mrf.mxu0 }
 0x29f   : > { %v2949_v62 = vadd.f32 %v7516_v44, %v2948_v7  ;;  %v7520_v44 = vunpack.c.h.bf16 %v8464_v58  ;;  %v7622_v58 = vld [vmem:[%s9278_s2 + $0xc0] sm:$0xff]  }
 0x2a0   : > { %v8529_v17 = vmul.f32 0.088388346, %v2947_v52 }
 0x2a2   : > { %9311 = vst [vmem:[#allocation15_spill] sm:$0xff] %v8529_v17 }
 0x2a4   : > { %3382 = vmax.xlane.f32.xlu2 %v3381_v9  ;;  %3409 = vmax.xlane.f32.xlu0 %v3408_v10  ;;  %v2923_v9 = vadd.f32 %v7512_v30, %v2922_v0  ;;  %v3076_v10 = vpop.f32.mrf.mxu2  ;;  %v8531_v0 = vmul.f32 0.088388346, %v2949_v62  ;;  %v3050_v30 = vpop.f32.mrf.mxu1  ;;  %v2975_v62 = vadd.f32 %v7520_v44, %v2974_v22  ;;  %v7524_v22 = vunpack.c.h.bf16 %v8485_v37 }
 0x2a5   : > { %3379 = vmax.xlane.f32.xlu1 %v3378_v25  ;;  %v7535_v25 = vunpack.c.l.bf16 %v7624_v60  ;;  %v3051_v27 = vadd.f32 %v7531_v14, %v3050_v30  ;;  %v7528_v14 = vunpack.c.h.bf16 %v7622_v58  ;;  %v7536_v30 = vunpack.c.h.bf16 %v7624_v60 }
 0x2a6   : > { %9312 = vst [vmem:[#allocation16_spill] sm:$0xff] %v8531_v0  ;;  %v8534_v29 = vmul.f32 0.088388346, %v2923_v9  ;;  %v3405_v52 = vsel %vm3275_vm0, %v8531_v0, -inf  ;;  %v8550_v0 = vmul.f32 0.088388346, %v2975_v62 }
 0x2a7   : > { %v8546_v9 = vmul.f32 0.088388346, %v3051_v27 }
 0x2a8   : > { %9313 = vst [vmem:[#allocation17_spill] sm:$0xff] %v8534_v29  ;;  %v3411_v37 = vsel %vm3275_vm0, %v8550_v0, -inf }
 0x2a9   : > { %v3426_v60 = vsel %vm3275_vm0, %v8546_v9, -inf }
 0x2ac   : > { %3394 = vmax.xlane.f32.xlu2 %v3393_v21  ;;  %3415 = vmax.xlane.f32.xlu0 %v3414_v56  ;;  %v3077_v21 = vadd.f32 %v7535_v25, %v3076_v10  ;;  %v3402_v56 = vsel %vm3275_vm0, %v8529_v17, -inf  ;;  %v3026_v25 = vpop.f32.mrf.mxu0  ;;  %v3078_v44 = vpop.f32.mrf.mxu2 }
 0x2ad   : > { %3391 = vmax.xlane.f32.xlu1 %v3390_v31  ;;  %v3399_v31 = vsel %vm3275_vm0, %v8534_v29, -inf  ;;  %v3027_v27 = vadd.f32 %v7528_v14, %v3026_v25  ;;  %v3079_v17 = vadd.f32 %v7536_v30, %v3078_v44  ;;  %v7527_v25 = vunpack.c.l.bf16 %v7622_v58 }
 0x2ae   : > { %v8548_v10 = vmul.f32 0.088388346, %v3077_v21 }
 0x2af   : > { %v3278_v7 = vpop.xlane.xlu0 %3277  ;;  %v3284_v40 = vpop.xlane.xlu1 %3283 }
 0x2b0   : > { %v3470_v29 = vsub.f32 %v8273_v3, %v3284_v40  ;;  %v3432_v21 = vsel %vm3275_vm0, %v8548_v10, -inf  ;;  %v8565_v3 = vmul.f32 0.088388346, %v3079_v17 }
 0x2b2   : > { %v3536_v39 = vmul.f32 1.442695, %v3470_v29  ;;  %v3435_v29 = vsel %vm3275_vm0, %v8565_v3, -inf }
 0x2b4   : > { %3403 = vmax.xlane.f32.xlu2 %v3402_v56  ;;  %3406 = vmax.xlane.f32.xlu0 %v3405_v52  ;;  %v3000_v52 = vpop.f32.mrf.mxu3 }
 0x2b5   : > { %3400 = vmax.xlane.f32.xlu1 %v3399_v31  ;;  %v3468_v31 = vsub.f32 %v8271_v1, %v3278_v7  ;;  %v3001_v62 = vadd.f32 %v7524_v22, %v3000_v52  ;;  %v8563_v1 = vmul.f32 0.088388346, %v3027_v27  ;;  %v3025_v52 = vadd.f32 %v7527_v25, %v3024_v34 }
 0x2b7   : > { %v3290_v2 = vpop.xlane.xlu0 %3289  ;;  %v8553_v56 = vpop.xlane.xlu1 %3286  ;;  %v3532_v45 = vmul.f32 1.442695, %v3468_v31  ;;  %v8567_v14 = vmul.f32 0.088388346, %v3001_v62  ;;  %v3423_v44 = vsel %vm3275_vm0, %v8563_v1, -inf }
 0x2b8   : > { %v3472_v22 = vsub.f32 %v8282_v15, %v3290_v2  ;;  %v8580_v15 = vmul.f32 0.088388346, %v3025_v52  ;;  %v7532_v2 = vunpack.c.h.bf16 %v8522_v57 }
 0x2b9   : > { %7685 = vpow2.f32 %v3532_v45  ;;  %v3417_v17 = vsel %vm3275_vm0, %v8567_v14, -inf }
 0x2ba   : > { %7687 = vpow2.f32 %v3536_v39  ;;  %v3540_v31 = vmul.f32 1.442695, %v3472_v22  ;;  %v3420_v57 = vsel %vm3275_vm0, %v8580_v15, -inf }
 0x2bc   : > { %3433 = vmax.xlane.f32.xlu2 %v3432_v21  ;;  %3427 = vmax.xlane.f32.xlu0 %v3426_v60  ;;  %v3052_v60 = vpop.f32.mrf.mxu1  ;;  %7689 = vpow2.f32 %v3540_v31 }
 0x2bd   : > { %3412 = vmax.xlane.f32.xlu1 %v3411_v37 }
 0x2bf   : > { %v3302_v40 = vpop.xlane.xlu2 %3301  ;;  %v3296_v7 = vpop.xlane.xlu0 %3295 }
 0x2c0   : > { %v3293_v30 = vpop.xlane.xlu1 %3292  ;;  %v8576_v58 = vpop.eup %7685  ;;  %v3474_v25 = vsub.f32 %v8299_v28, %v3296_v7 }
 0x2c1   : > { %v8578_v27 = vpop.eup %7687  ;;  %v3473_v52 = vsub.f32 %v8302_v32, %v3293_v30  ;;  %v3476_v32 = vsub.f32 %v8304_v36, %v3302_v40  ;;  %v3471_v30 = vsub.f32 %v8289_v16, %v8553_v56 }
 0x2c2   : > { %v3666_v22 = vsel %vm3275_vm0, %v8578_v27, 0.0  ;;  %v8595_v7 = vpop.eup %7689 }
 0x2c3   : > { %v3548_v40 = vmul.f32 1.442695, %v3476_v32  ;;  %v3538_v16 = vmul.f32 1.442695, %v3471_v30 }
 0x2c4   : > { %3424 = vmax.xlane.f32.xlu2 %v3423_v44  ;;  %3436 = vmax.xlane.f32.xlu0 %v3435_v29  ;;  %v3660_v44 = vsel %vm3275_vm0, %v8576_v58, 0.0  ;;  %v3053_v29 = vadd.f32 %v7532_v2, %v3052_v60 }
 0x2c5   : > { %3418 = vmax.xlane.f32.xlu1 %v3417_v17 }
 0x2c6   : > { %v8597_v31 = vmul.f32 0.088388346, %v3053_v29 }
 0x2c7   : > { %v3308_v45 = vpop.xlane.xlu2 %3307  ;;  %v3281_v39 = vpop.xlane.xlu0 %3280 }
 0x2c8   : > { %v3299_v21 = vpop.xlane.xlu1 %3298  ;;  %v3469_v34 = vsub.f32 %v8318_v53, %v3281_v39  ;;  %v3542_v39 = vmul.f32 1.442695, %v3473_v52  ;;  %v3478_v52 = vsub.f32 %v8320_v48, %v3308_v45 }
 0x2c9   : > { %v3475_v62 = vsub.f32 %v8322_v51, %v3299_v21  ;;  %v3544_v51 = vmul.f32 1.442695, %v3474_v25  ;;  %v3672_v21 = vsel %vm3275_vm0, %v8595_v7, 0.0 }
 0x2ca   : > { %v3534_v37 = vmul.f32 1.442695, %v3469_v34  ;;  %v3552_v32 = vmul.f32 1.442695, %v3478_v52 }
 0x2cb   : > { %v3546_v53 = vmul.f32 1.442695, %v3475_v62  ;;  %v3429_v62 = vsel %vm3275_vm0, %v8597_v31, -inf }
 0x2cc   : > { %3667 = vadd.xlane.f32.xlu0 %v3666_v22  ;;  %3661 = vadd.xlane.f32.xlu2 %v3660_v44  ;;  %7691 = vpow2.f32 %v3534_v37 }
 0x2cd   : > { %3421 = vmax.xlane.f32.xlu1 %v3420_v57  ;;  %7693 = vpow2.f32 %v3546_v53 }
 0x2ce   : > { %7695 = vpow2.f32 %v3544_v51 }
 0x2cf   : > { %v3314_v17 = vpop.xlane.xlu2 %3313  ;;  %v8593_v28 = vpop.xlane.xlu0 %3310  ;;  %7697 = vpow2.f32 %v3542_v39 }
 0x2d0   : > { %v3320_v2 = vpop.xlane.xlu1 %3319  ;;  %v3480_v60 = vsub.f32 %v8333_v63, %v3314_v17  ;;  %7699 = vpow2.f32 %v3548_v40 }
 0x2d1   : > { %7701 = vpow2.f32 %v3538_v16 }
 0x2d2   : > { %v8604_v34 = vpop.eup %7691  ;;  %v3556_v22 = vmul.f32 1.442695, %v3480_v60 }
 0x2d3   : > { %v3663_v36 = vsel %vm3275_vm0, %v8604_v34, 0.0  ;;  %v8611_v25 = vpop.eup %7693 }
 0x2d4   : > { %3673 = vadd.xlane.f32.xlu2 %v3672_v21  ;;  %3664 = vadd.xlane.f32.xlu0 %v3663_v36  ;;  %v8613_v29 = vpop.eup %7695  ;;  %v3681_v53 = vsel %vm3275_vm0, %v8611_v25, 0.0  ;;  %7703 = vpow2.f32 %v3556_v22  ;;  %v3482_v36 = vsub.f32 %v8338_v6, %v3320_v2 }
 0x2d5   : > { %3430 = vmax.xlane.f32.xlu1 %v3429_v62  ;;  %v8615_v63 = vpop.eup %7697  ;;  %v3678_v17 = vsel %vm3275_vm0, %v8613_v29, 0.0  ;;  %7705 = vpow2.f32 %v3552_v32 }
 0x2d6   : > { %v3675_v39 = vsel %vm3275_vm0, %v8615_v63, 0.0  ;;  %v3560_v52 = vmul.f32 1.442695, %v3482_v36 }
 0x2d7   : > { %v3305_v56 = vpop.xlane.xlu2 %3304  ;;  %v3317_v37 = vpop.xlane.xlu0 %3316 }
 0x2d8   : > { %v3326_v44 = vpop.xlane.xlu1 %3325  ;;  %v3481_v57 = vsub.f32 %v8354_v20, %v3317_v37  ;;  %v3477_v51 = vsub.f32 %v8352_v19, %v3305_v56  ;;  %v8626_v20 = vpop.eup %7699  ;;  %v3479_v56 = vsub.f32 %v8336_v4, %v8593_v28 }
 0x2d9   : > { %v8628_v62 = vpop.eup %7701  ;;  %v3484_v40 = vsub.f32 %v8356_v24, %v3326_v44  ;;  %v3684_v16 = vsel %vm3275_vm0, %v8626_v20, 0.0 }
 0x2da   : > { %v3558_v48 = vmul.f32 1.442695, %v3481_v57  ;;  %v3550_v21 = vmul.f32 1.442695, %v3477_v51  ;;  %v8630_v19 = vpop.eup %7703  ;;  %v3669_v37 = vsel %vm3275_vm0, %v8628_v62, 0.0 }
 0x2db   : > { %v3696_v22 = vsel %vm3275_vm0, %v8630_v19, 0.0  ;;  %v3564_v6 = vmul.f32 1.442695, %v3484_v40  ;;  %v8644_v44 = vpop.eup %7705  ;;  %v3554_v57 = vmul.f32 1.442695, %v3479_v56 }
 0x2dc   : > { %3682 = vadd.xlane.f32.xlu2 %v3681_v53  ;;  %3676 = vadd.xlane.f32.xlu0 %v3675_v39  ;;  %7707 = vpow2.f32 %v3558_v48  ;;  %v3690_v39 = vsel %vm3275_vm0, %v8644_v44, 0.0 }
 0x2dd   : > { %3679 = vadd.xlane.f32.xlu1 %v3678_v17  ;;  %7709 = vpow2.f32 %v3550_v21 }
 0x2de   : > { %7711 = vpow2.f32 %v3560_v52 }
 0x2df   : > { %v3323_v45 = vpop.xlane.xlu2 %3322  ;;  %v3338_v30 = vpop.xlane.xlu0 %3337  ;;  %7713 = vpow2.f32 %v3564_v6 }
 0x2e0   : > { %v3332_v60 = vpop.xlane.xlu1 %3331  ;;  %v3488_v17 = vsub.f32 %v8372_v43, %v3338_v30  ;;  %7715 = vpow2.f32 %v3554_v57  ;;  %v3483_v32 = vsub.f32 %v8370_v42, %v3323_v45 }
 0x2e1   : > { %v3486_v6 = vsub.f32 %v8374_v46, %v3332_v60 }
 0x2e2   : > { %v8646_v4 = vpop.eup %7707  ;;  %v3562_v30 = vmul.f32 1.442695, %v3483_v32 }
 0x2e3   : > { %v8648_v28 = vpop.eup %7709  ;;  %v3699_v48 = vsel %vm3275_vm0, %v8646_v4, 0.0 }
 0x2e4   : > { %3685 = vadd.xlane.f32.xlu2 %v3684_v16  ;;  %3697 = vadd.xlane.f32.xlu0 %v3696_v22  ;;  %v3687_v21 = vsel %vm3275_vm0, %v8648_v28, 0.0  ;;  %v8659_v43 = vpop.eup %7711 }
 0x2e5   : > { %3670 = vadd.xlane.f32.xlu1 %v3669_v37  ;;  %v8661_v37 = vpop.eup %7713  ;;  %v3702_v52 = vsel %vm3275_vm0, %v8659_v43, 0.0 }
 0x2e6   : > { %v8663_v42 = vpop.eup %7715 }
 0x2e7   : > { %v3329_v24 = vpop.xlane.xlu2 %3328  ;;  %v8642_v2 = vpop.xlane.xlu0 %3349  ;;  %v3693_v57 = vsel %vm3275_vm0, %v8663_v42, 0.0 }
 0x2e8   : > { %v3344_v53 = vpop.xlane.xlu1 %3343  ;;  %v3485_v51 = vsub.f32 %v8385_v59, %v3329_v24  ;;  %v3572_v59 = vmul.f32 1.442695, %v3488_v17  ;;  %v3708_v24 = vsel %vm3275_vm0, %v8661_v37, 0.0 }
 0x2e9   : > { %v3490_v22 = vsub.f32 %v8389_v5, %v3344_v53  ;;  %v3568_v53 = vmul.f32 1.442695, %v3486_v6 }
 0x2ea   : > { %v3566_v36 = vmul.f32 1.442695, %v3485_v51 }
 0x2ec   : > { %3691 = vadd.xlane.f32.xlu2 %v3690_v39  ;;  %3688 = vadd.xlane.f32.xlu0 %v3687_v21  ;;  %7717 = vpow2.f32 %v3566_v36 }
 0x2ed   : > { %3700 = vadd.xlane.f32.xlu1 %v3699_v48  ;;  %7719 = vpow2.f32 %v3572_v59 }
 0x2ee   : > { %7721 = vpow2.f32 %v3562_v30 }
 0x2ef   : > { %v3335_v40 = vpop.xlane.xlu2 %3334  ;;  %v3362_v16 = vpop.xlane.xlu0 %3361 }
 0x2f0   : > { %v3341_v56 = vpop.xlane.xlu1 %3340  ;;  %v3487_v21 = vsub.f32 %v8400_v18, %v3335_v40  ;;  %v3496_v59 = vsub.f32 %v8402_v23, %v3362_v16 }
 0x2f1   : > { %v3489_v45 = vsub.f32 %v8404_v26, %v3341_v56  ;;  %v3576_v26 = vmul.f32 1.442695, %v3490_v22 }
 0x2f2   : > { %v8676_v5 = vpop.eup %7717  ;;  %v3588_v6 = vmul.f32 1.442695, %v3496_v59 }
 0x2f3   : > { %v3574_v51 = vmul.f32 1.442695, %v3489_v45  ;;  %v8678_v46 = vpop.eup %7719  ;;  %v3711_v36 = vsel %vm3275_vm0, %v8676_v5, 0.0  ;;  %v3102_v45 = vpop.f32.mrf.mxu3 }
 0x2f4   : > { %3703 = vadd.xlane.f32.xlu2 %v3702_v52  ;;  %3694 = vadd.xlane.f32.xlu0 %v3693_v57  ;;  %v8680_v60 = vpop.eup %7721  ;;  %v3720_v30 = vsel %vm3275_vm0, %v8678_v46, 0.0  ;;  %v3492_v57 = vsub.f32 %v8387_v61, %v8642_v2  ;;  %v7625_v61 = vld [vmem:[%s9278_s2 + $0xd8] sm:$0xff]  }
 0x2f5   : > { %3709 = vadd.xlane.f32.xlu1 %v3708_v24  ;;  %7723 = vpow2.f32 %v3574_v51  ;;  %v3705_v56 = vsel %vm3275_vm0, %v8680_v60, 0.0 }
 0x2f6   : > { %7725 = vpow2.f32 %v3576_v26 }
 0x2f7   : > { %v3347_v17 = vpop.xlane.xlu2 %3346  ;;  %v8674_v39 = vpop.xlane.xlu0 %3367  ;;  %7727 = vpow2.f32 %v3568_v53 }
 0x2f8   : > { %v3353_v32 = vpop.xlane.xlu1 %3352  ;;  %v3491_v48 = vsub.f32 %v8415_v47, %v3347_v17  ;;  %v3570_v47 = vmul.f32 1.442695, %v3487_v21 }
 0x2f9   : > { %v3493_v26 = vsub.f32 %v8419_v33, %v3353_v32  ;;  %v7540_v33 = vunpack.c.h.bf16 %v7625_v61 }
 0x2fa   : > { %v3578_v22 = vmul.f32 1.442695, %v3491_v48  ;;  %v3580_v48 = vmul.f32 1.442695, %v3492_v57 }
 0x2fb   : > { %v8693_v40 = vpop.eup %7723  ;;  %v3582_v32 = vmul.f32 1.442695, %v3493_v26 }
 0x2fc   : > { %3712 = vadd.xlane.f32.xlu2 %v3711_v36  ;;  %3706 = vadd.xlane.f32.xlu0 %v3705_v56  ;;  %v8695_v23 = vpop.eup %7725  ;;  %7729 = vpow2.f32 %v3578_v22  ;;  %v3723_v51 = vsel %vm3275_vm0, %v8693_v40, 0.0  ;;  %v3104_v56 = vpop.f32.mrf.mxu3 }
 0x2fd   : > { %3721 = vadd.xlane.f32.xlu1 %v3720_v30  ;;  %v8697_v16 = vpop.eup %7727  ;;  %7731 = vpow2.f32 %v3570_v47  ;;  %v3726_v17 = vsel %vm3275_vm0, %v8695_v23, 0.0 }
 0x2fe   : > { %9314 = vst [vmem:[#allocation18_spill] sm:$0xff] %v8697_v16  ;;  %7733 = vpow2.f32 %v3588_v6  ;;  %v3714_v53 = vsel %vm3275_vm0, %v8697_v16, 0.0 }
 0x2ff   : > { %v3356_v52 = vpop.xlane.xlu2 %3355  ;;  %v8691_v18 = vpop.xlane.xlu0 %3358  ;;  %7735 = vpow2.f32 %v3580_v48 }
 0x300   : > { %v3365_v24 = vpop.xlane.xlu1 %3364  ;;  %v3494_v47 = vsub.f32 %v8430_v8, %v3356_v52  ;;  %7737 = vpow2.f32 %v3582_v32 }
 0x301   : > { %v3497_v6 = vsub.f32 %v8434_v11, %v3365_v24 }
 0x302   : > { %v8715_v36 = vpop.eup %7729 }
 0x303   : > { %v8717_v30 = vpop.eup %7731  ;;  %v3729_v57 = vsel %vm3275_vm0, %v8715_v36, 0.0  ;;  %v3590_v48 = vmul.f32 1.442695, %v3497_v6  ;;  %v3495_v6 = vsub.f32 %v8432_v12, %v8691_v18 }
 0x304   : > { %3724 = vadd.xlane.f32.xlu2 %v3723_v51  ;;  %3715 = vadd.xlane.f32.xlu0 %v3714_v53  ;;  %v8719_v22 = vpop.eup %7733  ;;  %v3105_v51 = vadd.f32 %v7540_v33, %v3104_v56  ;;  %v3717_v26 = vsel %vm3275_vm0, %v8717_v30, 0.0  ;;  %v3584_v53 = vmul.f32 1.442695, %v3494_v47  ;;  %v7539_v33 = vunpack.c.l.bf16 %v7625_v61 }
 0x305   : > { %3727 = vadd.xlane.f32.xlu1 %v3726_v17  ;;  %v3744_v17 = vsel %vm3275_vm0, %v8719_v22, 0.0  ;;  %v8729_v52 = vpop.eup %7735  ;;  %v3498_v56 = vsub.f32 %v8417_v50, %v8674_v39 }
 0x306   : > { %v8731_v11 = vmul.f32 0.088388346, %v3105_v51  ;;  %v8733_v32 = vpop.eup %7737  ;;  %7739 = vpow2.f32 %v3584_v53  ;;  %v3732_v47 = vsel %vm3275_vm0, %v8729_v52, 0.0  ;;  %v3103_v61 = vadd.f32 %v7539_v33, %v3102_v45 }
 0x307   : > { %v8711_v2 = vpop.xlane.xlu2 %3385  ;;  %v8713_v21 = vpop.xlane.xlu0 %3388  ;;  %7741 = vpow2.f32 %v3590_v48  ;;  %v3592_v50 = vmul.f32 1.442695, %v3498_v56  ;;  %v3586_v48 = vmul.f32 1.442695, %v3495_v6 }
 0x308   : > { %v3371_v59 = vpop.xlane.xlu1 %3370  ;;  %v3441_v51 = vsel %vm3275_vm0, %v8731_v11, -inf  ;;  %v8752_v18 = vmul.f32 0.088388346, %v3103_v61  ;;  %v3504_v33 = vsub.f32 %v8450_v35, %v8711_v2 }
 0x309   : > { %7743 = vpow2.f32 %v3592_v50 }
 0x30a   : > { %v3438_v6 = vsel %vm3275_vm0, %v8752_v18, -inf }
 0x30c   : > { %3730 = vadd.xlane.f32.xlu2 %v3729_v57  ;;  %3745 = vadd.xlane.f32.xlu0 %v3744_v17  ;;  %v8748_v53 = vpop.eup %7739 }
 0x30d   : > { %3718 = vadd.xlane.f32.xlu1 %v3717_v26  ;;  %v3735_v26 = vsel %vm3275_vm0, %v8733_v32, 0.0  ;;  %v8750_v12 = vpop.eup %7741  ;;  %v3738_v56 = vsel %vm3275_vm0, %v8748_v53, 0.0 }
 0x30f   : > { %v3377_v16 = vpop.xlane.xlu2 %3376  ;;  %v3398_v8 = vpop.xlane.xlu0 %3397 }
 0x310   : > { %v3374_v24 = vpop.xlane.xlu1 %3373  ;;  %v8768_v2 = vpop.eup %7743 }
 0x311   : > { %v3500_v57 = vsub.f32 %v8476_v13, %v3374_v24 }
 0x313   : > { %v3596_v39 = vmul.f32 1.442695, %v3500_v57  ;;  %v3499_v57 = vsub.f32 %v8455_v38, %v3371_v59 }
 0x314   : > { %3733 = vadd.xlane.f32.xlu2 %v3732_v47  ;;  %3736 = vadd.xlane.f32.xlu0 %v3735_v26  ;;  %v3747_v47 = vsel %vm3275_vm0, %v8750_v12, 0.0 }
 0x315   : > { %3442 = vmax.xlane.f32.xlu1 %v3441_v51  ;;  %7745 = vpow2.f32 %v3596_v39  ;;  %v3594_v26 = vmul.f32 1.442695, %v3499_v57  ;;  %v3501_v39 = vsub.f32 %v8471_v55, %v3377_v16 }
 0x316   : > { %7747 = vpow2.f32 %v3586_v48  ;;  %v3508_v48 = vsub.f32 %v8473_v41, %v3398_v8 }
 0x317   : > { %v3383_v17 = vpop.xlane.xlu2 %3382  ;;  %v8746_v13 = vpop.xlane.xlu0 %3409  ;;  %v3598_v57 = vmul.f32 1.442695, %v3501_v39 }
 0x318   : > { %v3380_v24 = vpop.xlane.xlu1 %3379  ;;  %v3612_v55 = vmul.f32 1.442695, %v3508_v48  ;;  %v9320_v48 = vld [vmem:[#allocation15_spill] sm:$0xff] }
 0x319   : > { %v3502_v45 = vsub.f32 %v8497_v54, %v3380_v24  ;;  %v3604_v54 = vmul.f32 1.442695, %v3504_v33  ;;  %v3750_v24 = vsel %vm3275_vm0, %v8768_v2, 0.0 }
 0x31b   : > { %v3600_v51 = vmul.f32 1.442695, %v3502_v45  ;;  %v8770_v38 = vpop.eup %7745  ;;  %v3503_v45 = vsub.f32 %v8492_v49, %v3383_v17  ;;  %v9318_v17 = vld [vmem:[#allocation10_spill] sm:$0xff] }
 0x31c   : > { %3739 = vadd.xlane.f32.xlu2 %v3738_v56  ;;  %3439 = vmax.xlane.f32.xlu0 %v3438_v6  ;;  %9315 = vst [vmem:[#allocation19_spill] sm:$0xff] %v8770_v38  ;;  %v8772_v59 = vpop.eup %7747  ;;  %v3756_v33 = vsel %vm3275_vm0, %v8770_v38, 0.0 }
 0x31d   : > { %3748 = vadd.xlane.f32.xlu1 %v3747_v47  ;;  %7749 = vpow2.f32 %v3600_v51  ;;  %v3741_v56 = vsel %vm3275_vm0, %v8772_v59, 0.0  ;;  %v3602_v8 = vmul.f32 1.442695, %v3503_v45 }
 0x31e   : > { %7751 = vpow2.f32 %v3604_v54  ;;  %v3505_v54 = vsub.f32 %v9318_v17, %v8713_v21 }
 0x31f   : > { %v8764_v61 = vpop.xlane.xlu2 %3394  ;;  %v8766_v35 = vpop.xlane.xlu0 %3415  ;;  %7753 = vpow2.f32 %v3594_v26  ;;  %v9319_v26 = vld [vmem:[#allocation14_spill] sm:$0xff] }
 0x320   : > { %v3392_v50 = vpop.xlane.xlu1 %3391  ;;  %7755 = vpow2.f32 %v3598_v57  ;;  %v3606_v38 = vmul.f32 1.442695, %v3505_v54 }
 0x321   : > { %7757 = vpow2.f32 %v3612_v55 }
 0x322   : > { %7759 = vpow2.f32 %v3602_v8 }
 0x323   : > { %v8783_v41 = vpop.eup %7749  ;;  %7761 = vpow2.f32 %v3606_v38 }
 0x324   : > { %3751 = vadd.xlane.f32.xlu2 %v3750_v24  ;;  %3742 = vadd.xlane.f32.xlu0 %v3741_v56  ;;  %9316 = vst [vmem:[#allocation20_spill] sm:$0xff] %v8783_v41  ;;  %v8785_v51 = vpop.eup %7751  ;;  %v3506_v24 = vsub.f32 %v9319_v26, %v3392_v50  ;;  %v3762_v39 = vsel %vm3275_vm0, %v8783_v41, 0.0 }
 0x325   : > { %3757 = vadd.xlane.f32.xlu1 %v3756_v33  ;;  %9317 = vst [vmem:[#allocation21_spill] sm:$0xff] %v8785_v51  ;;  %v8787_v49 = vpop.eup %7753  ;;  %v3768_v45 = vsel %vm3275_vm0, %v8785_v51, 0.0 }
 0x326   : > { %v3753_v56 = vsel %vm3275_vm0, %v8787_v49, 0.0  ;;  %v3608_v21 = vmul.f32 1.442695, %v3506_v24  ;;  %v8803_v55 = vpop.eup %7755 }
 0x327   : > { %v3404_v16 = vpop.xlane.xlu2 %3403  ;;  %v3407_v47 = vpop.xlane.xlu0 %3406  ;;  %v3759_v24 = vsel %vm3275_vm0, %v8803_v55, 0.0 }
 0x328   : > { %v3401_v6 = vpop.xlane.xlu1 %3400  ;;  %v3510_v33 = vsub.f32 %v9320_v48, %v3404_v16  ;;  %v8805_v16 = vpop.eup %7757  ;;  %7763 = vpow2.f32 %v3608_v21 }
 0x329   : > { %9321 = vst [vmem:[#allocation10_spill] sm:$0xff] %v8805_v16  ;;  %v8807_v26 = vpop.eup %7759 }
 0x32a   : > { %v3616_v8 = vmul.f32 1.442695, %v3510_v33  ;;  %9322 = vst [vmem:[#allocation14_spill] sm:$0xff] %v8807_v26  ;;  %v3765_v33 = vsel %vm3275_vm0, %v8807_v26, 0.0  ;;  %v8819_v21 = vpop.eup %7761 }
 0x32b   : > { %v3771_v26 = vsel %vm3275_vm0, %v8819_v21, 0.0 }
 0x32c   : > { %3763 = vadd.xlane.f32.xlu2 %v3762_v39  ;;  %3754 = vadd.xlane.f32.xlu0 %v3753_v56  ;;  %v9323_v39 = vld [vmem:[#allocation17_spill] sm:$0xff]  ;;  %7765 = vpow2.f32 %v3616_v8  ;;  %v3780_v56 = vsel %vm3275_vm0, %v8805_v16, 0.0 }
 0x32d   : > { %3769 = vadd.xlane.f32.xlu1 %v3768_v45  ;;  %v3509_v48 = vsub.f32 %v9323_v39, %v3401_v6  ;;  %v9324_v45 = vld [vmem:[#allocation16_spill] sm:$0xff] }
 0x32e   : > { %v3511_v54 = vsub.f32 %v9324_v45, %v3407_v47  ;;  %v8822_v8 = vpop.eup %7763  ;;  %v9326_v45 = vld [vmem:[#allocation11_spill] sm:$0xff] }
 0x32f   : > { %v8799_v57 = vpop.xlane.xlu2 %3433  ;;  %v8801_v50 = vpop.xlane.xlu0 %3427  ;;  %v3614_v51 = vmul.f32 1.442695, %v3509_v48  ;;  %9325 = vst [vmem:[#allocation15_spill] sm:$0xff] %v8822_v8 }
 0x330   : > { %v3413_v17 = vpop.xlane.xlu1 %3412  ;;  %v3618_v38 = vmul.f32 1.442695, %v3511_v54 }
 0x331   : > { %7767 = vpow2.f32 %v3614_v51 }
 0x332   : > { %v8826_v16 = vpop.eup %7765  ;;  %7769 = vpow2.f32 %v3618_v38 }
 0x334   : > { %3760 = vadd.xlane.f32.xlu2 %v3759_v24  ;;  %3766 = vadd.xlane.f32.xlu0 %v3765_v33  ;;  %v3512_v24 = vsub.f32 %v9326_v45, %v8746_v13  ;;  %v3513_v33 = vsub.f32 %v8550_v0, %v3413_v17  ;;  %v3786_v13 = vsel %vm3275_vm0, %v8826_v16, 0.0  ;;  %v3128_v17 = vpop.f32.mrf.mxu0 }
 0x335   : > { %3781 = vadd.xlane.f32.xlu1 %v3780_v56  ;;  %v9327_v56 = vld [vmem:[#allocation12_spill] sm:$0xff] }
 0x336   : > { %v3507_v48 = vsub.f32 %v9327_v56, %v8764_v61  ;;  %v3622_v61 = vmul.f32 1.442695, %v3513_v33 }
 0x337   : > { %v3425_v41 = vpop.xlane.xlu2 %3424  ;;  %v8817_v6 = vpop.xlane.xlu0 %3436 }
 0x338   : > { %v3419_v47 = vpop.xlane.xlu1 %3418  ;;  %v3517_v39 = vsub.f32 %v8563_v1, %v3425_v41  ;;  %v3774_v1 = vsel %vm3275_vm0, %v8822_v8, 0.0  ;;  %v3620_v41 = vmul.f32 1.442695, %v3512_v24  ;;  %v3610_v45 = vmul.f32 1.442695, %v3507_v48  ;;  %v8839_v0 = vpop.eup %7767 }
 0x339   : > { %9328 = vst [vmem:[#allocation17_spill] sm:$0xff] %v8839_v0  ;;  %v8841_v56 = vpop.eup %7769  ;;  %v3518_v48 = vsub.f32 %v8546_v9, %v8801_v50  ;;  %v3783_v33 = vsel %vm3275_vm0, %v8839_v0, 0.0 }
 0x33a   : > { %v3630_v54 = vmul.f32 1.442695, %v3517_v39  ;;  %9329 = vst [vmem:[#allocation16_spill] sm:$0xff] %v8841_v56 }
 0x33c   : > { %7771 = vpow2.f32 %v3630_v54  ;;  %3772 = vadd.xlane.f32.xlu2 %v3771_v26  ;;  %3787 = vadd.xlane.f32.xlu0 %v3786_v13  ;;  %v3632_v13 = vmul.f32 1.442695, %v3518_v48 }
 0x33d   : > { %3775 = vadd.xlane.f32.xlu1 %v3774_v1  ;;  %7773 = vpow2.f32 %v3620_v41  ;;  %v3789_v1 = vsel %vm3275_vm0, %v8841_v56, 0.0 }
 0x33e   : > { %7775 = vpow2.f32 %v3610_v45  ;;  %v3515_v45 = vsub.f32 %v8567_v14, %v3419_v47  ;;  %v9332_v47 = vld [vmem:[#allocation13_spill] sm:$0xff] }
 0x33f   : > { %v3662_v51 = vpop.xlane.xlu2 %3661  ;;  %v8837_v38 = vpop.xlane.xlu0 %3667  ;;  %7777 = vpow2.f32 %v3622_v61  ;;  %v7626_v61 = vld [vmem:[%s9278_s2 + $0xe0] sm:$0xff]  }
 0x340   : > { %v3422_v39 = vpop.xlane.xlu1 %3421  ;;  %7779 = vrcp.f32 %v3662_v51  ;;  %v3626_v48 = vmul.f32 1.442695, %v3515_v45 }
 0x341   : > { %v3516_v26 = vsub.f32 %v8580_v15, %v3422_v39 }
 0x342   : > { %v8844_v24 = vpop.eup %7771 }
 0x343   : > { %9330 = vst [vmem:[#allocation11_spill] sm:$0xff] %v8844_v24  ;;  %v3807_v54 = vsel %vm3275_vm0, %v8844_v24, 0.0  ;;  %v3628_v41 = vmul.f32 1.442695, %v3516_v26  ;;  %v8854_v15 = vpop.eup %7773  ;;  %v3514_v24 = vsub.f32 %v9332_v47, %v8766_v35 }
 0x344   : > { %3784 = vadd.xlane.f32.xlu2 %v3783_v33  ;;  %3808 = vadd.xlane.f32.xlu0 %v3807_v54  ;;  %v8857_v50 = vpop.eup %7775  ;;  %v7544_v33 = vunpack.c.h.bf16 %v7626_v61  ;;  %v3130_v54 = vpop.f32.mrf.mxu0  ;;  %v3792_v0 = vsel %vm3275_vm0, %v8854_v15, 0.0 }
 0x345   : > { %3790 = vadd.xlane.f32.xlu1 %v3789_v1  ;;  %9331 = vst [vmem:[#allocation12_spill] sm:$0xff] %v8857_v50  ;;  %v8862_v39 = vpop.eup %7777  ;;  %7781 = vpow2.f32 %v3628_v41  ;;  %v3777_v14 = vsel %vm3275_vm0, %v8857_v50, 0.0  ;;  %v3624_v35 = vmul.f32 1.442695, %v3514_v24 }
 0x346   : > { %v7780_v1 = vpop.eup %7779  ;;  %v3795_v8 = vsel %vm3275_vm0, %v8862_v39, 0.0  ;;  %v3131_v56 = vadd.f32 %v7544_v33, %v3130_v54 }
 0x347   : > { %v3674_v9 = vpop.xlane.xlu2 %3673  ;;  %v3665_v26 = vpop.xlane.xlu0 %3664  ;;  %v3916_v41 = vmul.f32 %v7780_v1, %v8576_v58 }
 0x348   : > { %v3431_v51 = vpop.xlane.xlu1 %3430  ;;  %7783 = vrcp.f32 %v3665_v26  ;;  %v8879_v58 = vmul.f32 0.088388346, %v3131_v56 }
 0x349   : > { %7785 = vpow2.f32 %v3632_v13  ;;  %v7543_v13 = vunpack.c.l.bf16 %v7626_v61  ;;  %v3980_v1 = vpack.c.bf16 %v3916_v41, %v3916_v41 }
 0x34a   : > { %7787 = vrcp.f32 %v3674_v9  ;;  %v3521_v9 = vsub.f32 %v8565_v3, %v8817_v6  ;;  %v8886_v3 = vld [vmem:[%s9278_s2 + $0xe8] sm:$0xff]   ;;  %v3447_v47 = vsel %vm3275_vm0, %v8879_v58, -inf }
 0x34b   : > { %v8873_v45 = vpop.eup %7781  ;;  %7789 = vpow2.f32 %v3626_v48  ;;  %v3129_v54 = vadd.f32 %v7543_v13, %v3128_v17  ;;  %v3519_v48 = vsub.f32 %v8597_v31, %v3431_v51  ;;  %v4046_v31 = vunpack.c.l.b16 %v3980_v1 }
 0x34c   : > { %3778 = vadd.xlane.f32.xlu2 %v3777_v14  ;;  %3793 = vadd.xlane.f32.xlu0 %v3792_v0  ;;  %9333 = vst [vmem:[#allocation13_spill] sm:$0xff] %v8873_v45  ;;  %v3804_v56 = vsel %vm3275_vm0, %v8873_v45, 0.0  ;;  %v7547_v13 = vunpack.c.l.bf16 %v8886_v3  ;;  %v3520_v1 = vsub.f32 %v8548_v10, %v8799_v57 }
 0x34d   : > { %3796 = vadd.xlane.f32.xlu1 %v3795_v8  ;;  %v8898_v41 = vmul.f32 0.088388346, %v3129_v54 }
 0x34e   : > { %v7784_v50 = vpop.eup %7783 }
 0x34f   : > { %v3683_v26 = vpop.xlane.xlu2 %3682  ;;  %v8877_v33 = vpop.eup %7785  ;;  %v3917_v8 = vmul.f32 %v7784_v50, %v8604_v34  ;;  %v3638_v34 = vmul.f32 1.442695, %v3521_v9 }
 0x350   : > { %7791 = vrcp.f32 %v3683_v26  ;;  %v3680_v14 = vpop.xlane.xlu1 %3679  ;;  %9334 = vst [vmem:[#allocation22_spill] sm:$0xff] %v8877_v33  ;;  %v3677_v0 = vpop.xlane.xlu0 %3676  ;;  %v3810_v17 = vsel %vm3275_vm0, %v8877_v33, 0.0 }
 0x351   : > { %7793 = vrcp.f32 %v3680_v14  ;;  %v7788_v61 = vpop.eup %7787  ;;  %v3981_v6 = vpack.c.bf16 %v3917_v8, %v3917_v8  ;;  %v8901_v26 = vpop.f32.mrf.mxu2 }
 0x352   : > { %7795 = vrcp.f32 %v3677_v0  ;;  %v8893_v24 = vpop.eup %7789  ;;  %v3920_v50 = vmul.f32 %v7788_v61, %v8595_v7  ;;  %v3154_v14 = vpop.f32.mrf.mxu1 }
 0x353   : > { %7797 = vrcp.f32 %v8837_v38  ;;  %v4047_v51 = vunpack.c.l.b16 %v3981_v6  ;;  %v3155_v57 = vadd.f32 %v7547_v13, %v3154_v14 }
 0x354   : > { %7799 = vpow2.f32 %v3624_v35  ;;  %3805 = vadd.xlane.f32.xlu2 %v3804_v56  ;;  %v3634_v35 = vmul.f32 1.442695, %v3519_v48  ;;  %3448 = vmax.xlane.f32.xlu0 %v3447_v47  ;;  %v7100_v56 = vld [vmem:[#allocation2 + $0x240] sm:$0xff]  ;;  %v3984_v33 = vpack.c.bf16 %v3920_v50, %v3920_v50 }
 0x355   : > { %3811 = vadd.xlane.f32.xlu1 %v3810_v17  ;;  %v4048_v7 = vpack.c.b16 %v4047_v51, %v4046_v31  ;;  %7801 = vpow2.f32 %v3638_v34  ;;  %v3636_v34 = vmul.f32 1.442695, %v3520_v1 }
 0x356   : > { %v7792_v38 = vpop.eup %7791 }
 0x357   : > { %v7794_v9 = vpop.eup %7793  ;;  %v3923_v8 = vmul.f32 %v7792_v38, %v8611_v25  ;;  %v3686_v0 = vpop.xlane.xlu2 %3685  ;;  %6507 = vmatmul.msk.bf16.vlgmr.msrb.gmra.mxu0 %vm3275_vm0, %v4048_v7  ;;  %v3801_v38 = vsel %vm3275_vm0, %v8893_v24, 0.0  ;;  %v8923_v7 = vmul.f32 0.088388346, %v3155_v57 }
 0x358   : > { %v7796_v61 = vpop.eup %7795  ;;  %v3922_v54 = vmul.f32 %v7794_v9, %v8613_v29  ;;  %v3671_v6 = vpop.xlane.xlu1 %3670  ;;  %4289 = vmatpush.bf16.msrb.mxu0 %v7100_v56  ;;  %v3444_v29 = vsel %vm3275_vm0, %v8898_v41, -inf  ;;  %v4102_v9 = vunpack.c.l.b16 %v3984_v33  ;;  %v7103_v33 = vld [vmem:[#allocation2 + $0x258] sm:$0xff] }
 0x359   : > { %v7798_v17 = vpop.eup %7797  ;;  %v3987_v45 = vpack.c.bf16 %v3923_v8, %v3923_v8  ;;  %v3921_v48 = vmul.f32 %v7796_v61, %v8615_v63  ;;  %7803 = vrcp.f32 %v3671_v6  ;;  %v3698_v47 = vpop.xlane.xlu0 %3697 }
 0x35a   : > { %v8909_v10 = vpop.eup %7799  ;;  %7805 = vpow2.f32 %v3634_v35  ;;  %v3986_v25 = vpack.c.bf16 %v3922_v54, %v3922_v54  ;;  %v3918_v50 = vmul.f32 %v7798_v17, %v8578_v27  ;;  %v3182_v6 = vpop.f32.mrf.mxu2 }
 0x35b   : > { %v4131_v31 = vunpack.c.l.b16 %v3987_v45  ;;  %v3985_v51 = vpack.c.bf16 %v3921_v48, %v3921_v48  ;;  %7807 = vrcp.f32 %v3698_v47  ;;  %v3798_v35 = vsel %vm3275_vm0, %v8909_v10, 0.0  ;;  %v8918_v14 = vpop.eup %7801  ;;  %v7628_v45 = vld [vmem:[%s9278_s2 + $0xf0] sm:$0xff]  }
 0x35c   : > { %v4130_v63 = vunpack.c.l.b16 %v3986_v25  ;;  %7809 = vrcp.f32 %v3686_v0  ;;  %3445 = vmax.xlane.f32.xlu2 %v3444_v29  ;;  %3799 = vadd.xlane.f32.xlu0 %v3798_v35  ;;  %v7552_v8 = vunpack.c.h.bf16 %v7628_v45  ;;  %v3982_v56 = vpack.c.bf16 %v3918_v50, %v3918_v50  ;;  %v7102_v47 = vld [vmem:[#allocation2 + $0x250] sm:$0xff]  ;;  %v8937_v50 = vld [vmem:[%s9278_s2 + $0xf8] sm:$0xff]  }
 0x35d   : > { %v4103_v13 = vunpack.c.l.b16 %v3985_v51  ;;  %3802 = vadd.xlane.f32.xlu1 %v3801_v38  ;;  %7811 = vpow2.f32 %v3636_v34  ;;  %v7551_v29 = vunpack.c.l.bf16 %v7628_v45 }
 0x35e   : > { %v4132_v1 = vpack.c.b16 %v4131_v31, %v4130_v63  ;;  %v3183_v63 = vadd.f32 %v7552_v8, %v3182_v6  ;;  %v4074_v38 = vunpack.c.l.b16 %v3982_v56  ;;  %v3206_v6 = vpop.f32.mrf.mxu3  ;;  %v7101_v56 = vld [vmem:[#allocation2 + $0x248] sm:$0xff] }
 0x35f   : > { %v7804_v27 = vpop.eup %7803  ;;  %v4104_v0 = vpack.c.b16 %v4103_v13, %v4102_v9  ;;  %v3692_v61 = vpop.xlane.xlu2 %3691  ;;  %v3181_v35 = vadd.f32 %v7551_v29, %v8901_v26 }
 0x360   : > { %v8925_v54 = vpop.eup %7805  ;;  %v3919_v17 = vmul.f32 %v7804_v27, %v8628_v62  ;;  %6522 = vmatmul.msk.bf16.vlgmr.msrb.gmra.mxu3 %vm3275_vm0, %v4132_v1  ;;  %v3701_v48 = vpop.xlane.xlu1 %3700  ;;  %v3450_v62 = vsel %vm3275_vm0, %v8923_v7, -inf  ;;  %v3819_v1 = vsel %vm3275_vm0, %v8918_v14, 0.0 }
 0x361   : > { %v7808_v25 = vpop.eup %7807  ;;  %7813 = vrcp.f32 %v3701_v48  ;;  %6517 = vmatmul.msk.bf16.vlgmr.msrb.gmra.mxu2 %vm3275_vm0, %v4104_v0  ;;  %v3689_v57 = vpop.xlane.xlu0 %3688  ;;  %4373 = vmatpush.bf16.msrb.mxu3 %v7103_v33  ;;  %v3813_v34 = vsel %vm3275_vm0, %v8925_v54, 0.0  ;;  %v7555_v33 = vunpack.c.l.bf16 %v8937_v50  ;;  %v8948_v48 = vmul.f32 0.088388346, %v3183_v63 }
 0x362   : > { %v7810_v31 = vpop.eup %7809  ;;  %v3983_v51 = vpack.c.bf16 %v3919_v17, %v3919_v17  ;;  %4345 = vmatpush.bf16.msrb.mxu2 %v7102_v47  ;;  %7815 = vrcp.f32 %v3689_v57  ;;  %v3928_v13 = vmul.f32 %v7808_v25, %v8630_v19  ;;  %v7548_v19 = vunpack.c.h.bf16 %v8886_v3  ;;  %v3156_v26 = vpop.f32.mrf.mxu1 }
 0x363   : > { %7817 = vrcp.f32 %v3692_v61  ;;  %v3924_v45 = vmul.f32 %v7810_v31, %v8626_v20  ;;  %v8944_v27 = vpop.eup %7811  ;;  %v8952_v29 = vmul.f32 0.088388346, %v3181_v35  ;;  %v3459_v35 = vsel %vm3275_vm0, %v8948_v48, -inf }
 0x364   : > { %v4075_v9 = vunpack.c.l.b16 %v3983_v51  ;;  %3814 = vadd.xlane.f32.xlu2 %v3813_v34  ;;  %3820 = vadd.xlane.f32.xlu0 %v3819_v1  ;;  %v3992_v20 = vpack.c.bf16 %v3928_v13, %v3928_v13  ;;  %v3157_v63 = vadd.f32 %v7548_v19, %v3156_v26 }
 0x365   : > { %3451 = vmax.xlane.f32.xlu1 %v3450_v62  ;;  %v3988_v57 = vpack.c.bf16 %v3924_v45, %v3924_v45  ;;  %v3207_v62 = vadd.f32 %v7555_v33, %v3206_v6 }
 0x366   : > { %v4076_v8 = vpack.c.b16 %v4075_v9, %v4074_v38  ;;  %v4214_v9 = vunpack.c.l.b16 %v3992_v20  ;;  %v8962_v6 = vmul.f32 0.088388346, %v3157_v63  ;;  %v7104_v20 = vld [vmem:[#allocation2 + $0x260] sm:$0xff] }
 0x367   : > { %v7814_v0 = vpop.eup %7813  ;;  %v3704_v61 = vpop.xlane.xlu2 %3703 }
 0x368   : > { %v7816_v17 = vpop.eup %7815  ;;  %v3929_v47 = vmul.f32 %v7814_v0, %v8646_v4  ;;  %v3710_v25 = vpop.xlane.xlu1 %3709  ;;  %6512 = vmatmul.msk.bf16.vlgmr.msrb.gmra.mxu1 %vm3275_vm0, %v4076_v8  ;;  %v3816_v4 = vsel %vm3275_vm0, %v8944_v27, 0.0  ;;  %v3456_v8 = vsel %vm3275_vm0, %v8952_v29, -inf }
 0x369   : > { %v3925_v31 = vmul.f32 %v7816_v17, %v8648_v28  ;;  %7819 = vrcp.f32 %v3710_v25  ;;  %4317 = vmatpush.bf16.msrb.mxu1 %v7101_v56  ;;  %v3695_v3 = vpop.xlane.xlu0 %3694  ;;  %v7818_v51 = vpop.eup %7817  ;;  %v4158_v28 = vunpack.c.l.b16 %v3988_v57  ;;  %v8964_v17 = vmul.f32 0.088388346, %v3207_v62 }
 0x36a   : > { %v3993_v34 = vpack.c.bf16 %v3929_v47, %v3929_v47  ;;  %7821 = vrcp.f32 %v3695_v3  ;;  %v3926_v45 = vmul.f32 %v7818_v51, %v8644_v44  ;;  %v7106_v47 = vld [vmem:[#allocation2 + $0x270] sm:$0xff] }
 0x36b   : > { %v3989_v38 = vpack.c.bf16 %v3925_v31, %v3925_v31  ;;  %7823 = vrcp.f32 %v3704_v61 }
 0x36c   : > { %v4215_v13 = vunpack.c.l.b16 %v3993_v34  ;;  %3817 = vadd.xlane.f32.xlu2 %v3816_v4  ;;  %3457 = vmax.xlane.f32.xlu0 %v3456_v8  ;;  %v3990_v44 = vpack.c.bf16 %v3926_v45, %v3926_v45  ;;  %v3453_v34 = vsel %vm3275_vm0, %v8962_v6, -inf  ;;  %v7105_v8 = vld [vmem:[#allocation2 + $0x268] sm:$0xff] }
 0x36d   : > { %v4159_v1 = vunpack.c.l.b16 %v3989_v38  ;;  %3460 = vmax.xlane.f32.xlu1 %v3459_v35 }
 0x36e   : > { %v4216_v0 = vpack.c.b16 %v4215_v13, %v4214_v9  ;;  %v4186_v62 = vunpack.c.l.b16 %v3990_v44 }
 0x36f   : > { %v7820_v33 = vpop.eup %7819  ;;  %v4160_v19 = vpack.c.b16 %v4159_v1, %v4158_v28  ;;  %v3713_v56 = vpop.xlane.xlu2 %3712 }
 0x370   : > { %v7822_v61 = vpop.eup %7821  ;;  %7825 = vrcp.f32 %v3713_v56  ;;  %v3722_v26 = vpop.xlane.xlu1 %3721  ;;  %v3932_v3 = vmul.f32 %v7820_v33, %v8661_v37 }
 0x371   : > { %v3927_v25 = vmul.f32 %v7822_v61, %v8663_v42  ;;  %7827 = vrcp.f32 %v3722_v26  ;;  %6527 = vmatmul.msk.bf16.vlgmr.msra.gmra.mxu0 %vm3275_vm0, %v4160_v19  ;;  %6537 = vmatmul.msk.bf16.vlgmr.msra.gmra.mxu2 %vm3275_vm0, %v4216_v0  ;;  %v3707_v57 = vpop.xlane.xlu0 %3706  ;;  %v7824_v31 = vpop.eup %7823  ;;  %v3462_v42 = vsel %vm3275_vm0, %v8964_v17, -inf }
 0x372   : > { %4401 = vmatpush.bf16.msra.mxu0 %v7104_v20  ;;  %4457 = vmatpush.bf16.msra.mxu2 %v7106_v47  ;;  %7829 = vrcp.f32 %v3707_v57  ;;  %v3930_v63 = vmul.f32 %v7824_v31, %v8659_v43  ;;  %v3996_v9 = vpack.c.bf16 %v3932_v3, %v3932_v3 }
 0x373   : > { %v3991_v51 = vpack.c.bf16 %v3927_v25, %v3927_v25 }
 0x374   : > { %3454 = vmax.xlane.f32.xlu2 %v3453_v34  ;;  %v3994_v0 = vpack.c.bf16 %v3930_v63, %v3930_v63  ;;  %v4270_v56 = vunpack.c.l.b16 %v3996_v9 }
 0x375   : > { %v4187_v38 = vunpack.c.l.b16 %v3991_v51  ;;  %3463 = vmax.xlane.f32.xlu1 %v3462_v42  ;;  %v7108_v42 = vld [vmem:[#allocation2 + $0x280] sm:$0xff] }
 0x376   : > { %v7826_v4 = vpop.eup %7825 }
 0x377   : > { %v7828_v13 = vpop.eup %7827  ;;  %v4188_v37 = vpack.c.b16 %v4187_v38, %v4186_v62  ;;  %v3933_v35 = vmul.f32 %v7826_v4, %v8676_v5  ;;  %v3725_v28 = vpop.xlane.xlu2 %3724  ;;  %v4242_v5 = vunpack.c.l.b16 %v3994_v0  ;;  %v7107_v62 = vld [vmem:[#allocation2 + $0x278] sm:$0xff] }
 0x378   : > { %v7830_v45 = vpop.eup %7829  ;;  %7831 = vrcp.f32 %v3725_v28  ;;  %v3728_v1 = vpop.xlane.xlu1 %3727  ;;  %v3936_v26 = vmul.f32 %v7828_v13, %v8678_v46  ;;  %v9335_v13 = vld [vmem:[#allocation18_spill] sm:$0xff] }
 0x379   : > { %v3997_v33 = vpack.c.bf16 %v3933_v35, %v3933_v35  ;;  %v3931_v19 = vmul.f32 %v7830_v45, %v8680_v60  ;;  %6532 = vmatmul.msk.bf16.vlgmr.msra.gmra.mxu1 %vm3275_vm0, %v4188_v37  ;;  %v3716_v43 = vpop.xlane.xlu0 %3715  ;;  %7833 = vrcp.f32 %v3728_v1  ;;  %v7110_v45 = vld [vmem:[#allocation2 + $0x290] sm:$0xff] }
 0x37a   : > { %4429 = vmatpush.bf16.msra.mxu1 %v7105_v8  ;;  %7835 = vrcp.f32 %v3716_v43  ;;  %v4000_v57 = vpack.c.bf16 %v3936_v26, %v3936_v26 }
 0x37b   : > { %v4271_v61 = vunpack.c.l.b16 %v3997_v33  ;;  %v3995_v20 = vpack.c.bf16 %v3931_v19, %v3931_v19 }
 0x37c   : > { %v4326_v4 = vunpack.c.l.b16 %v4000_v57 }
 0x37d   : > { %v4272_v47 = vpack.c.b16 %v4271_v61, %v4270_v56  ;;  %v4243_v44 = vunpack.c.l.b16 %v3995_v20 }
 0x37e   : > { %v7832_v25 = vpop.eup %7831 }
 0x37f   : > { %v4244_v31 = vpack.c.b16 %v4243_v44, %v4242_v5  ;;  %v3937_v3 = vmul.f32 %v7832_v25, %v8693_v40  ;;  %v3731_v60 = vpop.xlane.xlu2 %3730  ;;  %v7834_v51 = vpop.eup %7833 }
 0x380   : > { %7837 = vrcp.f32 %v3731_v60  ;;  %v3719_v34 = vpop.xlane.xlu1 %3718  ;;  %v7836_v63 = vpop.eup %7835  ;;  %v3938_v40 = vmul.f32 %v7834_v51, %v8695_v23  ;;  %v7109_v51 = vld [vmem:[#allocation2 + $0x288] sm:$0xff] }
 0x381   : > { %v4001_v38 = vpack.c.bf16 %v3937_v3, %v3937_v3  ;;  %7839 = vrcp.f32 %v3719_v34  ;;  %6547 = vmatmul.msk.bf16.vlgmr.msrb.gmra.mxu0 %vm3275_vm0, %v4272_v47  ;;  %v3746_v46 = vpop.xlane.xlu0 %3745  ;;  %6542 = vmatmul.msk.bf16.vlgmr.msra.gmra.mxu3 %vm3275_vm0, %v4244_v31  ;;  %v3934_v37 = vmul.f32 %v7836_v63, %v9335_v13 }
 0x382   : > { %4513 = vmatpush.bf16.msrb.mxu0 %v7108_v42  ;;  %4485 = vmatpush.bf16.msra.mxu3 %v7107_v62  ;;  %v4002_v8 = vpack.c.bf16 %v3938_v40, %v3938_v40 }
 0x383   : > { %v4327_v9 = vunpack.c.l.b16 %v4001_v38  ;;  %v3998_v19 = vpack.c.bf16 %v3934_v37, %v3934_v37 }
 0x384   : > { %v4354_v5 = vunpack.c.l.b16 %v4002_v8 }
 0x385   : > { %v4328_v35 = vpack.c.b16 %v4327_v9, %v4326_v4 }
 0x386   : > { %v7838_v28 = vpop.eup %7837 }
 0x387   : > { %v7840_v1 = vpop.eup %7839  ;;  %v3939_v0 = vmul.f32 %v7838_v28, %v8715_v36  ;;  %v3734_v33 = vpop.xlane.xlu2 %3733  ;;  %6557 = vmatmul.msk.bf16.vlgmr.msrb.gmra.mxu2 %vm3275_vm0, %v4328_v35  ;;  %v4298_v36 = vunpack.c.l.b16 %v3998_v19  ;;  %v7556_v19 = vunpack.c.h.bf16 %v8937_v50 }
 0x388   : > { %v3935_v43 = vmul.f32 %v7840_v1, %v8717_v30  ;;  %v3443_v56 = vpop.xlane.xlu1 %3442  ;;  %7841 = vrcp.f32 %v3734_v33  ;;  %4569 = vmatpush.bf16.msrb.mxu2 %v7110_v45  ;;  %v7112_v33 = vld [vmem:[#allocation2 + $0x2a0] sm:$0xff] }
 0x389   : > { %v4003_v61 = vpack.c.bf16 %v3939_v0, %v3939_v0  ;;  %v3523_v23 = vsub.f32 %v8731_v11, %v3443_v56  ;;  %v3737_v26 = vpop.xlane.xlu0 %3736  ;;  %v7111_v11 = vld [vmem:[#allocation2 + $0x298] sm:$0xff]  ;;  %v3208_v56 = vpop.f32.mrf.mxu3 }
 0x38a   : > { %v3999_v20 = vpack.c.bf16 %v3935_v43, %v3935_v43  ;;  %7843 = vrcp.f32 %v3737_v26 }
 0x38b   : > { %v4355_v47 = vunpack.c.l.b16 %v4003_v61  ;;  %7845 = vrcp.f32 %v3746_v46  ;;  %v3642_v44 = vmul.f32 1.442695, %v3523_v23 }
 0x38c   : > { %v4299_v25 = vunpack.c.l.b16 %v3999_v20 }
 0x38d   : > { %v4356_v57 = vpack.c.b16 %v4355_v47, %v4354_v5  ;;  %7847 = vpow2.f32 %v3642_v44  ;;  %v3209_v5 = vadd.f32 %v7556_v19, %v3208_v56 }
 0x38e   : > { %v7842_v31 = vpop.eup %7841  ;;  %v4300_v3 = vpack.c.b16 %v4299_v25, %v4298_v36  ;;  %v7114_v36 = vld [vmem:[#allocation2 + $0x2b0] sm:$0xff] }
 0x38f   : > { %v3940_v30 = vmul.f32 %v7842_v31, %v8729_v52  ;;  %v3740_v60 = vpop.xlane.xlu2 %3739  ;;  %v9007_v31 = vmul.f32 0.088388346, %v3209_v5 }
 0x390   : > { %v7844_v34 = vpop.eup %7843  ;;  %v3749_v42 = vpop.xlane.xlu1 %3748  ;;  %6552 = vmatmul.msk.bf16.vlgmr.msrb.gmra.mxu1 %vm3275_vm0, %v4300_v3 }
 0x391   : > { %v7846_v62 = vpop.eup %7845  ;;  %v4004_v63 = vpack.c.bf16 %v3940_v30, %v3940_v30  ;;  %v3941_v38 = vmul.f32 %v7844_v34, %v8733_v32  ;;  %7849 = vrcp.f32 %v3749_v42  ;;  %4541 = vmatpush.bf16.msrb.mxu1 %v7109_v51  ;;  %v3440_v46 = vpop.xlane.xlu0 %3439  ;;  %6562 = vmatmul.msk.bf16.vlgmr.msrb.gmra.mxu3 %vm3275_vm0, %v4356_v57 }
 0x392   : > { %v3522_v4 = vsub.f32 %v8752_v18, %v3440_v46  ;;  %4597 = vmatpush.bf16.msrb.mxu3 %v7111_v11  ;;  %v3944_v13 = vmul.f32 %v7846_v62, %v8719_v22  ;;  %7851 = vrcp.f32 %v3740_v60  ;;  %v3465_v62 = vsel %vm3275_vm0, %v9007_v31, -inf }
 0x393   : > { %v8993_v52 = vpop.eup %7847  ;;  %v4382_v9 = vunpack.c.l.b16 %v4004_v63  ;;  %v4005_v40 = vpack.c.bf16 %v3941_v38, %v3941_v38 }
 0x394   : > { %v3640_v37 = vmul.f32 1.442695, %v3522_v4  ;;  %v3825_v35 = vsel %vm3275_vm0, %v8993_v52, 0.0  ;;  %v4008_v8 = vpack.c.bf16 %v3944_v13, %v3944_v13 }
 0x395   : > { %v4383_v32 = vunpack.c.l.b16 %v4005_v40  ;;  %3826 = vadd.xlane.f32.xlu0 %v3825_v35  ;;  %v9336_v35 = vld [vmem:[#allocation19_spill] sm:$0xff] }
 0x396   : > { %7853 = vpow2.f32 %v3640_v37  ;;  %v4438_v26 = vunpack.c.l.b16 %v4008_v8 }
 0x397   : > { %v7850_v28 = vpop.eup %7849  ;;  %v4384_v45 = vpack.c.b16 %v4383_v32, %v4382_v9  ;;  %v3752_v1 = vpop.xlane.xlu2 %3751  ;;  %v7113_v9 = vld [vmem:[#allocation2 + $0x2a8] sm:$0xff] }
 0x398   : > { %v3945_v18 = vmul.f32 %v7850_v28, %v8750_v12  ;;  %v3758_v0 = vpop.xlane.xlu1 %3757  ;;  %v7852_v43 = vpop.eup %7851 }
 0x399   : > { %6567 = vmatmul.msk.bf16.vlgmr.msra.gmra.mxu0 %vm3275_vm0, %v4384_v45  ;;  %v3743_v22 = vpop.xlane.xlu0 %3742  ;;  %v3942_v12 = vmul.f32 %v7852_v43, %v8748_v53 }
 0x39a   : > { %v4009_v61 = vpack.c.bf16 %v3945_v18, %v3945_v18  ;;  %4625 = vmatpush.bf16.msra.mxu0 %v7112_v33  ;;  %7855 = vrcp.f32 %v3743_v22 }
 0x39b   : > { %7857 = vrcp.f32 %v3752_v1  ;;  %v4006_v3 = vpack.c.bf16 %v3942_v12, %v3942_v12  ;;  %v9337_v1 = vld [vmem:[#allocation20_spill] sm:$0xff]  ;;  %v9338_v12 = vld [vmem:[#allocation14_spill] sm:$0xff] }
 0x39c   : > { %v9001_v23 = vpop.eup %7853  ;;  %v4439_v20 = vunpack.c.l.b16 %v4009_v61  ;;  %7859 = vrcp.f32 %v3758_v0 }
 0x39d   : > { %v3822_v47 = vsel %vm3275_vm0, %v9001_v23, 0.0  ;;  %v4410_v34 = vunpack.c.l.b16 %v4006_v3 }
 0x39e   : > { %v4440_v50 = vpack.c.b16 %v4439_v20, %v4438_v26  ;;  %3823 = vadd.xlane.f32.xlu2 %v3822_v47  ;;  %v7115_v26 = vld [vmem:[#allocation2 + $0x2b8] sm:$0xff] }
 0x39f   : > { %v3764_v44 = vpop.xlane.xlu2 %3763 }
 0x3a0   : > { %v7856_v25 = vpop.eup %7855  ;;  %v3770_v57 = vpop.xlane.xlu1 %3769  ;;  %6577 = vmatmul.msk.bf16.vlgmr.msra.gmra.mxu2 %vm3275_vm0, %v4440_v50 }
 0x3a1   : > { %v3943_v30 = vmul.f32 %v7856_v25, %v8772_v59  ;;  %4681 = vmatpush.bf16.msra.mxu2 %v7114_v36  ;;  %v3755_v60 = vpop.xlane.xlu0 %3754  ;;  %v7858_v53 = vpop.eup %7857  ;;  %v9339_v36 = vld [vmem:[#allocation21_spill] sm:$0xff] }
 0x3a2   : > { %7861 = vrcp.f32 %v3755_v60  ;;  %v3946_v42 = vmul.f32 %v7858_v53, %v8768_v2  ;;  %v7860_v63 = vpop.eup %7859 }
 0x3a3   : > { %v4007_v51 = vpack.c.bf16 %v3943_v30, %v3943_v30  ;;  %7863 = vrcp.f32 %v3764_v44  ;;  %v3948_v32 = vmul.f32 %v7860_v63, %v9336_v35 }
 0x3a4   : > { %v4010_v40 = vpack.c.bf16 %v3946_v42, %v3946_v42 }
 0x3a5   : > { %v4411_v11 = vunpack.c.l.b16 %v4007_v51  ;;  %v4012_v33 = vpack.c.bf16 %v3948_v32, %v3948_v32  ;;  %v7116_v51 = vld [vmem:[#allocation2 + $0x2c0] sm:$0xff] }
 0x3a6   : > { %3466 = vmax.xlane.f32.xlu2 %v3465_v62  ;;  %v4466_v45 = vunpack.c.l.b16 %v4010_v40 }
 0x3a7   : > { %v4412_v38 = vpack.c.b16 %v4411_v11, %v4410_v34  ;;  %v3761_v46 = vpop.xlane.xlu2 %3760  ;;  %v4494_v44 = vunpack.c.l.b16 %v4012_v33 }
 0x3a8   : > { %v7862_v4 = vpop.eup %7861  ;;  %7865 = vrcp.f32 %v3761_v46  ;;  %v3782_v59 = vpop.xlane.xlu1 %3781  ;;  %v7117_v46 = vld [vmem:[#allocation2 + $0x2c8] sm:$0xff] }
 0x3a9   : > { %7867 = vrcp.f32 %v3770_v57  ;;  %v3947_v13 = vmul.f32 %v7862_v4, %v8787_v49  ;;  %6572 = vmatmul.msk.bf16.vlgmr.msra.gmra.mxu1 %vm3275_vm0, %v4412_v38  ;;  %v3767_v37 = vpop.xlane.xlu0 %3766  ;;  %v7864_v2 = vpop.eup %7863 }
 0x3aa   : > { %4653 = vmatpush.bf16.msra.mxu1 %v7113_v9  ;;  %7869 = vrcp.f32 %v3767_v37  ;;  %v3950_v8 = vmul.f32 %v7864_v2, %v9337_v1 }
 0x3ab   : > { %v4011_v28 = vpack.c.bf16 %v3947_v13, %v3947_v13  ;;  %v9340_v13 = vld [vmem:[#allocation10_spill] sm:$0xff] }
 0x3ac   : > { %v4014_v20 = vpack.c.bf16 %v3950_v8, %v3950_v8  ;;  %v9341_v8 = vld [vmem:[#allocation17_spill] sm:$0xff] }
 0x3ad   : > { %v4467_v18 = vunpack.c.l.b16 %v4011_v28  ;;  %v7118_v28 = vld [vmem:[#allocation2 + $0x2d0] sm:$0xff] }
 0x3ae   : > { %v7866_v0 = vpop.eup %7865 }
 0x3af   : > { %v7868_v19 = vpop.eup %7867  ;;  %v4468_v22 = vpack.c.b16 %v4467_v18, %v4466_v45  ;;  %v3949_v43 = vmul.f32 %v7866_v0, %v8803_v55  ;;  %v3773_v49 = vpop.xlane.xlu2 %3772  ;;  %v4522_v55 = vunpack.c.l.b16 %v4014_v20  ;;  %v9343_v20 = vld [vmem:[#allocation15_spill] sm:$0xff] }
 0x3b0   : > { %v7870_v56 = vpop.eup %7869  ;;  %7871 = vrcp.f32 %v3773_v49  ;;  %v3776_v61 = vpop.xlane.xlu1 %3775  ;;  %v3952_v25 = vmul.f32 %v7868_v19, %v9339_v36 }
 0x3b1   : > { %v4013_v5 = vpack.c.bf16 %v3949_v43, %v3949_v43  ;;  %v3951_v47 = vmul.f32 %v7870_v56, %v9338_v12  ;;  %v3788_v50 = vpop.xlane.xlu0 %3787  ;;  %6582 = vmatmul.msk.bf16.vlgmr.msra.gmra.mxu3 %vm3275_vm0, %v4468_v22  ;;  %7873 = vrcp.f32 %v3782_v59  ;;  %v9342_v22 = vld [vmem:[#allocation16_spill] sm:$0xff] }
 0x3b2   : > { %4709 = vmatpush.bf16.msra.mxu3 %v7115_v26  ;;  %7875 = vrcp.f32 %v3788_v50  ;;  %v4016_v34 = vpack.c.bf16 %v3952_v25, %v3952_v25 }
 0x3b3   : > { %v4495_v57 = vunpack.c.l.b16 %v4013_v5  ;;  %v4015_v3 = vpack.c.bf16 %v3951_v47, %v3951_v47 }
 0x3b4   : > { %v4550_v40 = vunpack.c.l.b16 %v4016_v34 }
 0x3b5   : > { %v4496_v30 = vpack.c.b16 %v4495_v57, %v4494_v44  ;;  %v4523_v60 = vunpack.c.l.b16 %v4015_v3  ;;  %v7120_v3 = vld [vmem:[#allocation2 + $0x2e0] sm:$0xff] }
 0x3b6   : > { %v7872_v53 = vpop.eup %7871 }
 0x3b7   : > { %v4524_v42 = vpack.c.b16 %v4523_v60, %v4522_v55  ;;  %v3953_v11 = vmul.f32 %v7872_v53, %v8819_v21  ;;  %v3785_v62 = vpop.xlane.xlu2 %3784  ;;  %6587 = vmatmul.msk.bf16.vlgmr.msrb.gmra.mxu0 %vm3275_vm0, %v4496_v30  ;;  %v7874_v63 = vpop.eup %7873  ;;  %v9344_v60 = vld [vmem:[#allocation12_spill] sm:$0xff] }
 0x3b8   : > { %7877 = vrcp.f32 %v3785_v62  ;;  %v3791_v38 = vpop.xlane.xlu1 %3790  ;;  %4737 = vmatpush.bf16.msrb.mxu0 %v7116_v51  ;;  %v7876_v4 = vpop.eup %7875  ;;  %v3956_v37 = vmul.f32 %v7874_v63, %v9340_v13  ;;  %v7121_v62 = vld [vmem:[#allocation2 + $0x2e8] sm:$0xff] }
 0x3b9   : > { %v4017_v59 = vpack.c.bf16 %v3953_v11, %v3953_v11  ;;  %7879 = vrcp.f32 %v3791_v38  ;;  %6592 = vmatmul.msk.bf16.vlgmr.msrb.gmra.mxu1 %vm3275_vm0, %v4524_v42  ;;  %v3809_v9 = vpop.xlane.xlu0 %3808  ;;  %v3958_v2 = vmul.f32 %v7876_v4, %v8826_v16 }
 0x3ba   : > { %7881 = vrcp.f32 %v3776_v61  ;;  %4765 = vmatpush.bf16.msrb.mxu1 %v7117_v46  ;;  %v4020_v1 = vpack.c.bf16 %v3956_v37, %v3956_v37 }
 0x3bb   : > { %v4551_v21 = vunpack.c.l.b16 %v4017_v59  ;;  %7883 = vrcp.f32 %v3809_v9  ;;  %v4022_v19 = vpack.c.bf16 %v3958_v2, %v3958_v2 }
 0x3bc   : > { %v4606_v26 = vunpack.c.l.b16 %v4020_v1 }
 0x3bd   : > { %v4552_v35 = vpack.c.b16 %v4551_v21, %v4550_v40  ;;  %v4634_v47 = vunpack.c.l.b16 %v4022_v19  ;;  %v9345_v40 = vld [vmem:[#allocation11_spill] sm:$0xff]  ;;  %v7122_v19 = vld [vmem:[#allocation2 + $0x2f0] sm:$0xff] }
 0x3be   : > { %v7878_v32 = vpop.eup %7877 }
 0x3bf   : > { %v7880_v45 = vpop.eup %7879  ;;  %v3957_v18 = vmul.f32 %v7878_v32, %v9341_v8  ;;  %v3779_v0 = vpop.xlane.xlu2 %3778  ;;  %6597 = vmatmul.msk.bf16.vlgmr.msrb.gmra.mxu2 %vm3275_vm0, %v4552_v35  ;;  %v9346_v8 = vld [vmem:[#allocation13_spill] sm:$0xff] }
 0x3c0   : > { %v7882_v33 = vpop.eup %7881  ;;  %v3959_v43 = vmul.f32 %v7880_v45, %v9342_v22  ;;  %7885 = vrcp.f32 %v3779_v0  ;;  %v3797_v49 = vpop.xlane.xlu1 %3796  ;;  %4793 = vmatpush.bf16.msrb.mxu2 %v7118_v28  ;;  %v7119_v45 = vld [vmem:[#allocation2 + $0x2d8] sm:$0xff] }
 0x3c1   : > { %v4021_v56 = vpack.c.bf16 %v3957_v18, %v3957_v18  ;;  %7887 = vrcp.f32 %v3797_v49  ;;  %v3794_v16 = vpop.xlane.xlu0 %3793  ;;  %v3954_v5 = vmul.f32 %v7882_v33, %v9343_v20  ;;  %v7884_v44 = vpop.eup %7883 }
 0x3c2   : > { %v4023_v61 = vpack.c.bf16 %v3959_v43, %v3959_v43  ;;  %7889 = vrcp.f32 %v3794_v16  ;;  %v3965_v13 = vmul.f32 %v7884_v44, %v9345_v40 }
 0x3c3   : > { %v4607_v12 = vunpack.c.l.b16 %v4021_v56  ;;  %v4018_v30 = vpack.c.bf16 %v3954_v5, %v3954_v5 }
 0x3c4   : > { %v4635_v50 = vunpack.c.l.b16 %v4023_v61 }
 0x3c5   : > { %v4608_v36 = vpack.c.b16 %v4607_v12, %v4606_v26  ;;  %v4578_v9 = vunpack.c.l.b16 %v4018_v30 }
 0x3c6   : > { %v7886_v25 = vpop.eup %7885  ;;  %v4636_v57 = vpack.c.b16 %v4635_v50, %v4634_v47 }
 0x3c7   : > { %v7888_v55 = vpop.eup %7887  ;;  %v3955_v53 = vmul.f32 %v7886_v25, %v9344_v60  ;;  %v3806_v51 = vpop.xlane.xlu2 %3805  ;;  %6607 = vmatmul.msk.bf16.vlgmr.msra.gmra.mxu0 %vm3275_vm0, %v4608_v36 }
 0x3c8   : > { %v7890_v34 = vpop.eup %7889  ;;  %v3961_v42 = vmul.f32 %v7888_v55, %v8862_v39  ;;  %7891 = vrcp.f32 %v3806_v51  ;;  %v3812_v11 = vpop.xlane.xlu1 %3811  ;;  %4849 = vmatpush.bf16.msra.mxu0 %v7120_v3 }
 0x3c9   : > { %v4019_v63 = vpack.c.bf16 %v3955_v53, %v3955_v53  ;;  %v3960_v38 = vmul.f32 %v7890_v34, %v8854_v15  ;;  %6612 = vmatmul.msk.bf16.vlgmr.msra.gmra.mxu1 %vm3275_vm0, %v4636_v57  ;;  %v3449_v46 = vpop.xlane.xlu0 %3448  ;;  %v4029_v15 = vpack.c.bf16 %v3965_v13, %v3965_v13  ;;  %v9347_v53 = vld [vmem:[#allocation22_spill] sm:$0xff]  ;;  %v7123_v13 = vld [vmem:[#allocation2 + $0x2f8] sm:$0xff] }
 0x3ca   : > { %v4025_v4 = vpack.c.bf16 %v3961_v42, %v3961_v42  ;;  %4877 = vmatpush.bf16.msra.mxu1 %v7121_v62  ;;  %v3525_v59 = vsub.f32 %v8879_v58, %v3449_v46 }
 0x3cb   : > { %v4579_v37 = vunpack.c.l.b16 %v4019_v63  ;;  %v4024_v21 = vpack.c.bf16 %v3960_v38, %v3960_v38  ;;  %v4719_v56 = vunpack.c.l.b16 %v4029_v15 }
 0x3cc   : > { %v4663_v39 = vunpack.c.l.b16 %v4025_v4  ;;  %v3646_v2 = vmul.f32 1.442695, %v3525_v59 }
 0x3cd   : > { %v4580_v35 = vpack.c.b16 %v4579_v37, %v4578_v9  ;;  %v4662_v32 = vunpack.c.l.b16 %v4024_v21 }
 0x3ce   : > { %v7892_v28 = vpop.eup %7891  ;;  %7893 = vpow2.f32 %v3646_v2 }
 0x3cf   : > { %v4664_v1 = vpack.c.b16 %v4663_v39, %v4662_v32  ;;  %v3964_v18 = vmul.f32 %v7892_v28, %v9346_v8  ;;  %v3446_v0 = vpop.xlane.xlu2 %3445  ;;  %6602 = vmatmul.msk.bf16.vlgmr.msrb.gmra.mxu3 %vm3275_vm0, %v4580_v35  ;;  %7895 = vrcp.f32 %v3812_v11 }
 0x3d0   : > { %v3524_v58 = vsub.f32 %v8898_v41, %v3446_v0  ;;  %v3803_v33 = vpop.xlane.xlu1 %3802  ;;  %4821 = vmatpush.bf16.msrb.mxu3 %v7119_v45 }
 0x3d1   : > { %v4028_v22 = vpack.c.bf16 %v3964_v18, %v3964_v18  ;;  %7897 = vrcp.f32 %v3803_v33  ;;  %6617 = vmatmul.msk.bf16.vlgmr.msra.gmra.mxu2 %vm3275_vm0, %v4664_v1  ;;  %v3800_v43 = vpop.xlane.xlu0 %3799 }
 0x3d2   : > { %v3644_v49 = vmul.f32 1.442695, %v3524_v58  ;;  %4905 = vmatpush.bf16.msra.mxu2 %v7122_v19  ;;  %7899 = vrcp.f32 %v3800_v43 }
 0x3d3   : > { %v4718_v16 = vunpack.c.l.b16 %v4028_v22 }
 0x3d4   : > { %v9041_v61 = vpop.eup %7893  ;;  %7901 = vpow2.f32 %v3644_v49  ;;  %v4067_v5 = vpop.f32.mrf.mxu0 }
 0x3d5   : > { %v4720_v26 = vpack.c.b16 %v4719_v56, %v4718_v16  ;;  %v3831_v41 = vsel %vm3275_vm0, %v9041_v61, 0.0  ;;  %v7896_v20 = vpop.eup %7895  ;;  %v4940_v47 = vpack.c.bf16 %v4067_v5, %v4067_v5 }
 0x3d6   : > { %3832 = vadd.xlane.f32.xlu1 %v3831_v41  ;;  %v3966_v51 = vmul.f32 %v7896_v20, %v9347_v53 }
 0x3d7   : > { %v7898_v12 = vpop.eup %7897  ;;  %v3815_v50 = vpop.xlane.xlu2 %3814  ;;  %6627 = vmatmul.msk.bf16.vlgmr.msrb.gmra.mxu0 %vm3275_vm0, %v4720_v26  ;;  %5004 = vst [vmem:[#allocation3] sm:$0xf] %v4940_v47 }
 0x3d8   : > { %v7900_v44 = vpop.eup %7899  ;;  %v3963_v36 = vmul.f32 %v7898_v12, %v8893_v24  ;;  %7903 = vrcp.f32 %v3815_v50  ;;  %v3452_v25 = vpop.xlane.xlu1 %3451  ;;  %v4030_v38 = vpack.c.bf16 %v3966_v51, %v3966_v51 }
 0x3d9   : > { %v3962_v57 = vmul.f32 %v7900_v44, %v8909_v10  ;;  %v3526_v3 = vsub.f32 %v8923_v7, %v3452_v25  ;;  %v3821_v55 = vpop.xlane.xlu0 %3820 }
 0x3da   : > { %v9049_v30 = vpop.eup %7901  ;;  %v4027_v60 = vpack.c.bf16 %v3963_v36, %v3963_v36  ;;  %7905 = vrcp.f32 %v3821_v55  ;;  %v4746_v32 = vunpack.c.l.b16 %v4030_v38 }
 0x3db   : > { %v4026_v34 = vpack.c.bf16 %v3962_v57, %v3962_v57  ;;  %v3648_v42 = vmul.f32 1.442695, %v3526_v3  ;;  %v3828_v11 = vsel %vm3275_vm0, %v9049_v30, 0.0 }
 0x3dc   : > { %v4691_v24 = vunpack.c.l.b16 %v4027_v60  ;;  %3829 = vadd.xlane.f32.xlu0 %v3828_v11  ;;  %v4069_v63 = vpop.f32.mrf.mxu0 }
 0x3dd   : > { %v4690_v62 = vunpack.c.l.b16 %v4026_v34  ;;  %7907 = vpow2.f32 %v3648_v42  ;;  %v4941_v4 = vpack.c.bf16 %v4069_v63, %v4069_v63 }
 0x3de   : > { %v7904_v10 = vpop.eup %7903 }
 0x3df   : > { %v4692_v7 = vpack.c.b16 %v4691_v24, %v4690_v62  ;;  %v3967_v46 = vmul.f32 %v7904_v10, %v8925_v54  ;;  %v3818_v59 = vpop.xlane.xlu2 %3817  ;;  %5005 = vst [vmem:[#allocation3 + $0x10] sm:$0xf] %v4941_v4 }
 0x3e0   : > { %v7906_v9 = vpop.eup %7905  ;;  %7909 = vrcp.f32 %v3818_v59  ;;  %v3461_v40 = vpop.xlane.xlu1 %3460 }
 0x3e1   : > { %v4031_v37 = vpack.c.bf16 %v3967_v46, %v3967_v46  ;;  %v3529_v21 = vsub.f32 %v8948_v48, %v3461_v40  ;;  %v3458_v39 = vpop.xlane.xlu0 %3457  ;;  %6622 = vmatmul.msk.bf16.vlgmr.msra.gmra.mxu3 %vm3275_vm0, %v4692_v7  ;;  %v3969_v28 = vmul.f32 %v7906_v9, %v8918_v14 }
 0x3e2   : > { %v3528_v2 = vsub.f32 %v8952_v29, %v3458_v39  ;;  %4933 = vmatpush.bf16.msra.mxu3 %v7123_v13 }
 0x3e3   : > { %v9058_v35 = vpop.eup %7907  ;;  %v4747_v54 = vunpack.c.l.b16 %v4031_v37  ;;  %v3654_v45 = vmul.f32 1.442695, %v3529_v21  ;;  %v4151_v15 = vpop.f32.mrf.mxu3  ;;  %v4033_v22 = vpack.c.bf16 %v3969_v28, %v3969_v28 }
 0x3e4   : > { %v3652_v1 = vmul.f32 1.442695, %v3528_v2  ;;  %v4123_v8 = vpop.f32.mrf.mxu2  ;;  %v4946_v18 = vpack.c.bf16 %v4151_v15, %v4151_v15  ;;  %v3834_v48 = vsel %vm3275_vm0, %v9058_v35, 0.0 }
 0x3e5   : > { %v4748_v0 = vpack.c.b16 %v4747_v54, %v4746_v32  ;;  %7911 = vpow2.f32 %v3654_v45  ;;  %v4944_v58 = vpack.c.bf16 %v4123_v8, %v4123_v8  ;;  %v4095_v33 = vpop.f32.mrf.mxu1  ;;  %3835 = vadd.xlane.f32.xlu2 %v3834_v48  ;;  %v4775_v5 = vunpack.c.l.b16 %v4033_v22 }
 0x3e6   : > { %v7910_v29 = vpop.eup %7909  ;;  %7913 = vpow2.f32 %v3652_v1  ;;  %5010 = vst [vmem:[#allocation3 + $0x60] sm:$0xf] %v4946_v18  ;;  %v4942_v19 = vpack.c.bf16 %v4095_v33, %v4095_v33 }
 0x3e7   : > { %v3968_v14 = vmul.f32 %v7910_v29, %v8944_v27  ;;  %5008 = vst [vmem:[#allocation3 + $0x40] sm:$0xf] %v4944_v58  ;;  %v3455_v43 = vpop.xlane.xlu2 %3454  ;;  %6632 = vmatmul.msk.bf16.vlgmr.msrb.gmra.mxu1 %vm3275_vm0, %v4748_v0 }
 0x3e8   : > { %5006 = vst [vmem:[#allocation3 + $0x20] sm:$0xf] %v4942_v19  ;;  %v3527_v49 = vsub.f32 %v8962_v6, %v3455_v43  ;;  %v3464_v56 = vpop.xlane.xlu1 %3463 }
 0x3e9   : > { %v4032_v16 = vpack.c.bf16 %v3968_v14, %v3968_v14  ;;  %v3530_v41 = vsub.f32 %v8964_v17, %v3464_v56 }
 0x3ea   : > { %v3650_v26 = vmul.f32 1.442695, %v3527_v49 }
 0x3eb   : > { %v9067_v20 = vpop.eup %7911  ;;  %v4774_v12 = vunpack.c.l.b16 %v4032_v16  ;;  %v4153_v47 = vpop.f32.mrf.mxu3  ;;  %v3656_v3 = vmul.f32 1.442695, %v3530_v41 }
 0x3ec   : > { %v9069_v50 = vpop.eup %7913  ;;  %7915 = vpow2.f32 %v3650_v26  ;;  %v4125_v27 = vpop.f32.mrf.mxu2  ;;  %v4947_v44 = vpack.c.bf16 %v4153_v47, %v4153_v47  ;;  %v3843_v36 = vsel %vm3275_vm0, %v9067_v20, 0.0 }
 0x3ed   : > { %v4776_v25 = vpack.c.b16 %v4775_v5, %v4774_v12  ;;  %v4945_v6 = vpack.c.bf16 %v4125_v27, %v4125_v27  ;;  %v4097_v57 = vpop.f32.mrf.mxu1  ;;  %3844 = vadd.xlane.f32.xlu2 %v3843_v36  ;;  %v3840_v17 = vsel %vm3275_vm0, %v9069_v50, 0.0  ;;  %7917 = vpow2.f32 %v3656_v3 }
 0x3ee   : > { %5011 = vst [vmem:[#allocation3 + $0x70] sm:$0xf] %v4947_v44  ;;  %v4943_v55 = vpack.c.bf16 %v4097_v57, %v4097_v57  ;;  %v4179_v60 = vpop.f32.mrf.mxu0  ;;  %3841 = vadd.xlane.f32.xlu1 %v3840_v17 }
 0x3ef   : > { %5009 = vst [vmem:[#allocation3 + $0x50] sm:$0xf] %v4945_v6  ;;  %v4948_v53 = vpack.c.bf16 %v4179_v60, %v4179_v60  ;;  %6637 = vmatmul.msk.bf16.vlgmr.msrb.gmra.mxu2 %vm3275_vm0, %v4776_v25 }
 0x3f0   : > { %5007 = vst [vmem:[#allocation3 + $0x30] sm:$0xf] %v4943_v55 }
 0x3f1   : > { %5012 = vst [vmem:[#allocation3 + $0x80] sm:$0xf] %v4948_v53 }
 0x3f2   : > { %v9076_v51 = vpop.eup %7915 }
 0x3f3   : > { %v3837_v34 = vsel %vm3275_vm0, %v9076_v51, 0.0  ;;  %v9080_v38 = vpop.eup %7917 }
 0x3f4   : > { %v4235_v42 = vpop.f32.mrf.mxu2  ;;  %3838 = vadd.xlane.f32.xlu0 %v3837_v34  ;;  %v3846_v7 = vsel %vm3275_vm0, %v9080_v38, 0.0 }
 0x3f5   : > { %v4952_v11 = vpack.c.bf16 %v4235_v42, %v4235_v42 }
 0x3f6   : > { %v4181_v24 = vpop.f32.mrf.mxu0  ;;  %v4207_v62 = vpop.f32.mrf.mxu1 }
 0x3f7   : > { %5016 = vst [vmem:[#allocation3 + $0xc0] sm:$0xf] %v4952_v11  ;;  %v4949_v10 = vpack.c.bf16 %v4181_v24, %v4181_v24  ;;  %v4950_v63 = vpack.c.bf16 %v4207_v62, %v4207_v62  ;;  %v7163_v24 = vld [vmem:[%s9279_s3 + $0x38] sm:$0xff] }
 0x3f8   : > { %5520 = vmatpush.bf16.msrb.mxu0 %v7163_v24 }
 0x3f9   : > { %5013 = vst [vmem:[#allocation3 + $0x90] sm:$0xf] %v4949_v10 }
 0x3fa   : > { %5014 = vst [vmem:[#allocation3 + $0xa0] sm:$0xf] %v4950_v63 }
 0x3fc   : > { %v4237_v46 = vpop.f32.mrf.mxu2  ;;  %3847 = vadd.xlane.f32.xlu0 %v3846_v7 }
 0x3fd   : > { %v4953_v4 = vpack.c.bf16 %v4237_v46, %v4237_v46 }
 0x3fe   : > { %v4209_v59 = vpop.f32.mrf.mxu1  ;;  %v4291_v9 = vpop.f32.mrf.mxu0 }
 0x3ff   : > { %5017 = vst [vmem:[#allocation3 + $0xd0] sm:$0xf] %v4953_v4  ;;  %v4951_v40 = vpack.c.bf16 %v4209_v59, %v4209_v59  ;;  %v4956_v13 = vpack.c.bf16 %v4291_v9, %v4291_v9  ;;  %v7162_v59 = vld [vmem:[%s9279_s3 + $0x30] sm:$0xff]  ;;  %v7161_v9 = vld [vmem:[%s9279_s3 + $0x28] sm:$0xff] }
 0x400   : > { %5521 = vmatpush.bf16.msrb.mxu0 %v7162_v59 }
 0x401   : > { %5015 = vst [vmem:[#allocation3 + $0xb0] sm:$0xf] %v4951_v40 }
 0x402   : > { %5020 = vst [vmem:[#allocation3 + $0x4] sm:$0xf] %v4956_v13 }
 0x404   : > { %v4263_v37 = vpop.f32.mrf.mxu3  ;;  %5522 = vmatpush.bf16.msrb.mxu0 %v7161_v9 }
 0x405   : > { %v4954_v21 = vpack.c.bf16 %v4263_v37, %v4263_v37 }
 0x406   : > { %v4293_v39 = vpop.f32.mrf.mxu0 }
 0x407   : > { %5018 = vst [vmem:[#allocation3 + $0xe0] sm:$0xf] %v4954_v21  ;;  %v4957_v2 = vpack.c.bf16 %v4293_v39, %v4293_v39 }
 0x408   : > { %v3827_v32 = vpop.xlane.xlu0 %3826 }
 0x409   : > { %5021 = vst [vmem:[#allocation3 + $0x14] sm:$0xf] %v4957_v2  ;;  %7919 = vrcp.f32 %v3827_v32  ;;  %v7160_v32 = vld [vmem:[%s9279_s3 + $0x20] sm:$0xff] }
 0x40a   : > { %v4347_v54 = vpop.f32.mrf.mxu2  ;;  %5523 = vmatpush.bf16.msrb.mxu0 %v7160_v32 }
 0x40b   : > { %v4960_v28 = vpack.c.bf16 %v4347_v54, %v4347_v54 }
 0x40c   : > { %v4265_v45 = vpop.f32.mrf.mxu3 }
 0x40d   : > { %v4955_v15 = vpack.c.bf16 %v4265_v45, %v4265_v45  ;;  %5024 = vst [vmem:[#allocation3 + $0x44] sm:$0xf] %v4960_v28  ;;  %v4319_v1 = vpop.f32.mrf.mxu1  ;;  %v7159_v45 = vld [vmem:[%s9279_s3 + $0x18] sm:$0xff] }
 0x40e   : > { %v4958_v8 = vpack.c.bf16 %v4319_v1, %v4319_v1  ;;  %5524 = vmatpush.bf16.msrb.mxu0 %v7159_v45 }
 0x40f   : > { %5019 = vst [vmem:[#allocation3 + $0xf0] sm:$0xf] %v4955_v15  ;;  %v7920_v48 = vpop.eup %7919  ;;  %v7179_v15 = vld [vmem:[%s9279_s3 + $0xb8] sm:$0xff] }
 0x410   : > { %5022 = vst [vmem:[#allocation3 + $0x24] sm:$0xf] %v4958_v8  ;;  %v3971_v29 = vmul.f32 %v7920_v48, %v8993_v52  ;;  %5618 = vmatpush.bf16.msrb.mxu2 %v7179_v15  ;;  %v7164_v15 = vld [vmem:[%s9279_s3 + $0x40] sm:$0xff] }
 0x411   : > { %v3824_v18 = vpop.xlane.xlu2 %3823 }
 0x412   : > { %7921 = vrcp.f32 %v3824_v18  ;;  %v4349_v0 = vpop.f32.mrf.mxu2  ;;  %v4035_v16 = vpack.c.bf16 %v3971_v29, %v3971_v29 }
 0x413   : > { %v4961_v58 = vpack.c.bf16 %v4349_v0, %v4349_v0  ;;  %v7158_v0 = vld [vmem:[%s9279_s3 + $0x10] sm:$0xff] }
 0x414   : > { %v4375_v33 = vpop.f32.mrf.mxu3  ;;  %v4803_v52 = vunpack.c.l.b16 %v4035_v16  ;;  %5525 = vmatpush.bf16.msrb.mxu0 %v7158_v0 }
 0x415   : > { %5025 = vst [vmem:[#allocation3 + $0x54] sm:$0xf] %v4961_v58  ;;  %v4962_v19 = vpack.c.bf16 %v4375_v33, %v4375_v33  ;;  %v4321_v22 = vpop.f32.mrf.mxu1  ;;  %v7178_v58 = vld [vmem:[%s9279_s3 + $0xb0] sm:$0xff] }
 0x416   : > { %v4959_v14 = vpack.c.bf16 %v4321_v22, %v4321_v22  ;;  %v4403_v43 = vpop.f32.mrf.mxu0  ;;  %5619 = vmatpush.bf16.msrb.mxu2 %v7178_v58  ;;  %v7157_v22 = vld [vmem:[%s9279_s3 + $0x8] sm:$0xff] }
 0x417   : > { %5026 = vst [vmem:[#allocation3 + $0x64] sm:$0xf] %v4962_v19  ;;  %v4964_v49 = vpack.c.bf16 %v4403_v43, %v4403_v43  ;;  %v7177_v43 = vld [vmem:[%s9279_s3 + $0xa8] sm:$0xff] }
 0x418   : > { %v7922_v56 = vpop.eup %7921  ;;  %5023 = vst [vmem:[#allocation3 + $0x34] sm:$0xf] %v4959_v14  ;;  %v7171_v14 = vld [vmem:[%s9279_s3 + $0x78] sm:$0xff]  ;;  %5526 = vmatpush.bf16.msrb.mxu0 %v7157_v22 }
 0x419   : > { %v3970_v26 = vmul.f32 %v7922_v56, %v9001_v23  ;;  %5028 = vst [vmem:[#allocation3 + $0x84] sm:$0xf] %v4964_v49  ;;  %v3467_v41 = vpop.xlane.xlu2 %3466  ;;  %5569 = vmatpush.bf16.msrb.mxu1 %v7171_v14 }
 0x41a   : > { %v3531_v5 = vsub.f32 %v9007_v31, %v3467_v41  ;;  %5620 = vmatpush.bf16.msrb.mxu2 %v7177_v43 }
 0x41b   : > { %v4034_v12 = vpack.c.bf16 %v3970_v26, %v3970_v26 }
 0x41c   : > { %v3658_v47 = vmul.f32 1.442695, %v3531_v5  ;;  %v4377_v27 = vpop.f32.mrf.mxu3  ;;  %v7156_v5 = vld [vmem:[%s9279_s3] sm:$0xff] }
 0x41d   : > { %v4802_v44 = vunpack.c.l.b16 %v4034_v12  ;;  %v4963_v36 = vpack.c.bf16 %v4377_v27, %v4377_v27  ;;  %v7170_v12 = vld [vmem:[%s9279_s3 + $0x70] sm:$0xff]  ;;  %5527 = vmatpush.bf16.msrb.mxu0 %v7156_v5 }
 0x41e   : > { %7923 = vpow2.f32 %v3658_v47  ;;  %v4405_v25 = vpop.f32.mrf.mxu0  ;;  %v7176_v47 = vld [vmem:[%s9279_s3 + $0xa0] sm:$0xff]  ;;  %5570 = vmatpush.bf16.msrb.mxu1 %v7170_v12 }
 0x41f   : > { %v4804_v6 = vpack.c.b16 %v4803_v52, %v4802_v44  ;;  %5027 = vst [vmem:[#allocation3 + $0x74] sm:$0xf] %v4963_v36  ;;  %v4965_v57 = vpack.c.bf16 %v4405_v25, %v4405_v25  ;;  %5621 = vmatpush.bf16.msrb.mxu2 %v7176_v47  ;;  %v7169_v25 = vld [vmem:[%s9279_s3 + $0x68] sm:$0xff] }
 0x421   : > { %5029 = vst [vmem:[#allocation3 + $0x94] sm:$0xf] %v4965_v57  ;;  %6642 = vmatmul.msk.bf16.vlgmr.msrb.gmra.mxu3 %vm3275_vm0, %v4804_v6  ;;  %v7175_v6 = vld [vmem:[%s9279_s3 + $0x98] sm:$0xff] }
 0x422   : > { %5571 = vmatpush.bf16.msrb.mxu1 %v7169_v25 }
 0x423   : > { %v4459_v17 = vpop.f32.mrf.mxu2  ;;  %5622 = vmatpush.bf16.msrb.mxu2 %v7175_v6 }
 0x424   : > { %v9088_v23 = vpop.eup %7923  ;;  %v4968_v3 = vpack.c.bf16 %v4459_v17, %v4459_v17 }
 0x425   : > { %v3849_v31 = vsel %vm3275_vm0, %v9088_v23, 0.0 }
 0x426   : > { %5032 = vst [vmem:[#allocation3 + $0xc4] sm:$0xf] %v4968_v3  ;;  %v4431_v55 = vpop.f32.mrf.mxu1  ;;  %3850 = vadd.xlane.f32.xlu1 %v3849_v31 }
 0x427   : > { %v4966_v60 = vpack.c.bf16 %v4431_v55, %v4431_v55 }
 0x429   : > { %5030 = vst [vmem:[#allocation3 + $0xa4] sm:$0xf] %v4966_v60 }
 0x42b   : > { %v4461_v53 = vpop.f32.mrf.mxu2 }
 0x42c   : > { %v4969_v34 = vpack.c.bf16 %v4461_v53, %v4461_v53  ;;  %v7168_v53 = vld [vmem:[%s9279_s3 + $0x60] sm:$0xff] }
 0x42d   : > { %5572 = vmatpush.bf16.msrb.mxu1 %v7168_v53  ;;  %v7186_v53 = vld [vmem:[%s9279_s3 + $0xf0] sm:$0xff] }
 0x42e   : > { %5033 = vst [vmem:[#allocation3 + $0xd4] sm:$0xf] %v4969_v34  ;;  %v4433_v42 = vpop.f32.mrf.mxu1  ;;  %v7174_v34 = vld [vmem:[%s9279_s3 + $0x90] sm:$0xff] }
 0x42f   : > { %v4967_v11 = vpack.c.bf16 %v4433_v42, %v4433_v42  ;;  %5623 = vmatpush.bf16.msrb.mxu2 %v7174_v34  ;;  %v6667_v34 = vld [vmem:[#allocation3 + $0x10] sm:$0xf0] }
 0x431   : > { %5031 = vst [vmem:[#allocation3 + $0xb4] sm:$0xf] %v4967_v11 }
 0x434   : > { %v4487_v62 = vpop.f32.mrf.mxu3  ;;  %v4515_v10 = vpop.f32.mrf.mxu0 }
 0x435   : > { %v4970_v63 = vpack.c.bf16 %v4487_v62, %v4487_v62  ;;  %v4972_v7 = vpack.c.bf16 %v4515_v10, %v4515_v10 }
 0x436   : > { %v4543_v46 = vpop.f32.mrf.mxu1 }
 0x437   : > { %5034 = vst [vmem:[#allocation3 + $0xe4] sm:$0xf] %v4970_v63  ;;  %v4974_v4 = vpack.c.bf16 %v4543_v46, %v4543_v46 }
 0x438   : > { %5036 = vst [vmem:[#allocation3 + $0x8] sm:$0xf] %v4972_v7  ;;  %v7173_v7 = vld [vmem:[%s9279_s3 + $0x88] sm:$0xff] }
 0x439   : > { %5038 = vst [vmem:[#allocation3 + $0x28] sm:$0xf] %v4974_v4  ;;  %5624 = vmatpush.bf16.msrb.mxu2 %v7173_v7 }
 0x43c   : > { %v4489_v40 = vpop.f32.mrf.mxu3  ;;  %v4517_v13 = vpop.f32.mrf.mxu0 }
 0x43d   : > { %v4971_v37 = vpack.c.bf16 %v4489_v40, %v4489_v40  ;;  %v4973_v21 = vpack.c.bf16 %v4517_v13, %v4517_v13  ;;  %v7166_v13 = vld [vmem:[%s9279_s3 + $0x50] sm:$0xff] }
 0x43e   : > { %v4545_v39 = vpop.f32.mrf.mxu1 }
 0x43f   : > { %5035 = vst [vmem:[#allocation3 + $0xf4] sm:$0xf] %v4971_v37  ;;  %v4975_v2 = vpack.c.bf16 %v4545_v39, %v4545_v39  ;;  %v7172_v37 = vld [vmem:[%s9279_s3 + $0x80] sm:$0xff] }
 0x440   : > { %5037 = vst [vmem:[#allocation3 + $0x18] sm:$0xf] %v4973_v21  ;;  %5625 = vmatpush.bf16.msrb.mxu2 %v7172_v37  ;;  %v6683_v37 = vld [vmem:[#allocation3 + $0x30] sm:$0xf0] }
 0x441   : > { %5039 = vst [vmem:[#allocation3 + $0x38] sm:$0xf] %v4975_v2  ;;  %v7165_v2 = vld [vmem:[%s9279_s3 + $0x48] sm:$0xff] }
 0x442   : > { %v4571_v54 = vpop.f32.mrf.mxu2 }
 0x443   : > { %v4976_v28 = vpack.c.bf16 %v4571_v54, %v4571_v54 }
 0x444   : > { %v4627_v1 = vpop.f32.mrf.mxu0 }
 0x445   : > { %5040 = vst [vmem:[#allocation3 + $0x48] sm:$0xf] %v4976_v28  ;;  %v4980_v8 = vpack.c.bf16 %v4627_v1, %v4627_v1 }
 0x446   : > { %v4655_v18 = vpop.f32.mrf.mxu1 }
 0x447   : > { %5044 = vst [vmem:[#allocation3 + $0x88] sm:$0xf] %v4980_v8  ;;  %v4982_v48 = vpack.c.bf16 %v4655_v18, %v4655_v18 }
 0x448   : > { %v7131_v7 = vld [vmem:[#allocation3 + $0x34] sm:$0xf0] }
 0x449   : > { %5046 = vst [vmem:[#allocation3 + $0xa8] sm:$0xf] %v4982_v48  ;;  %v3833_v33 = vpop.xlane.xlu1 %3832 }
 0x44a   : > { %7925 = vrcp.f32 %v3833_v33  ;;  %v4573_v29 = vpop.f32.mrf.mxu2 }
 0x44b   : > { %v4977_v19 = vpack.c.bf16 %v4573_v29, %v4573_v29  ;;  %v7126_v29 = vld [vmem:[#allocation3 + $0xc] sm:$0xf0] }
 0x44c   : > { %v4629_v49 = vpop.f32.mrf.mxu0 }
 0x44d   : > { %5041 = vst [vmem:[#allocation3 + $0x58] sm:$0xf] %v4977_v19  ;;  %v4981_v56 = vpack.c.bf16 %v4629_v49, %v4629_v49 }
 0x44e   : > { %v4657_v16 = vpop.f32.mrf.mxu1 }
 0x44f   : > { %5045 = vst [vmem:[#allocation3 + $0x98] sm:$0xf] %v4981_v56  ;;  %v4983_v26 = vpack.c.bf16 %v4657_v16, %v4657_v16  ;;  %v3830_v41 = vpop.xlane.xlu0 %3829  ;;  %v6665_v56 = vld [vmem:[#allocation3] sm:$0xf] }
 0x450   : > { %v7926_v27 = vpop.eup %7925  ;;  %7927 = vrcp.f32 %v3830_v41  ;;  %v6666_v5 = vor.u32 %v7126_v29, %v6665_v56  ;;  %v6699_v29 = vld [vmem:[#allocation3 + $0x50] sm:$0xf0] }
 0x451   : > { %5047 = vst [vmem:[#allocation3 + $0xb8] sm:$0xf] %v4983_v26  ;;  %v3973_v44 = vmul.f32 %v7926_v27, %v9041_v61 }
 0x452   : > { %v4599_v52 = vpop.f32.mrf.mxu3 }
 0x453   : > { %v4978_v36 = vpack.c.bf16 %v4599_v52, %v4599_v52  ;;  %v4037_v60 = vpack.c.bf16 %v3973_v44, %v3973_v44 }
 0x454   : > { %v4683_v57 = vpop.f32.mrf.mxu2  ;;  %v4739_v17 = vpop.f32.mrf.mxu0 }
 0x455   : > { %5042 = vst [vmem:[#allocation3 + $0x68] sm:$0xf] %v4978_v36  ;;  %v4984_v3 = vpack.c.bf16 %v4683_v57, %v4683_v57  ;;  %v4988_v31 = vpack.c.bf16 %v4739_v17, %v4739_v17  ;;  %v4831_v62 = vunpack.c.l.b16 %v4037_v60  ;;  %v7130_v57 = vld [vmem:[#allocation3 + $0x2c] sm:$0xf0]  ;;  %v6673_v60 = vld [vmem:[#allocation3 + $0x8] sm:$0xf] }
 0x456   : > { %v7928_v55 = vpop.eup %7927 }
 0x457   : > { %v3972_v61 = vmul.f32 %v7928_v55, %v9049_v30  ;;  %5048 = vst [vmem:[#allocation3 + $0xc8] sm:$0xf] %v4984_v3  ;;  %v7167_v30 = vld [vmem:[%s9279_s3 + $0x58] sm:$0xff]  ;;  %v6681_v3 = vld [vmem:[#allocation3 + $0x20] sm:$0xf] }
 0x458   : > { %5052 = vst [vmem:[#allocation3 + $0xc] sm:$0xf] %v4988_v31  ;;  %v3836_v42 = vpop.xlane.xlu2 %3835  ;;  %5573 = vmatpush.bf16.msrb.mxu1 %v7167_v30  ;;  %v7127_v31 = vld [vmem:[#allocation3 + $0x14] sm:$0xf0]  ;;  %v6682_v55 = vor.u32 %v7130_v57, %v6681_v3  ;;  %v6697_v30 = vld [vmem:[#allocation3 + $0x40] sm:$0xf] }
 0x459   : > { %v4036_v11 = vpack.c.bf16 %v3972_v61, %v3972_v61  ;;  %7929 = vrcp.f32 %v3836_v42  ;;  %v6674_v61 = vor.u32 %v7127_v31, %v6673_v60  ;;  %v7185_v42 = vld [vmem:[%s9279_s3 + $0xe8] sm:$0xff]  ;;  %v6745_v57 = vld [vmem:[#allocation3 + $0xa0] sm:$0xf]  ;;  %v7140_v60 = vld [vmem:[#allocation3 + $0x84] sm:$0xf] }
 0x45a   : > { %v4601_v24 = vpop.f32.mrf.mxu3  ;;  %v6737_v3 = vld [vmem:[#allocation3 + $0x88] sm:$0xf] }
 0x45b   : > { %v4830_v10 = vunpack.c.l.b16 %v4036_v11  ;;  %v4979_v63 = vpack.c.bf16 %v4601_v24, %v4601_v24  ;;  %v7124_v11 = vld [vmem:[#allocation3 + $0x4] sm:$0xf] }
 0x45c   : > { %v4685_v46 = vpop.f32.mrf.mxu2  ;;  %v4741_v4 = vpop.f32.mrf.mxu0  ;;  %5574 = vmatpush.bf16.msrb.mxu1 %v7166_v13  ;;  %v6670_v24 = vor.u32 %v7124_v11, %v6667_v34  ;;  %v7181_v13 = vld [vmem:[%s9279_s3 + $0xc8] sm:$0xff]  ;;  %v7150_v11 = vld [vmem:[#allocation3 + $0xcc] sm:$0xf0] }
 0x45d   : > { %v4832_v59 = vpack.c.b16 %v4831_v62, %v4830_v10  ;;  %5043 = vst [vmem:[#allocation3 + $0x78] sm:$0xf] %v4979_v63  ;;  %v4985_v9 = vpack.c.bf16 %v4685_v46, %v4685_v46  ;;  %v4989_v40 = vpack.c.bf16 %v4741_v4, %v4741_v4  ;;  %v7184_v62 = vld [vmem:[%s9279_s3 + $0xe0] sm:$0xff]  ;;  %v7183_v10 = vld [vmem:[%s9279_s3 + $0xd8] sm:$0xff]  ;;  %v7134_v63 = vld [vmem:[#allocation3 + $0x4c] sm:$0xf0] }
 0x45e   : > { %v6698_v46 = vor.u32 %v7134_v63, %v6697_v30  ;;  %v6689_v4 = vld [vmem:[#allocation3 + $0x28] sm:$0xf] }
 0x45f   : > { %5049 = vst [vmem:[#allocation3 + $0xd8] sm:$0xf] %v4985_v9  ;;  %6647 = vmatmul.msk.bf16.vlgmr.msra.gmra.mxu0 %vm3275_vm0, %v4832_v59  ;;  %v7930_v1 = vpop.eup %7929  ;;  %v6690_v59 = vor.u32 %v7131_v7, %v6689_v4  ;;  %v7182_v9 = vld [vmem:[%s9279_s3 + $0xd0] sm:$0xff]  ;;  %v6753_v63 = vld [vmem:[#allocation3 + $0xa8] sm:$0xf] }
 0x460   : > { %5053 = vst [vmem:[#allocation3 + $0x1c] sm:$0xf] %v4989_v40  ;;  %v3845_v21 = vpop.xlane.xlu2 %3844  ;;  %5575 = vmatpush.bf16.msrb.mxu1 %v7165_v2  ;;  %v3974_v19 = vmul.f32 %v7930_v1, %v9058_v35  ;;  %v7180_v2 = vld [vmem:[%s9279_s3 + $0xc0] sm:$0xff]  ;;  %v6747_v7 = vld [vmem:[#allocation3 + $0xb0] sm:$0xf0] }
 0x461   : > { %7931 = vrcp.f32 %v3845_v21  ;;  %v3842_v39 = vpop.xlane.xlu1 %3841  ;;  %v7128_v21 = vld [vmem:[#allocation3 + $0x24] sm:$0xf] }
 0x462   : > { %7933 = vrcp.f32 %v3842_v39  ;;  %v6686_v39 = vor.u32 %v7128_v21, %v6683_v37  ;;  %v6777_v21 = vld [vmem:[#allocation3 + $0xe0] sm:$0xf] }
 0x464   : > { %v4711_v32 = vpop.f32.mrf.mxu3  ;;  %v4767_v54 = vpop.f32.mrf.mxu1  ;;  %5576 = vmatpush.bf16.msrb.mxu1 %v7164_v15  ;;  %v7135_v15 = vld [vmem:[#allocation3 + $0x54] sm:$0xf0] }
 0x465   : > { %v4986_v28 = vpack.c.bf16 %v4711_v32, %v4711_v32  ;;  %v4990_v45 = vpack.c.bf16 %v4767_v54, %v4767_v54 }
 0x467   : > { %v7932_v8 = vpop.eup %7931  ;;  %5050 = vst [vmem:[#allocation3 + $0xe8] sm:$0xf] %v4986_v28  ;;  %v3839_v18 = vpop.xlane.xlu0 %3838  ;;  %v7138_v28 = vld [vmem:[#allocation3 + $0x6c] sm:$0xf0] }
 0x468   : > { %v7934_v48 = vpop.eup %7933  ;;  %v3977_v0 = vmul.f32 %v7932_v8, %v9067_v20  ;;  %5054 = vst [vmem:[#allocation3 + $0x2c] sm:$0xf] %v4990_v45  ;;  %7935 = vrcp.f32 %v3839_v18  ;;  %v4038_v20 = vpack.c.bf16 %v3974_v19, %v3974_v19  ;;  %v6713_v45 = vld [vmem:[#allocation3 + $0x60] sm:$0xf]  ;;  %v6705_v18 = vld [vmem:[#allocation3 + $0x48] sm:$0xf] }
 0x469   : > { %v3976_v58 = vmul.f32 %v7934_v48, %v9069_v50  ;;  %v6714_v8 = vor.u32 %v7138_v28, %v6713_v45  ;;  %v6706_v48 = vor.u32 %v7135_v15, %v6705_v18  ;;  %v6763_v45 = vld [vmem:[#allocation3 + $0xd0] sm:$0xf0] }
 0x46a   : > { %v4041_v33 = vpack.c.bf16 %v3977_v0, %v3977_v0  ;;  %v4858_v52 = vunpack.c.l.b16 %v4038_v20 }
 0x46b   : > { %v4040_v22 = vpack.c.bf16 %v3976_v58, %v3976_v58 }
 0x46c   : > { %v4887_v14 = vunpack.c.l.b16 %v4041_v33  ;;  %v4713_v43 = vpop.f32.mrf.mxu3  ;;  %v4769_v49 = vpop.f32.mrf.mxu1 }
 0x46d   : > { %v4886_v16 = vunpack.c.l.b16 %v4040_v22  ;;  %v4987_v26 = vpack.c.bf16 %v4713_v43, %v4713_v43  ;;  %v4991_v41 = vpack.c.bf16 %v4769_v49, %v4769_v49 }
 0x46e   : > { %v7936_v12 = vpop.eup %7935 }
 0x46f   : > { %v4888_v47 = vpack.c.b16 %v4887_v14, %v4886_v16  ;;  %v3975_v27 = vmul.f32 %v7936_v12, %v9076_v51  ;;  %5051 = vst [vmem:[#allocation3 + $0xf8] sm:$0xf] %v4987_v26  ;;  %5528 = vmatmul.bf16.vlgmr.msrb.gmra.mxu0 %v6666_v5  ;;  %v7187_v51 = vld [vmem:[%s9279_s3 + $0xf8] sm:$0xff]  ;;  %v3848_v40 = vpop.xlane.xlu0 %3847  ;;  %v7132_v14 = vld [vmem:[#allocation3 + $0x44] sm:$0xf] }
 0x470   : > { %5055 = vst [vmem:[#allocation3 + $0x3c] sm:$0xf] %v4991_v41  ;;  %5667 = vmatpush.bf16.msrb.mxu3 %v7187_v51  ;;  %7937 = vrcp.f32 %v3848_v40  ;;  %v6702_v16 = vor.u32 %v7132_v14, %v6699_v29  ;;  %v6729_v5 = vld [vmem:[#allocation3 + $0x80] sm:$0xf]  ;;  %v7139_v12 = vld [vmem:[#allocation3 + $0x74] sm:$0xf0] }
 0x471   : > { %v4039_v50 = vpack.c.bf16 %v3975_v27, %v3975_v27  ;;  %6657 = vmatmul.msk.bf16.vlgmr.msra.gmra.mxu2 %vm3275_vm0, %v4888_v47  ;;  %v6721_v47 = vld [vmem:[#allocation3 + $0x68] sm:$0xf]  ;;  %v7129_v34 = vld [vmem:[#allocation3 + $0x2c] sm:$0xf] }
 0x472   : > { %v4795_v35 = vpop.f32.mrf.mxu2  ;;  %v6722_v27 = vor.u32 %v7139_v12, %v6721_v47  ;;  %v6785_v29 = vld [vmem:[#allocation3 + $0xe8] sm:$0xf] }
 0x473   : > { %v4859_v44 = vunpack.c.l.b16 %v4039_v50  ;;  %v4992_v36 = vpack.c.bf16 %v4795_v35, %v4795_v35  ;;  %v6715_v50 = vld [vmem:[#allocation3 + $0x70] sm:$0xf0]  ;;  %v7136_v35 = vld [vmem:[#allocation3 + $0x64] sm:$0xf] }
 0x474   : > { %5668 = vmatpush.bf16.msrb.mxu3 %v7186_v53 }
 0x475   : > { %v4860_v25 = vpack.c.b16 %v4859_v44, %v4858_v52  ;;  %5056 = vst [vmem:[#allocation3 + $0x4c] sm:$0xf] %v4992_v36  ;;  %v6675_v52 = vld [vmem:[#allocation3 + $0x18] sm:$0xf0]  ;;  %v6718_v44 = vor.u32 %v7136_v35, %v6715_v50  ;;  %v7125_v36 = vld [vmem:[#allocation3 + $0xc] sm:$0xf] }
 0x476   : > { %v7938_v54 = vpop.eup %7937 }
 0x477   : > { %6652 = vmatmul.msk.bf16.vlgmr.msra.gmra.mxu1 %vm3275_vm0, %v4860_v25  ;;  %v3978_v1 = vmul.f32 %v7938_v54, %v9080_v38  ;;  %v7142_v38 = vld [vmem:[#allocation3 + $0x8c] sm:$0xf0]  ;;  %v6678_v25 = vor.u32 %v7125_v36, %v6675_v52  ;;  %v6769_v54 = vld [vmem:[#allocation3 + $0xc8] sm:$0xf] }
 0x478   : > { %5669 = vmatpush.bf16.msrb.mxu3 %v7185_v42 }
 0x479   : > { %v4042_v58 = vpack.c.bf16 %v3978_v1, %v3978_v1  ;;  %v7148_v1 = vld [vmem:[#allocation3 + $0xc4] sm:$0xf] }
 0x47a   : > { %v4797_v6 = vpop.f32.mrf.mxu2 }
 0x47b   : > { %v4993_v17 = vpack.c.bf16 %v4797_v6, %v4797_v6  ;;  %v4914_v43 = vunpack.c.l.b16 %v4042_v58  ;;  %v7146_v6 = vld [vmem:[#allocation3 + $0xac] sm:$0xf0] }
 0x47c   : > { %5670 = vmatpush.bf16.msrb.mxu3 %v7184_v62  ;;  %v6746_v51 = vor.u32 %v7146_v6, %v6745_v57  ;;  %v7147_v62 = vld [vmem:[#allocation3 + $0xb4] sm:$0xf0] }
 0x47d   : > { %5057 = vst [vmem:[#allocation3 + $0x5c] sm:$0xf] %v4993_v17  ;;  %v7143_v17 = vld [vmem:[#allocation3 + $0x94] sm:$0xf0]  ;;  %v6754_v30 = vor.u32 %v7147_v62, %v6753_v63 }
 0x47e   : > { %v6738_v31 = vor.u32 %v7143_v17, %v6737_v3 }
 0x47f   : > { %5533 = vmatmul.bf16.gmra.mxu0 %v6682_v55  ;;  %v6731_v55 = vld [vmem:[#allocation3 + $0x90] sm:$0xf0] }
 0x480   : > { %5671 = vmatpush.bf16.msrb.mxu3 %v7183_v10  ;;  %v6734_v53 = vor.u32 %v7140_v60, %v6731_v55 }
 0x481   : > { %5626 = vmatmul.bf16.vlgmr.msrb.gmra.mxu2 %v6674_v61  ;;  %v6691_v61 = vld [vmem:[#allocation3 + $0x38] sm:$0xf0] }
 0x482   : > { %v6694_v42 = vor.u32 %v7129_v34, %v6691_v61 }
 0x484   : > { %5672 = vmatpush.bf16.msrb.mxu3 %v7182_v9  ;;  %v6707_v4 = vld [vmem:[#allocation3 + $0x58] sm:$0xf0]  ;;  %v7133_v9 = vld [vmem:[#allocation3 + $0x4c] sm:$0xf] }
 0x485   : > { %v6710_v40 = vor.u32 %v7133_v9, %v6707_v4 }
 0x487   : > { %5577 = vmatmul.bf16.vlgmr.msrb.gmra.mxu1 %v6670_v24  ;;  %v6761_v24 = vld [vmem:[#allocation3 + $0xc0] sm:$0xf] }
 0x488   : > { %5673 = vmatpush.bf16.msrb.mxu3 %v7181_v13  ;;  %v6762_v10 = vor.u32 %v7150_v11, %v6761_v24  ;;  %v7154_v13 = vld [vmem:[#allocation3 + $0xec] sm:$0xf0] }
 0x48c   : > { %5674 = vmatpush.bf16.msrb.mxu3 %v7180_v2 }
 0x48f   : > { %5538 = vmatmul.bf16.gmra.mxu0 %v6698_v46  ;;  %v7144_v46 = vld [vmem:[#allocation3 + $0xa4] sm:$0xf] }
 0x491   : > { %5631 = vmatmul.bf16.gmra.mxu2 %v6690_v59  ;;  %v6750_v59 = vor.u32 %v7144_v46, %v6747_v7 }
 0x497   : > { %5582 = vmatmul.bf16.gmra.mxu1 %v6686_v39  ;;  %v7151_v39 = vld [vmem:[#allocation3 + $0xd4] sm:$0xf0] }
 0x498   : > { %v6770_v28 = vor.u32 %v7151_v39, %v6769_v54 }
 0x499   : > { %v3851_v32 = vpop.xlane.xlu1 %3850 }
 0x49a   : > { %7939 = vrcp.f32 %v3851_v32  ;;  %v6778_v32 = vor.u32 %v7154_v13, %v6777_v21 }
 0x49f   : > { %5543 = vmatmul.bf16.gmra.mxu0 %v6714_v8 }
 0x4a0   : > { %v7940_v0 = vpop.eup %7939 }
 0x4a1   : > { %v3979_v33 = vmul.f32 %v7940_v0, %v9088_v23  ;;  %5636 = vmatmul.bf16.gmra.mxu2 %v6706_v48  ;;  %v6730_v23 = vor.u32 %v7142_v38, %v6729_v5  ;;  %v6766_v48 = vor.u32 %v7148_v1, %v6763_v45 }
 0x4a3   : > { %v4043_v19 = vpack.c.bf16 %v3979_v33, %v3979_v33  ;;  %v7155_v33 = vld [vmem:[#allocation3 + $0xf4] sm:$0xf0] }
 0x4a4   : > { %v4823_v22 = vpop.f32.mrf.mxu3 }
 0x4a5   : > { %v4915_v49 = vunpack.c.l.b16 %v4043_v19  ;;  %v4994_v56 = vpack.c.bf16 %v4823_v22, %v4823_v22  ;;  %v6786_v19 = vor.u32 %v7155_v33, %v6785_v29  ;;  %v6779_v22 = vld [vmem:[#allocation3 + $0xf0] sm:$0xf0] }
 0x4a7   : > { %v4916_v26 = vpack.c.b16 %v4915_v49, %v4914_v43  ;;  %5058 = vst [vmem:[#allocation3 + $0x6c] sm:$0xf] %v4994_v56  ;;  %5587 = vmatmul.bf16.gmra.mxu1 %v6702_v16  ;;  %v7152_v49 = vld [vmem:[#allocation3 + $0xe4] sm:$0xf] }
 0x4a8   : > { %v6782_v38 = vor.u32 %v7152_v49, %v6779_v22 }
 0x4a9   : > { %6662 = vmatmul.msk.bf16.vlgmr.msra.gmra.mxu3 %vm3275_vm0, %v4916_v26 }
 0x4ac   : > { %v4825_v41 = vpop.f32.mrf.mxu3 }
 0x4ad   : > { %v4995_v20 = vpack.c.bf16 %v4825_v41, %v4825_v41 }
 0x4ae   : > { %v7137_v0 = vld [vmem:[#allocation3 + $0x6c] sm:$0xf] }
 0x4af   : > { %5059 = vst [vmem:[#allocation3 + $0x7c] sm:$0xf] %v4995_v20  ;;  %5548 = vmatmul.bf16.gmra.mxu0 %v6730_v23 }
 0x4b1   : > { %5641 = vmatmul.bf16.gmra.mxu2 %v6722_v27 }
 0x4b6   : > { %v6723_v8 = vld [vmem:[#allocation3 + $0x78] sm:$0xf0] }
 0x4b7   : > { %5592 = vmatmul.bf16.gmra.mxu1 %v6718_v44  ;;  %v6726_v58 = vor.u32 %v7137_v0, %v6723_v8 }
 0x4b9   : > { %5675 = vmatmul.bf16.vlgmr.msrb.gmra.mxu3 %v6678_v25 }
 0x4bf   : > { %5553 = vmatmul.bf16.gmra.mxu0 %v6746_v51 }
 0x4c1   : > { %5646 = vmatmul.bf16.gmra.mxu2 %v6738_v31 }
 0x4c7   : > { %5597 = vmatmul.bf16.gmra.mxu1 %v6734_v53  ;;  %v9203_v53 = vld [vmem:[%s9280_s4] ss:$0 sm:$0xff] }
 0x4c9   : > { %5680 = vmatmul.bf16.gmra.mxu3 %v6694_v42 }
 0x4cf   : > { %5558 = vmatmul.bf16.gmra.mxu0 %v6762_v10 }
 0x4d1   : > { %5651 = vmatmul.bf16.gmra.mxu2 %v6754_v30 }
 0x4d7   : > { %5602 = vmatmul.bf16.gmra.mxu1 %v6750_v59 }
 0x4d9   : > { %5685 = vmatmul.bf16.gmra.mxu3 %v6710_v40 }
 0x4dc   : > { %v4851_v37 = vpop.f32.mrf.mxu0 }
 0x4dd   : > { %v4996_v2 = vpack.c.bf16 %v4851_v37, %v4851_v37 }
 0x4df   : > { %5060 = vst [vmem:[#allocation3 + $0x8c] sm:$0xf] %v4996_v2  ;;  %5563 = vmatmul.bf16.gmra.mxu0 %v6778_v32 }
 0x4e1   : > { %5656 = vmatmul.bf16.gmra.mxu2 %v6770_v28 }
 0x4e4   : > { %v4853_v15 = vpop.f32.mrf.mxu0 }
 0x4e5   : > { %v4997_v18 = vpack.c.bf16 %v4853_v15, %v4853_v15 }
 0x4e6   : > { %v7141_v41 = vld [vmem:[#allocation3 + $0x8c] sm:$0xf] }
 0x4e7   : > { %5061 = vst [vmem:[#allocation3 + $0x9c] sm:$0xf] %v4997_v18  ;;  %5607 = vmatmul.bf16.gmra.mxu1 %v6766_v48 }
 0x4e9   : > { %5690 = vmatmul.bf16.gmra.mxu3 %v6726_v58 }
 0x4ec   : > { %v5529_v25 = vpop.f32.mrf.mxu0 }
 0x4ed   : > { %v5530_v42 = vadd.f32 %v9203_v53, %v5529_v25 }
 0x4ee   : > { %v6739_v56 = vld [vmem:[#allocation3 + $0x98] sm:$0xf0] }
 0x4ef   : > { %v6742_v5 = vor.u32 %v7141_v41, %v6739_v56 }
 0x4f1   : > { %5661 = vmatmul.bf16.gmra.mxu2 %v6786_v19 }
 0x4f4   : > { %v4907_v14 = vpop.f32.mrf.mxu2  ;;  %v4879_v43 = vpop.f32.mrf.mxu1 }
 0x4f5   : > { %v5000_v16 = vpack.c.bf16 %v4907_v14, %v4907_v14  ;;  %v4998_v26 = vpack.c.bf16 %v4879_v43, %v4879_v43  ;;  %v5531_v17 = vpop.f32.mrf.mxu0 }
 0x4f6   : > { %v5532_v46 = vadd.f32 %v9203_v53, %v5531_v17 }
 0x4f7   : > { %5064 = vst [vmem:[#allocation3 + $0xcc] sm:$0xf] %v5000_v16  ;;  %5612 = vmatmul.bf16.gmra.mxu1 %v6782_v38 }
 0x4f8   : > { %5062 = vst [vmem:[#allocation3 + $0xac] sm:$0xf] %v4998_v26 }
 0x4f9   : > { %5695 = vmatmul.bf16.gmra.mxu3 %v6742_v5 }
 0x4fc   : > { %v4909_v12 = vpop.f32.mrf.mxu2  ;;  %v4881_v20 = vpop.f32.mrf.mxu1 }
 0x4fd   : > { %v5001_v23 = vpack.c.bf16 %v4909_v12, %v4909_v12  ;;  %v4999_v47 = vpack.c.bf16 %v4881_v20, %v4881_v20  ;;  %v5534_v55 = vpop.f32.mrf.mxu0 }
 0x4fe   : > { %v7149_v44 = vld [vmem:[#allocation3 + $0xcc] sm:$0xf]  ;;  %v5535_v54 = vadd.f32 %v9203_v53, %v5534_v55 }
 0x4ff   : > { %5065 = vst [vmem:[#allocation3 + $0xdc] sm:$0xf] %v5001_v23  ;;  %v7145_v27 = vld [vmem:[#allocation3 + $0xac] sm:$0xf] }
 0x500   : > { %5063 = vst [vmem:[#allocation3 + $0xbc] sm:$0xf] %v4999_v47 }
 0x504   : > { %v5578_v6 = vpop.f32.mrf.mxu1  ;;  %v5627_v57 = vpop.f32.mrf.mxu2 }
 0x505   : > { %v5536_v62 = vpop.f32.mrf.mxu0  ;;  %v5579_v10 = vadd.f32 %v5578_v6, %v5530_v42 }
 0x506   : > { %v6771_v52 = vld [vmem:[#allocation3 + $0xd8] sm:$0xf0]  ;;  %v5537_v48 = vadd.f32 %v9203_v53, %v5536_v62 }
 0x507   : > { %v6755_v50 = vld [vmem:[#allocation3 + $0xb8] sm:$0xf0]  ;;  %v6774_v36 = vor.u32 %v7149_v44, %v6771_v52  ;;  %v5628_v30 = vadd.f32 %v5627_v57, %v5579_v10 }
 0x508   : > { %v6758_v35 = vor.u32 %v7145_v27, %v6755_v50 }
 0x50a   : > { %5700 = vmatmul.bf16.gmra.mxu3 %v6758_v35 }
 0x50c   : > { %v5580_v51 = vpop.f32.mrf.mxu1  ;;  %v5629_v3 = vpop.f32.mrf.mxu2 }
 0x50d   : > { %v5581_v40 = vadd.f32 %v5580_v51, %v5532_v46  ;;  %v5539_v21 = vpop.f32.mrf.mxu0 }
 0x50e   : > { %v5540_v14 = vadd.f32 %v9203_v53, %v5539_v21 }
 0x50f   : > { %v5630_v2 = vadd.f32 %v5629_v3, %v5581_v40 }
 0x514   : > { %v5583_v61 = vpop.f32.mrf.mxu1  ;;  %v5632_v11 = vpop.f32.mrf.mxu2 }
 0x515   : > { %v5584_v45 = vadd.f32 %v5583_v61, %v5535_v54  ;;  %v5541_v1 = vpop.f32.mrf.mxu0 }
 0x516   : > { %v5542_v41 = vadd.f32 %v9203_v53, %v5541_v1 }
 0x517   : > { %v5633_v8 = vadd.f32 %v5632_v11, %v5584_v45 }
 0x51a   : > { %5705 = vmatmul.bf16.gmra.mxu3 %v6774_v36 }
 0x51c   : > { %v5585_v63 = vpop.f32.mrf.mxu1  ;;  %v5634_v13 = vpop.f32.mrf.mxu2 }
 0x51d   : > { %v5586_v33 = vadd.f32 %v5585_v63, %v5537_v48  ;;  %v5544_v43 = vpop.f32.mrf.mxu0 }
 0x51e   : > { %v5545_v35 = vadd.f32 %v9203_v53, %v5544_v43 }
 0x51f   : > { %v5635_v19 = vadd.f32 %v5634_v13, %v5586_v33 }
 0x524   : > { %v5588_v39 = vpop.f32.mrf.mxu1  ;;  %v5637_v15 = vpop.f32.mrf.mxu2 }
 0x525   : > { %v5589_v56 = vadd.f32 %v5588_v39, %v5540_v14  ;;  %v5546_v20 = vpop.f32.mrf.mxu0 }
 0x526   : > { %v5547_v51 = vadd.f32 %v9203_v53, %v5546_v20 }
 0x527   : > { %v5638_v26 = vadd.f32 %v5637_v15, %v5589_v56 }
 0x52c   : > { %v4935_v31 = vpop.f32.mrf.mxu3  ;;  %v5590_v0 = vpop.f32.mrf.mxu1 }
 0x52d   : > { %v5002_v60 = vpack.c.bf16 %v4935_v31, %v4935_v31  ;;  %v5639_v29 = vpop.f32.mrf.mxu2  ;;  %v5591_v23 = vadd.f32 %v5590_v0, %v5542_v41  ;;  %v5549_v25 = vpop.f32.mrf.mxu0 }
 0x52e   : > { %v5550_v42 = vadd.f32 %v9203_v53, %v5549_v25 }
 0x52f   : > { %5066 = vst [vmem:[#allocation3 + $0xec] sm:$0xf] %v5002_v60  ;;  %v5640_v27 = vadd.f32 %v5639_v29, %v5591_v23 }
 0x534   : > { %v4937_v34 = vpop.f32.mrf.mxu3  ;;  %v5593_v16 = vpop.f32.mrf.mxu1 }
 0x535   : > { %v5003_v24 = vpack.c.bf16 %v4937_v34, %v4937_v34  ;;  %v5642_v5 = vpop.f32.mrf.mxu2  ;;  %v5594_v44 = vadd.f32 %v5593_v16, %v5545_v35  ;;  %v5551_v60 = vpop.f32.mrf.mxu0 }
 0x536   : > { %v7153_v59 = vld [vmem:[#allocation3 + $0xec] sm:$0xf] }
 0x537   : > { %5067 = vst [vmem:[#allocation3 + $0xfc] sm:$0xf] %v5003_v24  ;;  %v5643_v57 = vadd.f32 %v5642_v5, %v5594_v44 }
 0x53c   : > { %v5676_v7 = vpop.f32.mrf.mxu3  ;;  %v5595_v47 = vpop.f32.mrf.mxu1 }
 0x53d   : > { %v5677_v4 = vadd.f32 %v5676_v7, %v5628_v30  ;;  %v5644_v36 = vpop.f32.mrf.mxu2  ;;  %v5596_v31 = vadd.f32 %v5595_v47, %v5547_v51  ;;  %v5552_v7 = vadd.f32 %v9203_v53, %v5551_v60  ;;  %v5554_v46 = vpop.f32.mrf.mxu0 }
 0x53e   : > { %v6787_v9 = vld [vmem:[#allocation3 + $0xf8] sm:$0xf0]  ;;  %v5555_v39 = vadd.f32 %v9203_v53, %v5554_v46 }
 0x53f   : > { %5716 = vst [vmem:[%s9210_s6] sm:$0xff] %v5677_v4  ;;  %v6790_v37 = vor.u32 %v7153_v59, %v6787_v9  ;;  %v5645_v61 = vadd.f32 %v5644_v36, %v5596_v31 }
 0x541   : > { %5710 = vmatmul.bf16.gmra.mxu3 %v6790_v37 }
 0x544   : > { %v5678_v32 = vpop.f32.mrf.mxu3  ;;  %v5598_v6 = vpop.f32.mrf.mxu1 }
 0x545   : > { %v5679_v28 = vadd.f32 %v5678_v32, %v5630_v2  ;;  %v5647_v55 = vpop.f32.mrf.mxu2  ;;  %v5599_v62 = vadd.f32 %v5598_v6, %v5550_v42  ;;  %v5556_v2 = vpop.f32.mrf.mxu0 }
 0x546   : > { %v5557_v15 = vadd.f32 %v9203_v53, %v5556_v2 }
 0x547   : > { %5717 = vst [vmem:[%s9210_s6 + $0x8] sm:$0xff] %v5679_v28  ;;  %v5648_v63 = vadd.f32 %v5647_v55, %v5599_v62 }
 0x54c   : > { %v5681_v18 = vpop.f32.mrf.mxu3  ;;  %v5600_v11 = vpop.f32.mrf.mxu1 }
 0x54d   : > { %v5682_v58 = vadd.f32 %v5681_v18, %v5633_v8  ;;  %v5649_v10 = vpop.f32.mrf.mxu2  ;;  %v5601_v59 = vadd.f32 %v5600_v11, %v5552_v7  ;;  %v5559_v48 = vpop.f32.mrf.mxu0 }
 0x54e   : > { %v5560_v29 = vadd.f32 %v9203_v53, %v5559_v48 }
 0x54f   : > { %5718 = vst [vmem:[%s9210_s6 + $0x10] sm:$0xff] %v5682_v58  ;;  %v5650_v40 = vadd.f32 %v5649_v10, %v5601_v59 }
 0x554   : > { %v5683_v22 = vpop.f32.mrf.mxu3  ;;  %v5603_v9 = vpop.f32.mrf.mxu1 }
 0x555   : > { %v5684_v49 = vadd.f32 %v5683_v22, %v5635_v19  ;;  %v5652_v37 = vpop.f32.mrf.mxu2  ;;  %v5604_v32 = vadd.f32 %v5603_v9, %v5555_v39  ;;  %v5561_v43 = vpop.f32.mrf.mxu0 }
 0x557   : > { %5719 = vst [vmem:[%s9210_s6 + $0x18] sm:$0xff] %v5684_v49  ;;  %v5653_v28 = vadd.f32 %v5652_v37, %v5604_v32 }
 0x55c   : > { %v5686_v38 = vpop.f32.mrf.mxu3  ;;  %v5605_v54 = vpop.f32.mrf.mxu1 }
 0x55d   : > { %v5687_v12 = vadd.f32 %v5686_v38, %v5638_v26  ;;  %v5654_v8 = vpop.f32.mrf.mxu2  ;;  %v5606_v18 = vadd.f32 %v5605_v54, %v5557_v15  ;;  %v5562_v26 = vadd.f32 %v9203_v53, %v5561_v43  ;;  %v5564_v47 = vpop.f32.mrf.mxu0 }
 0x55f   : > { %5720 = vst [vmem:[%s9210_s6 + $0x20] sm:$0xff] %v5687_v12  ;;  %v5655_v58 = vadd.f32 %v5654_v8, %v5606_v18 }
 0x564   : > { %v5688_v50 = vpop.f32.mrf.mxu3  ;;  %v5608_v0 = vpop.f32.mrf.mxu1 }
 0x565   : > { %v5689_v52 = vadd.f32 %v5688_v50, %v5640_v27  ;;  %v5609_v22 = vadd.f32 %v5608_v0, %v5560_v29  ;;  %v5657_v14 = vpop.f32.mrf.mxu2  ;;  %v5565_v50 = vadd.f32 %v9203_v53, %v5564_v47  ;;  %v5566_v44 = vpop.f32.mrf.mxu0 }
 0x567   : > { %5721 = vst [vmem:[%s9210_s6 + $0x28] sm:$0xff] %v5689_v52  ;;  %v5658_v49 = vadd.f32 %v5657_v14, %v5609_v22 }
 0x56c   : > { %v5691_v17 = vpop.f32.mrf.mxu3  ;;  %v5610_v56 = vpop.f32.mrf.mxu1 }
 0x56d   : > { %v5692_v3 = vadd.f32 %v5691_v17, %v5643_v57  ;;  %v5611_v41 = vadd.f32 %v5610_v56, %v5562_v26  ;;  %v5659_v5 = vpop.f32.mrf.mxu2  ;;  %v5567_v57 = vadd.f32 %v9203_v53, %v5566_v44 }
 0x56f   : > { %5722 = vst [vmem:[%s9210_s6 + $0x30] sm:$0xff] %v5692_v3  ;;  %v5660_v12 = vadd.f32 %v5659_v5, %v5611_v41 }
 0x574   : > { %v5693_v34 = vpop.f32.mrf.mxu3  ;;  %v5613_v27 = vpop.f32.mrf.mxu1 }
 0x575   : > { %v5694_v24 = vadd.f32 %v5693_v34, %v5645_v61  ;;  %v5614_v35 = vadd.f32 %v5613_v27, %v5565_v50  ;;  %v5662_v52 = vpop.f32.mrf.mxu2 }
 0x577   : > { %5723 = vst [vmem:[%s9210_s6 + $0x38] sm:$0xff] %v5694_v24  ;;  %v5663_v36 = vadd.f32 %v5662_v52, %v5614_v35 }
 0x57c   : > { %v5696_v30 = vpop.f32.mrf.mxu3  ;;  %v5615_v25 = vpop.f32.mrf.mxu1 }
 0x57d   : > { %v5697_v4 = vadd.f32 %v5696_v30, %v5648_v63  ;;  %v5616_v51 = vadd.f32 %v5615_v25, %v5567_v57  ;;  %v5664_v3 = vpop.f32.mrf.mxu2 }
 0x57f   : > { %5724 = vst [vmem:[%s9210_s6 + $0x40] sm:$0xff] %v5697_v4  ;;  %v5665_v31 = vadd.f32 %v5664_v3, %v5616_v51 }
 0x584   : > { %v5698_v13 = vpop.f32.mrf.mxu3 }
 0x585   : > { %v5699_v21 = vadd.f32 %v5698_v13, %v5650_v40 }
 0x587   : > { %5725 = vst [vmem:[%s9210_s6 + $0x48] sm:$0xff] %v5699_v21 }
 0x58d   : > { %v5701_v45 = vpop.f32.mrf.mxu3 }
 0x58e   : > { %v5702_v1 = vadd.f32 %v5701_v45, %v5653_v28 }
 0x590   : > { %5726 = vst [vmem:[%s9210_s6 + $0x50] sm:$0xff] %v5702_v1 }
 0x595   : > { %v5703_v33 = vpop.f32.mrf.mxu3 }
 0x596   : > { %v5704_v19 = vadd.f32 %v5703_v33, %v5655_v58 }
 0x598   : > { %5727 = vst [vmem:[%s9210_s6 + $0x58] sm:$0xff] %v5704_v19 }
 0x59d   : > { %v5706_v16 = vpop.f32.mrf.mxu3 }
 0x59e   : > { %v5707_v38 = vadd.f32 %v5706_v16, %v5658_v49 }
 0x5a0   : > { %5728 = vst [vmem:[%s9210_s6 + $0x60] sm:$0xff] %v5707_v38 }
 0x5a5   : > { %v5708_v20 = vpop.f32.mrf.mxu3 }
 0x5a6   : > { %v5709_v23 = vadd.f32 %v5708_v20, %v5660_v12 }
 0x5a8   : > { %5729 = vst [vmem:[%s9210_s6 + $0x68] sm:$0xff] %v5709_v23 }
 0x5c4   : > { %v5711_v6 = vpop.f32.mrf.mxu3 }
 0x5c5   : > { %v5712_v17 = vadd.f32 %v5711_v6, %v5663_v36 }
 0x5c7   : > { %5730 = vst [vmem:[%s9210_s6 + $0x70] sm:$0xff] %v5712_v17 }
 0x5cc   : > { %v5713_v55 = vpop.f32.mrf.mxu3 }
 0x5cd   : > { %v5714_v60 = vadd.f32 %v5713_v55, %v5665_v31 }
 0x5cf   : > { %5731 = vst [vmem:[%s9210_s6 + $0x78] sm:$0xff] %v5714_v60 }
 0x5d0   : > { %8006 = shalt.err (!%p8003_p8)
}
 0x5d1   : > { %s8050_s26 = smov 128   ;;  %s8051_s30 = smov 8  }
 0x5d2   : > { %7634 = dma.vmem_to_hbm [thread:$0]  (%p8120_p5), %s5746_s11, 2048, %s5748_s12, %s5733_s22, %s8050_s26, %s8050_s26, %s8051_s30  }
 0x5d3 PF: > { %p7646_p9 = scmp.ge.s32.totalorder %s8045_s21, 2  ;;  %s5762_s6 = sand.u32 1, %s8033_s18  }
 0x5d4   : > { %s5763_s7 = scalar_lea.sflag [#allocation6], %s5762_s6 }
 0x5d5   : > { %p7641_p10 = pnand %p7646_p9, %p8124_p6 }
 0x5d7   : > { %p7642_p11 = pneg %p7641_p10 }
 0x5d9   : > { %8028 = dma.done.wait (%p7642_p11), %s5763_s7, 2048  }
 0x5da   : > { %8030 = vsyncadd (%p7642_p11), %s5763_s7, 4294965248  ;;  %p16_p12 = scmp.ge.s32.totalorder %s8107_s24, 4   ;;  %s9348_s18 = smov %s8037_s19 }
 0x5db   : > { %s9349_s19 = smov %s8041_s20  ;;  %s9350_s20 = smov %s8118_s27 }
 0x5dc   : > { %s9351_s21 = smov %s8107_s24  ;;  %18 = sbr.rel (!%p16_p12) target bundleno = 4 (0x4), region = 91 }
 0x5e1   :  { %5769 = vsyncpa [#allocation5], 1 }
 0x5e2   :  { %5771 = vsyncpa [#allocation5 + $0x1], 1 }
 0x5e3   :  { %5772 = vsyncpa [#allocation6], 1 }
 0x5e4   :  { %5774 = vsyncpa [#allocation6 + $0x1], 1 }

</bundles_post_ra>
